<compile_context>
chip_gen: v7x
topology: tpu7x:2x2x1
jax: 0.10.0
libtpu: 0.0.40
codegen_flags: <defaults>
</compile_context>

<pallas_src>
import jax
import jax.numpy as jnp
from jax.experimental import pallas as pl
from jax.experimental.pallas import tpu as pltpu

LANE = 128                 # lane-group width: mu lives in [0,128), logvar in [128,256)
MULV_PAD = 2 * LANE        # fused mu|logvar projection output width


def _round_up(a, m):
    return ((a + m - 1) // m) * m


def vae_kernel(
    x_ref, eps_ref,
    w1_ref, b1_ref,
    wmulv_ref, bmulv_ref,
    wd_ref, bd_ref,
    wo_ref, bo_ref,
    recon_ref, mulv_ref,
):
    # ---- encode ----
    x = x_ref[...].astype(jnp.bfloat16)                               # cast in-kernel
    h = jnp.dot(x, w1_ref[...], preferred_element_type=jnp.float32) + b1_ref[...]
    h = jnp.maximum(h, 0.0)                                           # relu, f32 [TM, 400]
    hb = h.astype(jnp.bfloat16)

    # fused mu/logvar projection -> lane-dense [TM, 256]
    # (mu in lanes [0,128), logvar in [128,256), padding lanes are zero)
    mulv = jnp.dot(hb, wmulv_ref[...], preferred_element_type=jnp.float32) + bmulv_ref[...]
    mulv_ref[...] = mulv                                              # lane-dense store

    mu128 = mulv[:, :LANE]                                            # [TM, 128] (lane-aligned)
    lv128 = mulv[:, LANE:]                                            # [TM, 128] (lane-aligned)

    # ---- reparameterize (f32 epilogue, full 128-lane width) ----
    # padded lanes: mu=0, logvar=0 -> exp(0)=1, eps pad=0 -> z pad = 0
    z = mu128 + eps_ref[...] * jnp.exp(0.5 * lv128)                   # [TM, 128] f32
    zb = z.astype(jnp.bfloat16)

    # ---- decode ----  (wd rows [L,128) are zero, so padded lanes contribute 0)
    hd = jnp.dot(zb, wd_ref[...], preferred_element_type=jnp.float32) + bd_ref[...]
    hd = jnp.maximum(hd, 0.0)                                         # relu, f32 [TM, 400]
    hdb = hd.astype(jnp.bfloat16)

    logits = jnp.dot(hdb, wo_ref[...], preferred_element_type=jnp.float32) + bo_ref[...]
    # sigmoid(x) = 0.5 * (tanh(0.5 x) + 1): single EUP transcendental per element
    recon_ref[...] = (0.5 * (jnp.tanh(0.5 * logits) + 1.0)).astype(recon_ref.dtype)


def prepare_params(params, latent):
    """One-time weight prep (bf16 cast, mu/logvar fusion, padding).

    Do this at init time, NOT per forward call, so the per-call path never
    re-reads / re-writes the weights in HBM.
    """
    bf = jnp.bfloat16
    H = params["b1"].shape[-1]
    L = latent
    assert L <= LANE

    # fused, lane-group-aligned mu|logvar projection: [H, 256]
    wmulv = jnp.zeros((H, MULV_PAD), jnp.float32)
    wmulv = wmulv.at[:, :L].set(params["wmu"])
    wmulv = wmulv.at[:, LANE:LANE + L].set(params["wlv"])
    bmulv = jnp.zeros((1, MULV_PAD), jnp.float32)
    bmulv = bmulv.at[:, :L].set(params["bmu"])
    bmulv = bmulv.at[:, LANE:LANE + L].set(params["blv"])

    # decode weight zero-padded to a full 128-row contraction: [128, H]
    wd = jnp.zeros((LANE, H), jnp.float32).at[:L, :].set(params["wd"])

    # NOTE: int8 weight quantization of w1/wo would halve the weight stream on
    # v5e/v6e but is NOT portable to v7x (fp8-only MXU); kept bf16 here.
    return dict(
        w1=params["w1"].astype(bf), b1=params["b1"],
        wmulv=wmulv.astype(bf), bmulv=bmulv,
        wd=wd.astype(bf), bd=params["bd"],
        wo=params["wo"].astype(bf), bo=params["bo"],
        latent=L,
    )


def vae_forward(x, eps, prep, *, tm=None):
    """x: [B, 784] f32, eps: [B, latent] f32.  Returns (recon[bf16], mu, logvar)."""
    B, D = x.shape
    L = prep["latent"]
    H = prep["b1"].shape[-1]

    # Row tile: as large as possible (<=512, multiple of 128) while keeping
    # >=2 grid steps when the batch allows it, so both v7x TCs stay busy.
    if tm is None:
        tm = max(128, min(512, _round_up(pl.cdiv(B, 2), 128)))

    n_tiles = pl.cdiv(B, tm)
    Bp = n_tiles * tm

    # eps padded to a full 128-lane group (zeros in padded lanes)
    eps_p = jnp.zeros((Bp, LANE), jnp.float32).at[:B, :L].set(eps)
    x_p = x if Bp == B else jnp.pad(x, ((0, Bp - B), (0, 0)))

    row_map = lambda i: (i, 0)      # streamed per grid step
    const_map = lambda i: (0, 0)    # resident across the grid (weights / biases)

    flops = 2 * Bp * (D * H + H * MULV_PAD + LANE * H + H * D)
    transcendentals = Bp * (LANE + D)          # exp (reparam) + tanh (sigmoid)
    bytes_accessed = (
        2 * (prep["w1"].size + prep["wmulv"].size + prep["wd"].size + prep["wo"].size)
        + 4 * (x_p.size + eps_p.size + Bp * MULV_PAD
               + prep["b1"].size + prep["bmulv"].size + prep["bd"].size + prep["bo"].size)
        + 2 * Bp * D                            # bf16 recon write
    )
    cost = pl.CostEstimate(flops=flops, transcendentals=transcendentals,
                           bytes_accessed=bytes_accessed)

    # NOTE: weight specs could use pipeline_mode=pl.Buffered(1) to single-buffer
    # the ~1.5 MiB of resident weights on v7x; footprint is already far under
    # the 32 MiB limit here, so default double-buffering is kept.
    recon_p, mulv_p = pl.pallas_call(
        vae_kernel,
        out_shape=(
            jax.ShapeDtypeStruct((Bp, D), jnp.bfloat16),              # recon (bf16 store)
            jax.ShapeDtypeStruct((Bp, MULV_PAD), jnp.float32),        # [mu | pad | logvar | pad]
        ),
        grid=(n_tiles,),
        in_specs=[
            pl.BlockSpec((tm, D), row_map),            # x (f32, cast in-kernel)
            pl.BlockSpec((tm, LANE), row_map),         # eps (padded to 128 lanes)
            pl.BlockSpec((D, H), const_map),           # w1
            pl.BlockSpec((1, H), const_map),           # b1
            pl.BlockSpec((H, MULV_PAD), const_map),    # wmulv (fused mu|logvar)
            pl.BlockSpec((1, MULV_PAD), const_map),    # bmulv
            pl.BlockSpec((LANE, H), const_map),        # wd (zero-padded rows)
            pl.BlockSpec((1, H), const_map),           # bd
            pl.BlockSpec((H, D), const_map),           # wo
            pl.BlockSpec((1, D), const_map),           # bo
        ],
        out_specs=(
            pl.BlockSpec((tm, D), row_map),
            pl.BlockSpec((tm, MULV_PAD), row_map),
        ),
        compiler_params=pltpu.CompilerParams(
            dimension_semantics=("parallel",),          # megacore sharding on v7x
            vmem_limit_bytes=32 << 20,
        ),
        cost_estimate=cost,
    )(x_p, eps_p, prep["w1"], prep["b1"], prep["wmulv"], prep["bmulv"],
      prep["wd"], prep["bd"], prep["wo"], prep["bo"])

    recon = recon_p[:B]                         # bf16; cast downstream if needed
    mu = mulv_p[:B, :L]
    logvar = mulv_p[:B, LANE:LANE + L]
    return recon, mu, logvar


def init_params(key, d_in=28 * 28, hidden=400, latent=32):
    """Mimics torch.nn.Linear default init (uniform +-1/sqrt(fan_in)).

    Weights stored [in, out]; biases [1, out].
    """
    def linear(k, fan_in, fan_out):
        kw, kb = jax.random.split(k)
        bound = 1.0 / jnp.sqrt(fan_in)
        w = jax.random.uniform(kw, (fan_in, fan_out), jnp.float32, -bound, bound)
        b = jax.random.uniform(kb, (1, fan_out), jnp.float32, -bound, bound)
        return w, b

    k1, k2, k3, k4, k5 = jax.random.split(key, 5)
    w1, b1 = linear(k1, d_in, hidden)
    wmu, bmu = linear(k2, hidden, latent)
    wlv, blv = linear(k3, hidden, latent)
    wd, bd = linear(k4, latent, hidden)
    wo, bo = linear(k5, hidden, d_in)
    return dict(w1=w1, b1=b1, wmu=wmu, bmu=bmu, wlv=wlv, blv=blv,
                wd=wd, bd=bd, wo=wo, bo=bo)


def reference_forward(x, eps, p):
    """Pure-JAX reference with the same bf16-input / f32-accumulate numerics."""
    bf, f32 = jnp.bfloat16, jnp.float32
    xb = x.astype(bf)
    h = jnp.maximum(
        jnp.dot(xb, p["w1"].astype(bf), preferred_element_type=f32) + p["b1"], 0.0)
    hb = h.astype(bf)
    mu = jnp.dot(hb, p["wmu"].astype(bf), preferred_element_type=f32) + p["bmu"]
    logvar = jnp.dot(hb, p["wlv"].astype(bf), preferred_element_type=f32) + p["blv"]
    z = mu + eps * jnp.exp(0.5 * logvar)
    zb = z.astype(bf)
    hd = jnp.maximum(
        jnp.dot(zb, p["wd"].astype(bf), preferred_element_type=f32) + p["bd"], 0.0)
    hdb = hd.astype(bf)
    recon = jax.nn.sigmoid(
        jnp.dot(hdb, p["wo"].astype(bf), preferred_element_type=f32) + p["bo"])
    return recon, mu, logvar


if __name__ == "__main__":
    B = 256            # -> tm=128, 2 grid steps (keeps both v7x TCs busy)
    D_IN = 28 * 28
    LATENT = 32

    key = jax.random.PRNGKey(0)
    k_param, k_x, k_eps = jax.random.split(key, 3)

    params = init_params(k_param, d_in=D_IN, hidden=400, latent=LATENT)
    prep = prepare_params(params, latent=LATENT)               # one-time weight prep
    x = jax.random.uniform(k_x, (B, D_IN), jnp.float32)        # flattened "image" batch
    eps = jax.random.normal(k_eps, (B, LATENT), jnp.float32)   # reparameterization noise

    recon, mu, logvar = jax.block_until_ready(vae_forward(x, eps, prep))

    # correctness check vs pure-JAX reference (same bf16/f32 mixed precision)
    r_ref, mu_ref, lv_ref = reference_forward(x, eps, params)
    assert recon.shape == (B, D_IN) and mu.shape == (B, LATENT) and logvar.shape == (B, LATENT)
    assert jnp.allclose(recon.astype(jnp.float32), r_ref, atol=2e-2, rtol=2e-2)
    assert jnp.allclose(mu, mu_ref, atol=2e-2, rtol=2e-2)
    assert jnp.allclose(logvar, lv_ref, atol=2e-2, rtol=2e-2)

    print("KERNEL_OK")
</pallas_src>

<mosaic_0001>
module attributes {stable_mosaic.version = 11 : i64} {
  func.func @vae_kernel(%arg0: i32, %arg1: memref<128x784xf32, #tpu.memory_space<vmem>>, %arg2: memref<128x128xf32, #tpu.memory_space<vmem>>, %arg3: memref<784x400xbf16, #tpu.memory_space<vmem>>, %arg4: memref<1x400xf32, #tpu.memory_space<vmem>>, %arg5: memref<400x256xbf16, #tpu.memory_space<vmem>>, %arg6: memref<1x256xf32, #tpu.memory_space<vmem>>, %arg7: memref<128x400xbf16, #tpu.memory_space<vmem>>, %arg8: memref<1x400xf32, #tpu.memory_space<vmem>>, %arg9: memref<400x784xbf16, #tpu.memory_space<vmem>>, %arg10: memref<1x784xf32, #tpu.memory_space<vmem>>, %arg11: memref<128x784xbf16, #tpu.memory_space<vmem>>, %arg12: memref<128x256xf32, #tpu.memory_space<vmem>>) attributes {dimension_semantics = [#tpu.dimension_semantics<parallel>], iteration_bounds = array<i64: 2>, scalar_prefetch = 0 : i64, scratch_operands = 0 : i64, tpu.core_type = #tpu.core_type<tc>, window_params = [{transform_indices = @transform_0, window_bounds = array<i64: 128, 784>}, {transform_indices = @transform_1, window_bounds = array<i64: 128, 128>}, {pipeline_mode = #tpu.pipeline_mode<synchronous>, transform_indices = @transform_2, window_bounds = array<i64: 784, 400>}, {pipeline_mode = #tpu.pipeline_mode<synchronous>, transform_indices = @transform_3, window_bounds = array<i64: 1, 400>}, {pipeline_mode = #tpu.pipeline_mode<synchronous>, transform_indices = @transform_4, window_bounds = array<i64: 400, 256>}, {pipeline_mode = #tpu.pipeline_mode<synchronous>, transform_indices = @transform_5, window_bounds = array<i64: 1, 256>}, {pipeline_mode = #tpu.pipeline_mode<synchronous>, transform_indices = @transform_6, window_bounds = array<i64: 128, 400>}, {pipeline_mode = #tpu.pipeline_mode<synchronous>, transform_indices = @transform_7, window_bounds = array<i64: 1, 400>}, {pipeline_mode = #tpu.pipeline_mode<synchronous>, transform_indices = @transform_8, window_bounds = array<i64: 400, 784>}, {pipeline_mode = #tpu.pipeline_mode<synchronous>, transform_indices = @transform_9, window_bounds = array<i64: 1, 784>}, {transform_indices = @transform_10, window_bounds = array<i64: 128, 784>}, {transform_indices = @transform_11, window_bounds = array<i64: 128, 256>}]} {
    %c0 = arith.constant 0 : index
    %c0_0 = arith.constant 0 : index
    %0 = vector.load %arg1[%c0, %c0_0] : memref<128x784xf32, #tpu.memory_space<vmem>>, vector<128x784xf32>
    %1 = arith.truncf %0 : vector<128x784xf32> to vector<128x784xbf16>
    %c0_1 = arith.constant 0 : index
    %c0_2 = arith.constant 0 : index
    %2 = vector.load %arg3[%c0_1, %c0_2] : memref<784x400xbf16, #tpu.memory_space<vmem>>, vector<784x400xbf16>
    %cst = arith.constant dense<0.000000e+00> : vector<128x400xf32>
    %3 = tpu.matmul %1, %2, %cst {dimension_numbers = #tpu.dot_dimension_numbers<[1], [0], [0], [1], [0, 0, 1, 1], [], []>} : vector<128x784xbf16>, vector<784x400xbf16>, vector<128x400xf32> -> vector<128x400xf32>
    %c0_3 = arith.constant 0 : index
    %c0_4 = arith.constant 0 : index
    %4 = vector.load %arg4[%c0_3, %c0_4] : memref<1x400xf32, #tpu.memory_space<vmem>>, vector<1x400xf32>
    %5 = vector.broadcast %4 : vector<1x400xf32> to vector<128x400xf32>
    %6 = arith.addf %3, %5 : vector<128x400xf32>
    %cst_5 = arith.constant 0.000000e+00 : f32
    %7 = vector.broadcast %cst_5 : f32 to vector<128x400xf32>
    %8 = arith.maximumf %6, %7 : vector<128x400xf32>
    %9 = arith.truncf %8 : vector<128x400xf32> to vector<128x400xbf16>
    %c0_6 = arith.constant 0 : index
    %c0_7 = arith.constant 0 : index
    %10 = vector.load %arg5[%c0_6, %c0_7] : memref<400x256xbf16, #tpu.memory_space<vmem>>, vector<400x256xbf16>
    %cst_8 = arith.constant dense<0.000000e+00> : vector<128x256xf32>
    %11 = tpu.matmul %9, %10, %cst_8 {dimension_numbers = #tpu.dot_dimension_numbers<[1], [0], [0], [1], [0, 0, 1, 1], [], []>} : vector<128x400xbf16>, vector<400x256xbf16>, vector<128x256xf32> -> vector<128x256xf32>
    %c0_9 = arith.constant 0 : index
    %c0_10 = arith.constant 0 : index
    %12 = vector.load %arg6[%c0_9, %c0_10] : memref<1x256xf32, #tpu.memory_space<vmem>>, vector<1x256xf32>
    %13 = vector.broadcast %12 : vector<1x256xf32> to vector<128x256xf32>
    %14 = arith.addf %11, %13 : vector<128x256xf32>
    %c0_11 = arith.constant 0 : index
    %c0_12 = arith.constant 0 : index
    %15 = vector.load %arg12[%c0_11, %c0_12] : memref<128x256xf32, #tpu.memory_space<vmem>>, vector<128x256xf32>
    tpu.vector_store %arg12[%c0_11, %c0_12], %14 {strides = array<i32>} : memref<128x256xf32, #tpu.memory_space<vmem>>, vector<128x256xf32>,
    %16 = vector.extract_strided_slice %14 {offsets = [0, 0], sizes = [128, 128], strides = [1, 1]} : vector<128x256xf32> to vector<128x128xf32>
    %17 = vector.extract_strided_slice %14 {offsets = [0, 128], sizes = [128, 128], strides = [1, 1]} : vector<128x256xf32> to vector<128x128xf32>
    %c0_13 = arith.constant 0 : index
    %c0_14 = arith.constant 0 : index
    %18 = vector.load %arg2[%c0_13, %c0_14] : memref<128x128xf32, #tpu.memory_space<vmem>>, vector<128x128xf32>
    %cst_15 = arith.constant 5.000000e-01 : f32
    %19 = vector.broadcast %cst_15 : f32 to vector<128x128xf32>
    %20 = arith.mulf %19, %17 : vector<128x128xf32>
    %21 = math.exp %20 : vector<128x128xf32>
    %22 = arith.mulf %18, %21 : vector<128x128xf32>
    %23 = arith.addf %16, %22 : vector<128x128xf32>
    %24 = arith.truncf %23 : vector<128x128xf32> to vector<128x128xbf16>
    %c0_16 = arith.constant 0 : index
    %c0_17 = arith.constant 0 : index
    %25 = vector.load %arg7[%c0_16, %c0_17] : memref<128x400xbf16, #tpu.memory_space<vmem>>, vector<128x400xbf16>
    %cst_18 = arith.constant dense<0.000000e+00> : vector<128x400xf32>
    %26 = tpu.matmul %24, %25, %cst_18 {dimension_numbers = #tpu.dot_dimension_numbers<[1], [0], [0], [1], [0, 0, 1, 1], [], []>} : vector<128x128xbf16>, vector<128x400xbf16>, vector<128x400xf32> -> vector<128x400xf32>
    %c0_19 = arith.constant 0 : index
    %c0_20 = arith.constant 0 : index
    %27 = vector.load %arg8[%c0_19, %c0_20] : memref<1x400xf32, #tpu.memory_space<vmem>>, vector<1x400xf32>
    %28 = vector.broadcast %27 : vector<1x400xf32> to vector<128x400xf32>
    %29 = arith.addf %26, %28 : vector<128x400xf32>
    %cst_21 = arith.constant 0.000000e+00 : f32
    %30 = vector.broadcast %cst_21 : f32 to vector<128x400xf32>
    %31 = arith.maximumf %29, %30 : vector<128x400xf32>
    %32 = arith.truncf %31 : vector<128x400xf32> to vector<128x400xbf16>
    %c0_22 = arith.constant 0 : index
    %c0_23 = arith.constant 0 : index
    %33 = vector.load %arg9[%c0_22, %c0_23] : memref<400x784xbf16, #tpu.memory_space<vmem>>, vector<400x784xbf16>
    %cst_24 = arith.constant dense<0.000000e+00> : vector<128x784xf32>
    %34 = tpu.matmul %32, %33, %cst_24 {dimension_numbers = #tpu.dot_dimension_numbers<[1], [0], [0], [1], [0, 0, 1, 1], [], []>} : vector<128x400xbf16>, vector<400x784xbf16>, vector<128x784xf32> -> vector<128x784xf32>
    %c0_25 = arith.constant 0 : index
    %c0_26 = arith.constant 0 : index
    %35 = vector.load %arg10[%c0_25, %c0_26] : memref<1x784xf32, #tpu.memory_space<vmem>>, vector<1x784xf32>
    %36 = vector.broadcast %35 : vector<1x784xf32> to vector<128x784xf32>
    %37 = arith.addf %34, %36 : vector<128x784xf32>
    %cst_27 = arith.constant 5.000000e-01 : f32
    %38 = vector.broadcast %cst_27 : f32 to vector<128x784xf32>
    %39 = arith.mulf %38, %37 : vector<128x784xf32>
    %40 = math.tanh %39 : vector<128x784xf32>
    %cst_28 = arith.constant 1.000000e+00 : f32
    %41 = vector.broadcast %cst_28 : f32 to vector<128x784xf32>
    %42 = arith.addf %40, %41 : vector<128x784xf32>
    %cst_29 = arith.constant 5.000000e-01 : f32
    %43 = vector.broadcast %cst_29 : f32 to vector<128x784xf32>
    %44 = arith.mulf %43, %42 : vector<128x784xf32>
    %45 = arith.truncf %44 : vector<128x784xf32> to vector<128x784xbf16>
    %c0_30 = arith.constant 0 : index
    %c0_31 = arith.constant 0 : index
    %46 = vector.load %arg11[%c0_30, %c0_31] : memref<128x784xbf16, #tpu.memory_space<vmem>>, vector<128x784xbf16>
    tpu.vector_store %arg11[%c0_30, %c0_31], %45 {strides = array<i32>} : memref<128x784xbf16, #tpu.memory_space<vmem>>, vector<128x784xbf16>,
    return
  }
  func.func @transform_0(%arg0: i32) -> (i32, i32) {
    %c0_i32 = arith.constant 0 : i32
    %c0_i32_0 = arith.constant 0 : i32
    return %arg0, %c0_i32 : i32, i32
  }
  func.func @transform_1(%arg0: i32) -> (i32, i32) {
    %c0_i32 = arith.constant 0 : i32
    %c0_i32_0 = arith.constant 0 : i32
    return %arg0, %c0_i32 : i32, i32
  }
  func.func @transform_2(%arg0: i32) -> (i32, i32) {
    %c0_i32 = arith.constant 0 : i32
    %c0_i32_0 = arith.constant 0 : i32
    %c0_i32_1 = arith.constant 0 : i32
    return %c0_i32, %c0_i32_0 : i32, i32
  }
  func.func @transform_3(%arg0: i32) -> (i32, i32) {
    %c0_i32 = arith.constant 0 : i32
    %c0_i32_0 = arith.constant 0 : i32
    %c0_i32_1 = arith.constant 0 : i32
    return %c0_i32, %c0_i32_0 : i32, i32
  }
  func.func @transform_4(%arg0: i32) -> (i32, i32) {
    %c0_i32 = arith.constant 0 : i32
    %c0_i32_0 = arith.constant 0 : i32
    %c0_i32_1 = arith.constant 0 : i32
    return %c0_i32, %c0_i32_0 : i32, i32
  }
  func.func @transform_5(%arg0: i32) -> (i32, i32) {
    %c0_i32 = arith.constant 0 : i32
    %c0_i32_0 = arith.constant 0 : i32
    %c0_i32_1 = arith.constant 0 : i32
    return %c0_i32, %c0_i32_0 : i32, i32
  }
  func.func @transform_6(%arg0: i32) -> (i32, i32) {
    %c0_i32 = arith.constant 0 : i32
    %c0_i32_0 = arith.constant 0 : i32
    %c0_i32_1 = arith.constant 0 : i32
    return %c0_i32, %c0_i32_0 : i32, i32
  }
  func.func @transform_7(%arg0: i32) -> (i32, i32) {
    %c0_i32 = arith.constant 0 : i32
    %c0_i32_0 = arith.constant 0 : i32
    %c0_i32_1 = arith.constant 0 : i32
    return %c0_i32, %c0_i32_0 : i32, i32
  }
  func.func @transform_8(%arg0: i32) -> (i32, i32) {
    %c0_i32 = arith.constant 0 : i32
    %c0_i32_0 = arith.constant 0 : i32
    %c0_i32_1 = arith.constant 0 : i32
    return %c0_i32, %c0_i32_0 : i32, i32
  }
  func.func @transform_9(%arg0: i32) -> (i32, i32) {
    %c0_i32 = arith.constant 0 : i32
    %c0_i32_0 = arith.constant 0 : i32
    %c0_i32_1 = arith.constant 0 : i32
    return %c0_i32, %c0_i32_0 : i32, i32
  }
  func.func @transform_10(%arg0: i32) -> (i32, i32) {
    %c0_i32 = arith.constant 0 : i32
    %c0_i32_0 = arith.constant 0 : i32
    return %arg0, %c0_i32 : i32, i32
  }
  func.func @transform_11(%arg0: i32) -> (i32, i32) {
    %c0_i32 = arith.constant 0 : i32
    %c0_i32_0 = arith.constant 0 : i32
    return %arg0, %c0_i32 : i32, i32
  }
}

</mosaic_0001>

<bundles_post_ra>
// kernel: tpu_custom_call.1
= control target key start
LH: loop header
LB: loop body
LE: loop exit
PB: predicated region body
PF: predicated region fallthrough
CT: control target
= control target key end

     0   :  { %17 = vsyncpa [#allocation3], 0  ;;  %s12090_s0 = inlined_call_operand.vmem [shape: f32[256,784], index: 0, kind: input, shape index: {}]   ;;  %s12091_s1 = inlined_call_operand.vmem [shape: f32[256,128], index: 1, kind: input, shape index: {}]   ;;  %s12092_s2 = inlined_call_operand.vmem [shape: bf16[784,400], index: 2, kind: input, shape index: {}]   ;;  %s12093_s3 = inlined_call_operand.vmem [shape: f32[1,400], index: 3, kind: input, shape index: {}]   ;;  %s12094_s4 = inlined_call_operand.vmem [shape: bf16[400,256], index: 4, kind: input, shape index: {}]   ;;  %s12095_s5 = inlined_call_operand.vmem [shape: f32[1,256], index: 5, kind: input, shape index: {}]   ;;  %s12096_s6 = inlined_call_operand.vmem [shape: bf16[128,400], index: 6, kind: input, shape index: {}]   ;;  %s12097_s7 = inlined_call_operand.vmem [shape: f32[1,400], index: 7, kind: input, shape index: {}]   ;;  %s12098_s8 = inlined_call_operand.vmem [shape: bf16[400,784], index: 8, kind: input, shape index: {}]   ;;  %s12099_s9 = inlined_call_operand.vmem [shape: f32[1,784], index: 9, kind: input, shape index: {}]   ;;  %s12100_s10 = inlined_call_operand.vmem [shape: bf16[256,784], index: 10, kind: output, shape index: {0}]   ;;  %s12101_s11 = inlined_call_operand.hbm [shape: f32[256,256], index: 11, kind: output, shape index: {1}]  }
   0x1   :  { %19 = vsyncpa [#allocation3 + $0x1], 0  ;;  %s9406_s17 = smov 0   ;;  %s9408_s18 = smov 0  }
   0x2   :  { %s9410_s19 = smov 0   ;;  %s9412_s20 = smov 0  }
   0x3 LB: > { %12105 = sst [smem:[#allocation5_spill]] %s9336_s19  ;;  %s9427_s21 = sadd.s32 4294967295, %s9340_s20   ;;  %s9340_s20 = sphi %s9412_s20, %s12110_s20   ;;  %s9336_s19 = sphi %s9410_s19, %s12112_s19   ;;  %s9332_s18 = sphi %s9408_s18, %s12114_s18   ;;  %s9328_s17 = sphi %s9406_s17, %s12113_s17  }
   0x4   : > { %s7078_s22 = sadd.s32 4294967294, %s9340_s20   ;;  %s9431_s23 = sadd.s32 1, %s9340_s20  }
   0x5   : > { %12106 = sst [smem:[#allocation6_spill]] %s9431_s23  ;;  %s278_s24 = sadd.s32 1, %s9336_s19 }
   0x6   : > { %s275_s25 = ssub.s32 %s9340_s20, %s9431_s23  ;;  %p288_p0 = scmp.ne.s32.totalorder %s9336_s19, %s9332_s18 }
   0x7   : > { %p276_p1 = scmp.eq.s32.totalorder %s275_s25, 0  ;;  %p289_p2 = scmp.eq.s32.totalorder %s9427_s21, 1 }
   0x8   : > { %p294_p3 = scmp.ne.s32.totalorder %s9332_s18, %s9328_s17  ;;  %p295_p4 = scmp.eq.s32.totalorder %s7078_s22, 1 }
   0x9   : > { %s9442_s26 = scalar_select %p276_p1, %s9336_s19, %s278_s24  }
   0xa   : > { %p9444_p5 = por %p289_p2, %p288_p0  ;;  %p9448_p6 = por %p295_p4, %p294_p3 }
   0xb   : > { %12107 = sst [smem:[#allocation7_spill]] %s9442_s26  ;;  %p7081_p7 = scmp.ge.s32.totalorder %s9340_s20, 1 }
   0xc   : > { %p356_p8 = scmp.lt.s32.totalorder %s9340_s20, 3 }
   0xe   : > { %p357_p9 = pnand %p7081_p7, %p356_p8 }
   0xf   : > { %v8354_v0 = vld [vmem:[%s12092_s2 + $0x4] ss:$16 sps:$4 sm:$0xff] (!%p357_p9)   ;;  %v8356_v1 = vld [vmem:[%s12092_s2 + $0xc] ss:$16 sps:$4 sm:$0xff] (!%p357_p9)   ;;  %v8358_v2 = vld [vmem:[%s12092_s2] ss:$16 sps:$4 sm:$0xff] (!%p357_p9)  }
  0x10   : > { %360 = sbr.rel (%p357_p9) target bundleno = 1510 (0x5e6), region = 60  ;;  %1821 = vmatprep.subr.bf16.mxu0 (!%p357_p9), %v8354_v0  ;;  %v8359_v3 = vld [vmem:[%s12092_s2 + $0x8] ss:$16 sps:$4 sm:$0xff] (!%p357_p9)   ;;  %2273 = vmatprep.subr.bf16.mxu1 (!%p357_p9), %v8356_v1  ;;  %v8360_v4 = vld [vmem:[%s12092_s2 + $0x24] ss:$16 sps:$4 sm:$0xff] (!%p357_p9)   ;;  %s7083_s24 = sshll.u32 (!%p357_p9), %s9427_s21, 4 }
  0x11   : > { %1822 = vmatpush1.bf16.msra.mxu0 (!%p357_p9), %v8358_v2  ;;  %2274 = vmatpush1.bf16.msra.mxu1 (!%p357_p9), %v8359_v3  ;;  %v8362_v5 = vld [vmem:[%s12092_s2 + $0x2c] ss:$16 sps:$4 sm:$0xff] (!%p357_p9)   ;;  %v8364_v6 = vld [vmem:[%s12092_s2 + $0x20] ss:$16 sps:$4 sm:$0xff] (!%p357_p9)   ;;  %v8365_v7 = vld [vmem:[%s12092_s2 + $0x28] ss:$16 sps:$4 sm:$0xff] (!%p357_p9)  }
  0x12   : > { %1823 = vmatprep.subr.bf16.mxu0 (!%p357_p9), %v8360_v4  ;;  %2275 = vmatprep.subr.bf16.mxu1 (!%p357_p9), %v8362_v5  ;;  %v8366_v8 = vld [vmem:[%s12092_s2 + $0x44] ss:$16 sps:$4 sm:$0xff] (!%p357_p9)   ;;  %v8368_v9 = vld [vmem:[%s12092_s2 + $0x4c] ss:$16 sps:$4 sm:$0xff] (!%p357_p9)   ;;  %v8370_v10 = vld [vmem:[%s12092_s2 + $0x40] ss:$16 sps:$4 sm:$0xff] (!%p357_p9)  }
  0x13   : > { %v8371_v11 = vld [vmem:[%s12092_s2 + $0x48] ss:$16 sps:$4 sm:$0xff] (!%p357_p9)   ;;  %v8372_v12 = vld [vmem:[%s12092_s2 + $0x64] ss:$16 sps:$4 sm:$0xff] (!%p357_p9)   ;;  %v8374_v13 = vld [vmem:[%s12092_s2 + $0x6c] ss:$16 sps:$4 sm:$0xff] (!%p357_p9)  }
  0x14   : > { %v8376_v14 = vld [vmem:[%s12092_s2 + $0x60] ss:$16 sps:$4 sm:$0xff] (!%p357_p9)   ;;  %v8377_v15 = vld [vmem:[%s12092_s2 + $0x68] ss:$16 sps:$4 sm:$0xff] (!%p357_p9)   ;;  %v8378_v16 = vld [vmem:[%s12092_s2 + $0x84] ss:$16 sps:$4 sm:$0xff] (!%p357_p9)  }
  0x15   : > { %1824 = vmatpush1.bf16.msra.mxu0 (!%p357_p9), %v8364_v6  ;;  %2276 = vmatpush1.bf16.msra.mxu1 (!%p357_p9), %v8365_v7  ;;  %v8380_v17 = vld [vmem:[%s12092_s2 + $0x8c] ss:$16 sps:$4 sm:$0xff] (!%p357_p9)   ;;  %v8382_v18 = vld [vmem:[%s12092_s2 + $0x80] ss:$16 sps:$4 sm:$0xff] (!%p357_p9)   ;;  %v8383_v19 = vld [vmem:[%s12092_s2 + $0x88] ss:$16 sps:$4 sm:$0xff] (!%p357_p9)  }
  0x16   : > { %1825 = vmatprep.subr.bf16.mxu0 (!%p357_p9), %v8366_v8  ;;  %2277 = vmatprep.subr.bf16.mxu1 (!%p357_p9), %v8368_v9  ;;  %v8384_v20 = vld [vmem:[%s12092_s2 + $0xa4] ss:$16 sps:$4 sm:$0xff] (!%p357_p9)   ;;  %v8386_v21 = vld [vmem:[%s12092_s2 + $0xac] ss:$16 sps:$4 sm:$0xff] (!%p357_p9)   ;;  %v8388_v22 = vld [vmem:[%s12092_s2 + $0xa0] ss:$16 sps:$4 sm:$0xff] (!%p357_p9)  }
  0x17   : > { %v8389_v23 = vld [vmem:[%s12092_s2 + $0xa8] ss:$16 sps:$4 sm:$0xff]   ;;  %v8390_v24 = vld [vmem:[%s12092_s2 + $0xc4] ss:$16 sps:$4 sm:$0xff]   ;;  %v8392_v25 = vld [vmem:[%s12092_s2 + $0xcc] ss:$16 sps:$4 sm:$0xff]  }
  0x18   : > { %v8394_v26 = vld [vmem:[%s12092_s2 + $0xc0] ss:$16 sps:$4 sm:$0xff]   ;;  %v8395_v27 = vld [vmem:[%s12092_s2 + $0xc8] ss:$16 sps:$4 sm:$0xff]   ;;  %v8396_v28 = vld [vmem:[%s12092_s2 + $0xe4] ss:$16 sps:$4 sm:$0xff]  }
  0x19   : > { %1826 = vmatpush1.bf16.msra.mxu0 %v8370_v10  ;;  %2278 = vmatpush1.bf16.msra.mxu1 %v8371_v11  ;;  %v8398_v29 = vld [vmem:[%s12092_s2 + $0xec] ss:$16 sps:$4 sm:$0xff]   ;;  %v8400_v30 = vld [vmem:[%s12092_s2 + $0xe0] ss:$16 sps:$4 sm:$0xff]   ;;  %p409_p10 = scmp.lt.s32.totalorder %s7083_s24, 31  ;;  %vm1796_vm0 = vcmask 130048  }
  0x1a   : > { %1827 = vmatprep.subr.bf16.mxu0 %v8372_v12  ;;  %2279 = vmatprep.subr.bf16.mxu1 %v8374_v13  ;;  %v8401_v31 = vld [vmem:[%s12092_s2 + $0xe8] ss:$16 sps:$4 sm:$0xff]   ;;  %v8402_v32 = vld [vmem:[%s12092_s2 + $0x104] ss:$16 sps:$4 sm:$0xff]   ;;  %v8404_v33 = vld [vmem:[%s12092_s2 + $0x10c] ss:$16 sps:$4 sm:$0xff]  }
  0x1b   : > { %v8406_v34 = vld [vmem:[%s12092_s2 + $0x100] ss:$16 sps:$4 sm:$0xff]   ;;  %v8407_v35 = vld [vmem:[%s12092_s2 + $0x108] ss:$16 sps:$4 sm:$0xff]   ;;  %s12116_s24 = smov (!%p409_p10, %s7083_s24), 31  ;;  %s405_s19 = sand.u32 1, %s9332_s18  }
  0x1c   : > { %v8408_v36 = vld [vmem:[%s12092_s2 + $0x124] ss:$16 sps:$4 sm:$0xff]   ;;  %v8410_v37 = vld [vmem:[%s12092_s2 + $0x12c] ss:$16 sps:$4 sm:$0xff]   ;;  %v8412_v38 = vld [vmem:[%s12092_s2 + $0x120] ss:$16 sps:$4 sm:$0xff]  }
  0x1d   : > { %1828 = vmatpush1.bf16.msra.mxu0 %v8376_v14  ;;  %2280 = vmatpush1.bf16.msra.mxu1 %v8377_v15  ;;  %s8310_s26 = smul.u32 56, %s12116_s24  ;;  %v8413_v39 = vld [vmem:[%s12092_s2 + $0x128] ss:$16 sps:$4 sm:$0xff]   ;;  %v8414_v40 = vld [vmem:[%s12092_s2 + $0x144] ss:$16 sps:$4 sm:$0xff]   ;;  %s7082_s22 = sshll.u32 %s405_s19, 8 }
  0x1e   : > { %1829 = vmatprep.subr.bf16.mxu0 %v8378_v16  ;;  %2281 = vmatprep.subr.bf16.mxu1 %v8380_v17  ;;  %v8416_v41 = vld [vmem:[%s12092_s2 + $0x14c] ss:$16 sps:$4 sm:$0xff]   ;;  %v8418_v42 = vld [vmem:[%s12092_s2 + $0x140] ss:$16 sps:$4 sm:$0xff]   ;;  %v8419_v43 = vld [vmem:[%s12092_s2 + $0x148] ss:$16 sps:$4 sm:$0xff]  }
  0x1f   : > { %s9593_s23 = scalar_lea.vmem %s12090_s0, %s8310_s26  ;;  %v8420_v44 = vld [vmem:[%s12092_s2 + $0x164] ss:$16 sps:$4 sm:$0xff]   ;;  %v8422_v45 = vld [vmem:[%s12092_s2 + $0x16c] ss:$16 sps:$4 sm:$0xff]   ;;  %v8424_v47 = vld [vmem:[%s12092_s2 + $0x160] ss:$16 sps:$4 sm:$0xff]  }
  0x20   : > { %v431_v46 = vld [vmem:[%s9593_s23 + $0x8] sm:$0xff]  ;;  %v438_v49 = vld [vmem:[%s9593_s23 + $0x40] sm:$0xff]  ;;  %v437_v4 = vld [vmem:[%s9593_s23 + $0x38] sm:$0xff]  ;;  %s10548_s25 = scalar_lea.vmem [#allocation2], %s7082_s22  ;;  %s7086_s29 = sshll.u32 %s12116_s24, 3 }
  0x21   : > { %1830 = vmatpush1.bf16.msra.mxu0 %v8382_v18  ;;  %2282 = vmatpush1.bf16.msra.mxu1 %v8383_v19  ;;  %v8425_v48 = vld [vmem:[%s12092_s2 + $0x168] ss:$16 sps:$4 sm:$0xff]   ;;  %v8426_v50 = vld [vmem:[%s12092_s2 + $0x184] ss:$16 sps:$4 sm:$0xff]   ;;  %v543_v51 = vpack.c.bf16 %v438_v49, %v431_v46  ;;  %v8428_v52 = vld [vmem:[%s12092_s2 + $0x18c] ss:$16 sps:$4 sm:$0xff]   ;;  %s10571_s12 = scalar_lea.vmem %s12091_s1, %s7086_s29 }
  0x22   : > { %1831 = vmatprep.subr.bf16.mxu0 %v8384_v20  ;;  %2283 = vmatprep.subr.bf16.mxu1 %v8386_v21  ;;  %v8430_v53 = vld [vmem:[%s12092_s2 + $0x180] ss:$16 sps:$4 sm:$0xff]   ;;  %v8431_v54 = vld [vmem:[%s12092_s2 + $0x188] ss:$16 sps:$4 sm:$0xff]   ;;  %v8432_v55 = vld [vmem:[%s12092_s2 + $0x1a4] ss:$16 sps:$4 sm:$0xff]  }
  0x23   : > { %1853 = vmatprep.mubr.bf16.mxu0 %v543_v51  ;;  %2305 = vmatprep.mubr.bf16.mxu1 %v543_v51  ;;  %v8434_v56 = vld [vmem:[%s12092_s2 + $0x1ac] ss:$16 sps:$4 sm:$0xff]   ;;  %v8436_v57 = vld [vmem:[%s12092_s2 + $0x1a0] ss:$16 sps:$4 sm:$0xff]   ;;  %v8437_v58 = vld [vmem:[%s12092_s2 + $0x1a8] ss:$16 sps:$4 sm:$0xff]  }
  0x24   : > { %v8438_v59 = vld [vmem:[%s12092_s2 + $0x1c4] ss:$16 sps:$4 sm:$0xff]   ;;  %v8440_v60 = vld [vmem:[%s12092_s2 + $0x1cc] ss:$16 sps:$4 sm:$0xff]   ;;  %v8442_v61 = vld [vmem:[%s12092_s2 + $0x1c0] ss:$16 sps:$4 sm:$0xff]  }
  0x25   : > { %1832 = vmatpush1.bf16.msra.mxu0 %v8388_v22  ;;  %2284 = vmatpush1.bf16.msra.mxu1 %v8389_v23  ;;  %v8443_v62 = vld [vmem:[%s12092_s2 + $0x1c8] ss:$16 sps:$4 sm:$0xff]   ;;  %v8444_v63 = vld [vmem:[%s12092_s2 + $0x1e4] ss:$16 sps:$4 sm:$0xff]   ;;  %v8446_v0 = vld [vmem:[%s12092_s2 + $0x1ec] ss:$16 sps:$4 sm:$0xff]  }
  0x26   : > { %1833 = vmatprep.subr.bf16.mxu0 %v8390_v24  ;;  %2285 = vmatprep.subr.bf16.mxu1 %v8392_v25  ;;  %v8448_v1 = vld [vmem:[%s12092_s2 + $0x1e0] ss:$16 sps:$4 sm:$0xff]   ;;  %v8449_v2 = vld [vmem:[%s12092_s2 + $0x1e8] ss:$16 sps:$4 sm:$0xff]   ;;  %v8452_v5 = vld [vmem:[%s12092_s2 + $0x204] ss:$16 sps:$4 sm:$0xff]  }
  0x27   : > { %v430_v3 = vld [vmem:[%s9593_s23] sm:$0xff]  ;;  %v8455_v6 = vld [vmem:[%s12092_s2 + $0x20c] ss:$16 sps:$4 sm:$0xff]   ;;  %v8453_v9 = vld [vmem:[%s12092_s2 + $0x208] ss:$16 sps:$4 sm:$0xff]   ;;  %s8311_s16 = smul.u32 28, %s12116_s24 }
  0x28   : > { %v8450_v7 = vld [vmem:[%s12092_s2 + $0x200] ss:$16 sps:$4 sm:$0xff]   ;;  %v542_v8 = vpack.c.bf16 %v437_v4, %v430_v3  ;;  %v445_v10 = vld [vmem:[%s9593_s23 + $0x78] sm:$0xff]  ;;  %v8458_v12 = vld [vmem:[%s12092_s2 + $0x224] ss:$16 sps:$4 sm:$0xff]   ;;  %s7733_s29 = sshll.u32 %s9427_s21, 12 }
  0x29   : > { %1834 = vmatpush1.bf16.msra.mxu0 %v8394_v26  ;;  %2286 = vmatpush1.bf16.msra.mxu1 %v8395_v27  ;;  %v452_v11 = vld [vmem:[%s9593_s23 + $0xb0] sm:$0xff]  ;;  %v8461_v13 = vld [vmem:[%s12092_s2 + $0x22c] ss:$16 sps:$4 sm:$0xff]   ;;  %v8459_v16 = vld [vmem:[%s12092_s2 + $0x228] ss:$16 sps:$4 sm:$0xff]   ;;  %s11661_s22 = scalar_lea.vmem %s12100_s10, %s8311_s16  ;;  %s6978_s13 = sshll.u32 %s10548_s25, 4  ;;  %s11867_s13 = int_to_ptr.vmem [resolvable:$true] %s6978_s13 }
  0x2a   : > { %1835 = vmatprep.subr.bf16.mxu0 %v8396_v28  ;;  %2287 = vmatprep.subr.bf16.mxu1 %v8398_v29  ;;  %v8456_v14 = vld [vmem:[%s12092_s2 + $0x220] ss:$16 sps:$4 sm:$0xff]   ;;  %v550_v15 = vpack.c.bf16 %v452_v11, %v445_v10  ;;  %v451_v18 = vld [vmem:[%s9593_s23 + $0xa8] sm:$0xff]  ;;  %v8464_v19 = vld [vmem:[%s12092_s2 + $0x244] ss:$16 sps:$4 sm:$0xff]   ;;  %s11874_s21 = scalar_lea.sflag [#allocation3], %s405_s19 }
  0x2b   : > { %v444_v17 = vld [vmem:[%s9593_s23 + $0x70] sm:$0xff]  ;;  %v8467_v20 = vld [vmem:[%s12092_s2 + $0x24c] ss:$16 sps:$4 sm:$0xff]   ;;  %v8465_v22 = vld [vmem:[%s12092_s2 + $0x248] ss:$16 sps:$4 sm:$0xff]   ;;  %s9343_s14 = smov [#allocation2]  }
  0x2c   : > { %v8462_v21 = vld [vmem:[%s12092_s2 + $0x240] ss:$16 sps:$4 sm:$0xff]   ;;  %v549_v23 = vpack.c.bf16 %v451_v18, %v444_v17  ;;  %v459_v24 = vld [vmem:[%s9593_s23 + $0xe8] sm:$0xff]  ;;  %v8470_v26 = vld [vmem:[%s12092_s2 + $0x264] ss:$16 sps:$4 sm:$0xff]   ;;  %s9282_s15 = sshll.u32 %s9343_s14, 4  ;;  %s9283_s15 = int_to_ptr.vmem [resolvable:$false] %s9282_s15 }
  0x2d   : > { %1836 = vmatpush1.bf16.msra.mxu0 %v8400_v30  ;;  %2288 = vmatpush1.bf16.msra.mxu1 %v8401_v31  ;;  %v466_v25 = vld [vmem:[%s9593_s23 + $0x120] sm:$0xff]  ;;  %v8473_v27 = vld [vmem:[%s12092_s2 + $0x26c] ss:$16 sps:$4 sm:$0xff]   ;;  %v8471_v30 = vld [vmem:[%s12092_s2 + $0x268] ss:$16 sps:$4 sm:$0xff]   ;;  %s9284_s16 = scalar_lea.vmem %s9283_s15, 8192  ;;  %p9285_p0 = scmp.lt.s32.totalorder %s11867_s13, %s9283_s15 }
  0x2e   : > { %1837 = vmatprep.subr.bf16.mxu0 %v8402_v32  ;;  %2289 = vmatprep.subr.bf16.mxu1 %v8404_v33  ;;  %v557_v28 = vpack.c.bf16 %v466_v25, %v459_v24  ;;  %v8468_v29 = vld [vmem:[%s12092_s2 + $0x260] ss:$16 sps:$4 sm:$0xff]   ;;  %v465_v32 = vld [vmem:[%s9593_s23 + $0x118] sm:$0xff]  ;;  %v8476_v33 = vld [vmem:[%s12092_s2 + $0x284] ss:$16 sps:$4 sm:$0xff]  }
  0x2f   : > { %v458_v31 = vld [vmem:[%s9593_s23 + $0xe0] sm:$0xff]  ;;  %v479_v46 = vld [vmem:[%s9593_s23 + $0x188] sm:$0xff]  ;;  %v521_v24 = vld [vmem:[%s9593_s23 + $0x2d8] sm:$0xff] }
  0x30   : > { %v8486_v49 = vld [vmem:[%s12092_s2 + $0x2c0] ss:$16 sps:$4 sm:$0xff]   ;;  %v487_v51 = vld [vmem:[%s9593_s23 + $0x1c8] sm:$0xff]  ;;  %v8506_v4 = vld [vmem:[%s12092_s2 + $0x324] ss:$16 sps:$4 sm:$0xff]  }
  0x31   : > { %1838 = vmatpush1.bf16.msra.mxu0 %v8406_v34  ;;  %2290 = vmatpush1.bf16.msra.mxu1 %v8407_v35  ;;  %v8479_v34 = vld [vmem:[%s12092_s2 + $0x28c] ss:$16 sps:$4 sm:$0xff]   ;;  %v8474_v35 = vld [vmem:[%s12092_s2 + $0x280] ss:$16 sps:$4 sm:$0xff]   ;;  %v8501_v3 = vld [vmem:[%s12092_s2 + $0x308] ss:$16 sps:$4 sm:$0xff]  }
  0x32   : > { %1839 = vmatprep.subr.bf16.mxu0 %v8408_v36  ;;  %2291 = vmatprep.subr.bf16.mxu1 %v8410_v37  ;;  %v8477_v36 = vld [vmem:[%s12092_s2 + $0x288] ss:$16 sps:$4 sm:$0xff]   ;;  %v556_v37 = vpack.c.bf16 %v465_v32, %v458_v31  ;;  %v8512_v11 = vld [vmem:[%s12092_s2 + $0x344] ss:$16 sps:$4 sm:$0xff]  }
  0x33   : > { %v507_v10 = vld [vmem:[%s9593_s23 + $0x268] sm:$0xff]  ;;  %v522_v17 = vld [vmem:[%s9593_s23 + $0x2e0] sm:$0xff]  ;;  %v536_v31 = vld [vmem:[%s9593_s23 + $0x350] sm:$0xff] }
  0x34   : > { %v8518_v18 = vld [vmem:[%s12092_s2 + $0x364] ss:$16 sps:$4 sm:$0xff]  }
  0x35   : > { %1840 = vmatpush1.bf16.msra.mxu0 %v8412_v38  ;;  %2292 = vmatpush1.bf16.msra.mxu1 %v8413_v39  ;;  %v473_v38 = vld [vmem:[%s9593_s23 + $0x158] sm:$0xff]  ;;  %v480_v39 = vld [vmem:[%s9593_s23 + $0x190] sm:$0xff] }
  0x36   : > { %1841 = vmatprep.subr.bf16.mxu0 %v8414_v40  ;;  %2293 = vmatprep.subr.bf16.mxu1 %v8416_v41  ;;  %v8482_v40 = vld [vmem:[%s12092_s2 + $0x2a4] ss:$16 sps:$4 sm:$0xff]   ;;  %v8485_v41 = vld [vmem:[%s12092_s2 + $0x2ac] ss:$16 sps:$4 sm:$0xff]  }
  0x37   : > { %v8524_v25 = vld [vmem:[%s12092_s2 + $0x384] ss:$16 sps:$4 sm:$0xff]  }
  0x38   : > { %v8530_v32 = vld [vmem:[%s12092_s2 + $0x3a4] ss:$16 sps:$4 sm:$0xff]  }
  0x39   : > { %1842 = vmatpush1.bf16.msra.mxu0 %v8418_v42  ;;  %2294 = vmatpush1.bf16.msra.mxu1 %v8419_v43  ;;  %v8480_v42 = vld [vmem:[%s12092_s2 + $0x2a0] ss:$16 sps:$4 sm:$0xff]   ;;  %v564_v43 = vpack.c.bf16 %v480_v39, %v473_v38  ;;  %v535_v38 = vld [vmem:[%s9593_s23 + $0x348] sm:$0xff]  ;;  %v8536_v39 = vld [vmem:[%s12092_s2 + $0x3c4] ss:$16 sps:$4 sm:$0xff]  }
  0x3a   : > { %1843 = vmatprep.subr.bf16.mxu0 %v8420_v44  ;;  %2295 = vmatprep.subr.bf16.mxu1 %v8422_v45  ;;  %v8483_v44 = vld [vmem:[%s12092_s2 + $0x2a8] ss:$16 sps:$4 sm:$0xff]   ;;  %v472_v45 = vld [vmem:[%s9593_s23 + $0x150] sm:$0xff] }
  0x3d   : > { %1844 = vmatpush1.bf16.msra.mxu0 %v8424_v47  ;;  %2296 = vmatpush1.bf16.msra.mxu1 %v8425_v48  ;;  %v8488_v47 = vld [vmem:[%s12092_s2 + $0x2c4] ss:$16 sps:$4 sm:$0xff]   ;;  %v8491_v48 = vld [vmem:[%s12092_s2 + $0x2cc] ss:$16 sps:$4 sm:$0xff]  }
  0x3e   : > { %1845 = vmatprep.subr.bf16.mxu0 %v8426_v50  ;;  %2297 = vmatprep.subr.bf16.mxu1 %v8428_v52  ;;  %v563_v50 = vpack.c.bf16 %v479_v46, %v472_v45  ;;  %v494_v52 = vld [vmem:[%s9593_s23 + $0x200] sm:$0xff]  ;;  %v440_v45 = vld [vmem:[%s9593_s23 + $0x50] sm:$0xff] }
  0x3f   : > { %v8542_v46 = vld [vmem:[%s12092_s2 + $0x3e4] ss:$16 sps:$4 sm:$0xff]  }
  0x41   : > { %1846 = vmatpush1.bf16.msra.mxu0 %v8430_v53  ;;  %2298 = vmatpush1.bf16.msra.mxu1 %v8431_v54  ;;  %v8489_v53 = vld [vmem:[%s12092_s2 + $0x2c8] ss:$16 sps:$4 sm:$0xff]   ;;  %v8494_v54 = vld [vmem:[%s12092_s2 + $0x2e4] ss:$16 sps:$4 sm:$0xff]  }
  0x42   : > { %1847 = vmatprep.subr.bf16.mxu0 %v8432_v55  ;;  %2299 = vmatprep.subr.bf16.mxu1 %v8434_v56  ;;  %v8497_v55 = vld [vmem:[%s12092_s2 + $0x2ec] ss:$16 sps:$4 sm:$0xff]   ;;  %v8492_v56 = vld [vmem:[%s12092_s2 + $0x2e0] ss:$16 sps:$4 sm:$0xff]  }
  0x45   : > { %1848 = vmatpush1.bf16.msra.mxu0 %v8436_v57  ;;  %2300 = vmatpush1.bf16.msra.mxu1 %v8437_v58  ;;  %v8495_v57 = vld [vmem:[%s12092_s2 + $0x2e8] ss:$16 sps:$4 sm:$0xff]   ;;  %v571_v58 = vpack.c.bf16 %v494_v52, %v487_v51  ;;  %v432_v51 = vld [vmem:[%s9593_s23 + $0x10] sm:$0xff] }
  0x46   : > { %1849 = vmatprep.subr.bf16.mxu0 %v8438_v59  ;;  %2301 = vmatprep.subr.bf16.mxu1 %v8440_v60  ;;  %v486_v59 = vld [vmem:[%s9593_s23 + $0x1c0] sm:$0xff]  ;;  %v493_v60 = vld [vmem:[%s9593_s23 + $0x1f8] sm:$0xff]  ;;  %v439_v52 = vld [vmem:[%s9593_s23 + $0x48] sm:$0xff] }
  0x49   : > { %1850 = vmatpush1.bf16.msra.mxu0 %v8442_v61  ;;  %2302 = vmatpush1.bf16.msra.mxu1 %v8443_v62  ;;  %v8500_v61 = vld [vmem:[%s12092_s2 + $0x304] ss:$16 sps:$4 sm:$0xff]   ;;  %v8503_v62 = vld [vmem:[%s12092_s2 + $0x30c] ss:$16 sps:$4 sm:$0xff]  }
  0x4a   : > { %1851 = vmatprep.subr.bf16.mxu0 %v8444_v63  ;;  %2303 = vmatprep.subr.bf16.mxu1 %v8446_v0  ;;  %v570_v63 = vpack.c.bf16 %v493_v60, %v486_v59  ;;  %v501_v0 = vld [vmem:[%s9593_s23 + $0x238] sm:$0xff]  ;;  %v8554_v60 = vld [vmem:[%s12092_s2 + $0x424] ss:$16 sps:$4 sm:$0xff]  }
  0x4b   : > { %v8549_v59 = vld [vmem:[%s12092_s2 + $0x408] ss:$16 sps:$4 sm:$0xff]  }
  0x4d   : > { %1852 = vmatpush1.bf16.msra.mxu0 %v8448_v1  ;;  %2304 = vmatpush1.bf16.msra.mxu1 %v8449_v2  ;;  %v508_v1 = vld [vmem:[%s9593_s23 + $0x270] sm:$0xff] }
  0x4e   : > { %1934 = vmatprep.subr.bf16.mxu0 %v8452_v5  ;;  %2386 = vmatprep.subr.bf16.mxu1 %v8455_v6  ;;  %v8498_v2 = vld [vmem:[%s12092_s2 + $0x300] ss:$16 sps:$4 sm:$0xff]   ;;  %v8509_v5 = vld [vmem:[%s12092_s2 + $0x32c] ss:$16 sps:$4 sm:$0xff]  }
  0x4f   : > { %v8504_v6 = vld [vmem:[%s12092_s2 + $0x320] ss:$16 sps:$4 sm:$0xff]  }
  0x50   : > { %1854 = vmatmul.mubr.bf16.vlgmr.msra.gmra.mrb[0].mxu0 %v542_v8  ;;  %2306 = vmatmul.mubr.bf16.vlgmr.msra.gmra.mrb[0].mxu1 %v542_v8  ;;  %v578_v8 = vpack.c.bf16 %v508_v1, %v501_v0  ;;  %v446_v1 = vld [vmem:[%s9593_s23 + $0x80] sm:$0xff] }
  0x51   : > { %1935 = vmatpush1.bf16.msra.mxu0 %v8450_v7  ;;  %2387 = vmatpush1.bf16.msra.mxu1 %v8453_v9  ;;  %v8507_v7 = vld [vmem:[%s12092_s2 + $0x328] ss:$16 sps:$4 sm:$0xff]   ;;  %v500_v9 = vld [vmem:[%s9593_s23 + $0x230] sm:$0xff] }
  0x52   : > { %1936 = vmatprep.subr.bf16.mxu0 %v8458_v12  ;;  %2388 = vmatprep.subr.bf16.mxu1 %v8461_v13  ;;  %v8515_v12 = vld [vmem:[%s12092_s2 + $0x34c] ss:$16 sps:$4 sm:$0xff]   ;;  %v8510_v13 = vld [vmem:[%s12092_s2 + $0x340] ss:$16 sps:$4 sm:$0xff]  }
  0x53   : > { %1863 = vmatprep.mubr.bf16.mxu0 %v550_v15  ;;  %2315 = vmatprep.mubr.bf16.mxu1 %v550_v15  ;;  %v8513_v15 = vld [vmem:[%s12092_s2 + $0x348] ss:$16 sps:$4 sm:$0xff]  }
  0x55   : > { %1937 = vmatpush1.bf16.msra.mxu0 %v8456_v14  ;;  %2389 = vmatpush1.bf16.msra.mxu1 %v8459_v16  ;;  %v577_v14 = vpack.c.bf16 %v507_v10, %v500_v9  ;;  %v515_v16 = vld [vmem:[%s9593_s23 + $0x2a8] sm:$0xff]  ;;  %v8566_v10 = vld [vmem:[%s12092_s2 + $0x464] ss:$16 sps:$4 sm:$0xff]  }
  0x56   : > { %1938 = vmatprep.subr.bf16.mxu0 %v8464_v19  ;;  %2390 = vmatprep.subr.bf16.mxu1 %v8467_v20  ;;  %v8521_v19 = vld [vmem:[%s12092_s2 + $0x36c] ss:$16 sps:$4 sm:$0xff]   ;;  %v8516_v20 = vld [vmem:[%s12092_s2 + $0x360] ss:$16 sps:$4 sm:$0xff]   ;;  %v8561_v9 = vld [vmem:[%s12092_s2 + $0x448] ss:$16 sps:$4 sm:$0xff]  }
  0x58   : > { %1864 = vmatmul.mubr.bf16.gmra.mrb[4].mxu0 %v549_v23  ;;  %2316 = vmatmul.mubr.bf16.gmra.mrb[4].mxu1 %v549_v23  ;;  %v514_v23 = vld [vmem:[%s9593_s23 + $0x2a0] sm:$0xff] }
  0x59   : > { %1939 = vmatpush1.bf16.msra.mxu0 %v8462_v21  ;;  %2391 = vmatpush1.bf16.msra.mxu1 %v8465_v22  ;;  %v585_v21 = vpack.c.bf16 %v522_v17, %v515_v16  ;;  %v8519_v22 = vld [vmem:[%s12092_s2 + $0x368] ss:$16 sps:$4 sm:$0xff]   ;;  %v8572_v17 = vld [vmem:[%s12092_s2 + $0x484] ss:$16 sps:$4 sm:$0xff]  }
  0x5a   : > { %1940 = vmatprep.subr.bf16.mxu0 %v8470_v26  ;;  %2392 = vmatprep.subr.bf16.mxu1 %v8473_v27  ;;  %v8527_v26 = vld [vmem:[%s12092_s2 + $0x38c] ss:$16 sps:$4 sm:$0xff]   ;;  %v8522_v27 = vld [vmem:[%s12092_s2 + $0x380] ss:$16 sps:$4 sm:$0xff]  }
  0x5b   : > { %1873 = vmatprep.mubr.bf16.mxu0 %v557_v28  ;;  %2325 = vmatprep.mubr.bf16.mxu1 %v557_v28  ;;  %v8525_v28 = vld [vmem:[%s12092_s2 + $0x388] ss:$16 sps:$4 sm:$0xff]  }
  0x5c   : > { %v467_v16 = vld [vmem:[%s9593_s23 + $0x128] sm:$0xff] }
  0x5d   : > { %1941 = vmatpush1.bf16.msra.mxu0 %v8468_v29  ;;  %2393 = vmatpush1.bf16.msra.mxu1 %v8471_v30  ;;  %v584_v29 = vpack.c.bf16 %v521_v24, %v514_v23  ;;  %v529_v30 = vld [vmem:[%s9593_s23 + $0x318] sm:$0xff]  ;;  %v482_v23 = vld [vmem:[%s9593_s23 + $0x1a0] sm:$0xff] }
  0x5e   : > { %1942 = vmatprep.subr.bf16.mxu0 %v8476_v33  ;;  %2394 = vmatprep.subr.bf16.mxu1 %v8479_v34  ;;  %v8533_v33 = vld [vmem:[%s12092_s2 + $0x3ac] ss:$16 sps:$4 sm:$0xff]   ;;  %v592_v34 = vpack.c.bf16 %v536_v31, %v529_v30  ;;  %v8578_v24 = vld [vmem:[%s12092_s2 + $0x4a4] ss:$16 sps:$4 sm:$0xff]  }
  0x5f   : > { %v481_v30 = vld [vmem:[%s9593_s23 + $0x198] sm:$0xff]  ;;  %v8584_v31 = vld [vmem:[%s12092_s2 + $0x4c4] ss:$16 sps:$4 sm:$0xff]  }
  0x60   : > { %1874 = vmatmul.mubr.bf16.gmra.mrb[8].mxu0 %v556_v37  ;;  %2326 = vmatmul.mubr.bf16.gmra.mrb[8].mxu1 %v556_v37  ;;  %v528_v37 = vld [vmem:[%s9593_s23 + $0x310] sm:$0xff] }
  0x61   : > { %1943 = vmatpush1.bf16.msra.mxu0 %v8474_v35  ;;  %2395 = vmatpush1.bf16.msra.mxu1 %v8477_v36  ;;  %v8528_v35 = vld [vmem:[%s12092_s2 + $0x3a0] ss:$16 sps:$4 sm:$0xff]   ;;  %v8531_v36 = vld [vmem:[%s12092_s2 + $0x3a8] ss:$16 sps:$4 sm:$0xff]  }
  0x62   : > { %1944 = vmatprep.subr.bf16.mxu0 %v8482_v40  ;;  %2396 = vmatprep.subr.bf16.mxu1 %v8485_v41  ;;  %v8539_v40 = vld [vmem:[%s12092_s2 + $0x3cc] ss:$16 sps:$4 sm:$0xff]   ;;  %v8534_v41 = vld [vmem:[%s12092_s2 + $0x3c0] ss:$16 sps:$4 sm:$0xff]  }
  0x63   : > { %1883 = vmatprep.mubr.bf16.mxu0 %v564_v43  ;;  %2335 = vmatprep.mubr.bf16.mxu1 %v564_v43  ;;  %v591_v43 = vpack.c.bf16 %v535_v38, %v528_v37  ;;  %v8585_v37 = vld [vmem:[%s12092_s2 + $0x4c8] ss:$16 sps:$4 sm:$0xff]   ;;  %v8590_v38 = vld [vmem:[%s12092_s2 + $0x4e4] ss:$16 sps:$4 sm:$0xff]  }
  0x65   : > { %1945 = vmatpush1.bf16.msra.mxu0 %v8480_v42  ;;  %2397 = vmatpush1.bf16.msra.mxu1 %v8483_v44  ;;  %v8537_v42 = vld [vmem:[%s12092_s2 + $0x3c8] ss:$16 sps:$4 sm:$0xff]  }
  0x66   : > { %1946 = vmatprep.subr.bf16.mxu0 %v8488_v47  ;;  %2398 = vmatprep.subr.bf16.mxu1 %v8491_v48  ;;  %v433_v44 = vld [vmem:[%s9593_s23 + $0x18] sm:$0xff]  ;;  %v8540_v48 = vld [vmem:[%s12092_s2 + $0x3e0] ss:$16 sps:$4 sm:$0xff]  }
  0x67   : > { %v8545_v47 = vld [vmem:[%s12092_s2 + $0x3ec] ss:$16 sps:$4 sm:$0xff]  }
  0x68   : > { %1884 = vmatmul.mubr.bf16.gmra.mrb[12].mxu0 %v563_v50  ;;  %2336 = vmatmul.mubr.bf16.gmra.mrb[12].mxu1 %v563_v50  ;;  %v8543_v50 = vld [vmem:[%s12092_s2 + $0x3e8] ss:$16 sps:$4 sm:$0xff]  }
  0x69   : > { %1947 = vmatpush1.bf16.msra.mxu0 %v8486_v49  ;;  %2399 = vmatpush1.bf16.msra.mxu1 %v8489_v53  ;;  %v545_v49 = vpack.c.bf16 %v440_v45, %v433_v44  ;;  %v8548_v53 = vld [vmem:[%s12092_s2 + $0x404] ss:$16 sps:$4 sm:$0xff]   ;;  %v495_v44 = vld [vmem:[%s9593_s23 + $0x208] sm:$0xff] }
  0x6a   : > { %1948 = vmatprep.subr.bf16.mxu0 %v8494_v54  ;;  %2400 = vmatprep.subr.bf16.mxu1 %v8497_v55  ;;  %v8551_v54 = vld [vmem:[%s12092_s2 + $0x40c] ss:$16 sps:$4 sm:$0xff]   ;;  %v8546_v55 = vld [vmem:[%s12092_s2 + $0x400] ss:$16 sps:$4 sm:$0xff]   ;;  %v8596_v45 = vld [vmem:[%s12092_s2 + $0x504] ss:$16 sps:$4 sm:$0xff]  }
  0x6b   : > { %1893 = vmatprep.mubr.bf16.mxu0 %v571_v58  ;;  %2345 = vmatprep.mubr.bf16.mxu1 %v571_v58  ;;  %v454_v58 = vld [vmem:[%s9593_s23 + $0xc0] sm:$0xff] }
  0x6d   : > { %1949 = vmatpush1.bf16.msra.mxu0 %v8492_v56  ;;  %2401 = vmatpush1.bf16.msra.mxu1 %v8495_v57  ;;  %v544_v56 = vpack.c.bf16 %v439_v52, %v432_v51  ;;  %v447_v57 = vld [vmem:[%s9593_s23 + $0x88] sm:$0xff]  ;;  %v8602_v52 = vld [vmem:[%s12092_s2 + $0x524] ss:$16 sps:$4 sm:$0xff]  }
  0x6e   : > { %1950 = vmatprep.subr.bf16.mxu0 %v8500_v61  ;;  %2402 = vmatprep.subr.bf16.mxu1 %v8503_v62  ;;  %v8557_v61 = vld [vmem:[%s12092_s2 + $0x42c] ss:$16 sps:$4 sm:$0xff]   ;;  %v8552_v62 = vld [vmem:[%s12092_s2 + $0x420] ss:$16 sps:$4 sm:$0xff]   ;;  %v552_v0 = vpack.c.bf16 %v454_v58, %v447_v57  ;;  %v8597_v51 = vld [vmem:[%s12092_s2 + $0x508] ss:$16 sps:$4 sm:$0xff]  }
  0x6f   : > { %v502_v57 = vld [vmem:[%s9593_s23 + $0x240] sm:$0xff]  ;;  %v509_v58 = vld [vmem:[%s9593_s23 + $0x278] sm:$0xff] }
  0x70   : > { %1894 = vmatmul.mubr.bf16.gmra.mrb[16].mxu0 %v570_v63  ;;  %2346 = vmatmul.mubr.bf16.gmra.mrb[16].mxu1 %v570_v63  ;;  %v8555_v63 = vld [vmem:[%s12092_s2 + $0x428] ss:$16 sps:$4 sm:$0xff]  }
  0x71   : > { %1951 = vmatpush1.bf16.msra.mxu0 %v8498_v2  ;;  %2403 = vmatpush1.bf16.msra.mxu1 %v8501_v3  ;;  %v453_v2 = vld [vmem:[%s9593_s23 + $0xb8] sm:$0xff]  ;;  %v8560_v3 = vld [vmem:[%s12092_s2 + $0x444] ss:$16 sps:$4 sm:$0xff]  }
  0x72   : > { %1952 = vmatprep.subr.bf16.mxu0 %v8506_v4  ;;  %2404 = vmatprep.subr.bf16.mxu1 %v8509_v5  ;;  %v8563_v4 = vld [vmem:[%s12092_s2 + $0x44c] ss:$16 sps:$4 sm:$0xff]   ;;  %v551_v5 = vpack.c.bf16 %v453_v2, %v446_v1  ;;  %v579_v1 = vpack.c.bf16 %v509_v58, %v502_v57  ;;  %v8614_v2 = vld [vmem:[%s12092_s2 + $0x564] ss:$16 sps:$4 sm:$0xff]  }
  0x73   : > { %1903 = vmatprep.mubr.bf16.mxu0 %v578_v8  ;;  %2355 = vmatprep.mubr.bf16.mxu1 %v578_v8  ;;  %v8558_v8 = vld [vmem:[%s12092_s2 + $0x440] ss:$16 sps:$4 sm:$0xff]  }
  0x74   : > { %v476_v58 = vld [vmem:[%s9593_s23 + $0x170] sm:$0xff] }
  0x75   : > { %1953 = vmatpush1.bf16.msra.mxu0 %v8504_v6  ;;  %2405 = vmatpush1.bf16.msra.mxu1 %v8507_v7  ;;  %v461_v6 = vld [vmem:[%s9593_s23 + $0xf8] sm:$0xff]  ;;  %v468_v7 = vld [vmem:[%s9593_s23 + $0x130] sm:$0xff] }
  0x76   : > { %1954 = vmatprep.subr.bf16.mxu0 %v8512_v11  ;;  %2406 = vmatprep.subr.bf16.mxu1 %v8515_v12  ;;  %v8569_v11 = vld [vmem:[%s12092_s2 + $0x46c] ss:$16 sps:$4 sm:$0xff]   ;;  %v8564_v12 = vld [vmem:[%s12092_s2 + $0x460] ss:$16 sps:$4 sm:$0xff]  }
  0x78   : > { %1904 = vmatmul.mubr.bf16.gmra.mrb[20].mxu0 %v577_v14  ;;  %2356 = vmatmul.mubr.bf16.gmra.mrb[20].mxu1 %v577_v14  ;;  %v559_v14 = vpack.c.bf16 %v468_v7, %v461_v6  ;;  %v516_v7 = vld [vmem:[%s9593_s23 + $0x2b0] sm:$0xff] }
  0x79   : > { %1955 = vmatpush1.bf16.msra.mxu0 %v8510_v13  ;;  %2407 = vmatpush1.bf16.msra.mxu1 %v8513_v15  ;;  %v8567_v13 = vld [vmem:[%s12092_s2 + $0x468] ss:$16 sps:$4 sm:$0xff]   ;;  %v460_v15 = vld [vmem:[%s9593_s23 + $0xf0] sm:$0xff] }
  0x7a   : > { %1956 = vmatprep.subr.bf16.mxu0 %v8518_v18  ;;  %2408 = vmatprep.subr.bf16.mxu1 %v8521_v19  ;;  %v8575_v18 = vld [vmem:[%s12092_s2 + $0x48c] ss:$16 sps:$4 sm:$0xff]   ;;  %v8570_v19 = vld [vmem:[%s12092_s2 + $0x480] ss:$16 sps:$4 sm:$0xff]  }
  0x7b   : > { %1913 = vmatprep.mubr.bf16.mxu0 %v585_v21  ;;  %2365 = vmatprep.mubr.bf16.mxu1 %v585_v21  ;;  %v8573_v21 = vld [vmem:[%s12092_s2 + $0x488] ss:$16 sps:$4 sm:$0xff]  }
  0x7d   : > { %1957 = vmatpush1.bf16.msra.mxu0 %v8516_v20  ;;  %2409 = vmatpush1.bf16.msra.mxu1 %v8519_v22  ;;  %v558_v20 = vpack.c.bf16 %v467_v16, %v460_v15  ;;  %v475_v22 = vld [vmem:[%s9593_s23 + $0x168] sm:$0xff]  ;;  %v8626_v16 = vld [vmem:[%s12092_s2 + $0x5a4] ss:$16 sps:$4 sm:$0xff]  }
  0x7e   : > { %1958 = vmatprep.subr.bf16.mxu0 %v8524_v25  ;;  %2410 = vmatprep.subr.bf16.mxu1 %v8527_v26  ;;  %v8581_v25 = vld [vmem:[%s12092_s2 + $0x4ac] ss:$16 sps:$4 sm:$0xff]   ;;  %v8576_v26 = vld [vmem:[%s12092_s2 + $0x4a0] ss:$16 sps:$4 sm:$0xff]  }
  0x80   : > { %1914 = vmatmul.mubr.bf16.gmra.mrb[24].mxu0 %v584_v29  ;;  %2366 = vmatmul.mubr.bf16.gmra.mrb[24].mxu1 %v584_v29  ;;  %v474_v29 = vld [vmem:[%s9593_s23 + $0x160] sm:$0xff] }
  0x81   : > { %1959 = vmatpush1.bf16.msra.mxu0 %v8522_v27  ;;  %2411 = vmatpush1.bf16.msra.mxu1 %v8525_v28  ;;  %v566_v27 = vpack.c.bf16 %v482_v23, %v475_v22  ;;  %v8579_v28 = vld [vmem:[%s12092_s2 + $0x4a8] ss:$16 sps:$4 sm:$0xff]   ;;  %v8632_v23 = vld [vmem:[%s12092_s2 + $0x5c4] ss:$16 sps:$4 sm:$0xff]  }
  0x82   : > { %1960 = vmatprep.subr.bf16.mxu0 %v8530_v32  ;;  %2412 = vmatprep.subr.bf16.mxu1 %v8533_v33  ;;  %v8587_v32 = vld [vmem:[%s12092_s2 + $0x4cc] ss:$16 sps:$4 sm:$0xff]   ;;  %v565_v33 = vpack.c.bf16 %v481_v30, %v474_v29  ;;  %v8638_v30 = vld [vmem:[%s12092_s2 + $0x5e4] ss:$16 sps:$4 sm:$0xff]  }
  0x83   : > { %1923 = vmatprep.mubr.bf16.mxu0 %v592_v34  ;;  %2375 = vmatprep.mubr.bf16.mxu1 %v592_v34  ;;  %v489_v34 = vld [vmem:[%s9593_s23 + $0x1d8] sm:$0xff] }
  0x84   : > { %v537_v22 = vld [vmem:[%s9593_s23 + $0x358] sm:$0xff] }
  0x85   : > { %1961 = vmatpush1.bf16.msra.mxu0 %v8528_v35  ;;  %2413 = vmatpush1.bf16.msra.mxu1 %v8531_v36  ;;  %v496_v35 = vld [vmem:[%s9593_s23 + $0x210] sm:$0xff] }
  0x86   : > { %1962 = vmatprep.subr.bf16.mxu0 %v8536_v39  ;;  %2414 = vmatprep.subr.bf16.mxu1 %v8539_v40  ;;  %v8582_v36 = vld [vmem:[%s12092_s2 + $0x4c0] ss:$16 sps:$4 sm:$0xff]   ;;  %v8593_v39 = vld [vmem:[%s12092_s2 + $0x4ec] ss:$16 sps:$4 sm:$0xff]   ;;  %v573_v40 = vpack.c.bf16 %v496_v35, %v489_v34  ;;  %v8639_v34 = vld [vmem:[%s12092_s2 + $0x5e8] ss:$16 sps:$4 sm:$0xff]  }
  0x87   : > { %v434_v35 = vld [vmem:[%s9593_s23 + $0x20] sm:$0xff] }
  0x88   : > { %1924 = vmatmul.mubr.bf16.gmra.mrb[28].mxu0 %v591_v43  ;;  %2376 = vmatmul.mubr.bf16.gmra.mrb[28].mxu1 %v591_v43  ;;  %v488_v43 = vld [vmem:[%s9593_s23 + $0x1d0] sm:$0xff] }
  0x89   : > { %1963 = vmatpush1.bf16.msra.mxu0 %v8534_v41  ;;  %2415 = vmatpush1.bf16.msra.mxu1 %v8537_v42  ;;  %v8588_v41 = vld [vmem:[%s12092_s2 + $0x4e0] ss:$16 sps:$4 sm:$0xff]   ;;  %v8591_v42 = vld [vmem:[%s12092_s2 + $0x4e8] ss:$16 sps:$4 sm:$0xff]  }
  0x8a   : > { %1964 = vmatprep.subr.bf16.mxu0 %v8542_v46  ;;  %2416 = vmatprep.subr.bf16.mxu1 %v8545_v47  ;;  %v8599_v46 = vld [vmem:[%s12092_s2 + $0x50c] ss:$16 sps:$4 sm:$0xff]   ;;  %v572_v47 = vpack.c.bf16 %v495_v44, %v488_v43  ;;  %v8645_v44 = vld [vmem:[%s12092_s2 + $0x608] ss:$16 sps:$4 sm:$0xff]  }
  0x8b   : > { %1966 = vmatprep.mubr.bf16.mxu0 %v545_v49  ;;  %2418 = vmatprep.mubr.bf16.mxu1 %v545_v49  ;;  %v510_v49 = vld [vmem:[%s9593_s23 + $0x280] sm:$0xff] }
  0x8d   : > { %1965 = vmatpush1.bf16.msra.mxu0 %v8540_v48  ;;  %2417 = vmatpush1.bf16.msra.mxu1 %v8543_v50  ;;  %v503_v48 = vld [vmem:[%s9593_s23 + $0x248] sm:$0xff]  ;;  %v8594_v50 = vld [vmem:[%s12092_s2 + $0x500] ss:$16 sps:$4 sm:$0xff]  }
  0x8e   : > { %2047 = vmatprep.subr.bf16.mxu0 %v8548_v53  ;;  %2499 = vmatprep.subr.bf16.mxu1 %v8551_v54  ;;  %v8605_v53 = vld [vmem:[%s12092_s2 + $0x52c] ss:$16 sps:$4 sm:$0xff]   ;;  %v580_v54 = vpack.c.bf16 %v510_v49, %v503_v48  ;;  %v470_v49 = vld [vmem:[%s9593_s23 + $0x140] sm:$0xff] }
  0x8f   : > { %v463_v48 = vld [vmem:[%s9593_s23 + $0x108] sm:$0xff] }
  0x90   : > { %1967 = vmatmul.mubr.bf16.vlgmr.msra.gmra.mrb[0].mxu0 %v544_v56  ;;  %2419 = vmatmul.mubr.bf16.vlgmr.msra.gmra.mrb[0].mxu1 %v544_v56  ;;  %v8603_v56 = vld [vmem:[%s12092_s2 + $0x528] ss:$16 sps:$4 sm:$0xff]  }
  0x91   : > { %2048 = vmatpush1.bf16.msra.mxu0 %v8546_v55  ;;  %2500 = vmatpush1.bf16.msra.mxu1 %v8549_v59  ;;  %v8600_v55 = vld [vmem:[%s12092_s2 + $0x520] ss:$16 sps:$4 sm:$0xff]   ;;  %v8608_v59 = vld [vmem:[%s12092_s2 + $0x544] ss:$16 sps:$4 sm:$0xff]  }
  0x92   : > { %2049 = vmatprep.subr.bf16.mxu0 %v8554_v60  ;;  %2501 = vmatprep.subr.bf16.mxu1 %v8557_v61  ;;  %v8611_v60 = vld [vmem:[%s12092_s2 + $0x54c] ss:$16 sps:$4 sm:$0xff]   ;;  %v8606_v61 = vld [vmem:[%s12092_s2 + $0x540] ss:$16 sps:$4 sm:$0xff]  }
  0x93   : > { %1976 = vmatprep.mubr.bf16.mxu0 %v552_v0  ;;  %2428 = vmatprep.mubr.bf16.mxu1 %v552_v0  ;;  %v524_v0 = vld [vmem:[%s9593_s23 + $0x2f0] sm:$0xff] }
  0x95   : > { %2050 = vmatpush1.bf16.msra.mxu0 %v8552_v62  ;;  %2502 = vmatpush1.bf16.msra.mxu1 %v8555_v63  ;;  %v8609_v62 = vld [vmem:[%s12092_s2 + $0x548] ss:$16 sps:$4 sm:$0xff]  }
  0x96   : > { %2051 = vmatprep.subr.bf16.mxu0 %v8560_v3  ;;  %2503 = vmatprep.subr.bf16.mxu1 %v8563_v4  ;;  %v517_v63 = vld [vmem:[%s9593_s23 + $0x2b8] sm:$0xff]  ;;  %v8612_v4 = vld [vmem:[%s12092_s2 + $0x560] ss:$16 sps:$4 sm:$0xff]  }
  0x97   : > { %v8617_v3 = vld [vmem:[%s12092_s2 + $0x56c] ss:$16 sps:$4 sm:$0xff]   ;;  %v587_v6 = vpack.c.bf16 %v524_v0, %v517_v63  ;;  %v490_v0 = vld [vmem:[%s9593_s23 + $0x1e0] sm:$0xff] }
  0x98   : > { %1977 = vmatmul.mubr.bf16.gmra.mrb[4].mxu0 %v551_v5  ;;  %2429 = vmatmul.mubr.bf16.gmra.mrb[4].mxu1 %v551_v5  ;;  %v8615_v5 = vld [vmem:[%s12092_s2 + $0x568] ss:$16 sps:$4 sm:$0xff]  }
  0x99   : > { %2052 = vmatpush1.bf16.msra.mxu0 %v8558_v8  ;;  %2504 = vmatpush1.bf16.msra.mxu1 %v8561_v9  ;;  %v523_v8 = vld [vmem:[%s9593_s23 + $0x2e8] sm:$0xff]  ;;  %v8620_v9 = vld [vmem:[%s12092_s2 + $0x584] ss:$16 sps:$4 sm:$0xff]  }
  0x9a   : > { %2053 = vmatprep.subr.bf16.mxu0 %v8566_v10  ;;  %2505 = vmatprep.subr.bf16.mxu1 %v8569_v11  ;;  %v8623_v10 = vld [vmem:[%s12092_s2 + $0x58c] ss:$16 sps:$4 sm:$0xff]   ;;  %v586_v15 = vpack.c.bf16 %v523_v8, %v516_v7 }
  0x9b   : > { %1986 = vmatprep.mubr.bf16.mxu0 %v559_v14  ;;  %2438 = vmatprep.mubr.bf16.mxu1 %v559_v14  ;;  %v531_v11 = vld [vmem:[%s9593_s23 + $0x328] sm:$0xff] }
  0x9c   : > { %v8621_v14 = vld [vmem:[%s12092_s2 + $0x588] ss:$16 sps:$4 sm:$0xff]  }
  0x9d   : > { %2054 = vmatpush1.bf16.msra.mxu0 %v8564_v12  ;;  %2506 = vmatpush1.bf16.msra.mxu1 %v8567_v13  ;;  %v538_v12 = vld [vmem:[%s9593_s23 + $0x360] sm:$0xff]  ;;  %v511_v7 = vld [vmem:[%s9593_s23 + $0x288] sm:$0xff] }
  0x9e   : > { %2055 = vmatprep.subr.bf16.mxu0 %v8572_v17  ;;  %2507 = vmatprep.subr.bf16.mxu1 %v8575_v18  ;;  %v8618_v13 = vld [vmem:[%s12092_s2 + $0x580] ss:$16 sps:$4 sm:$0xff]   ;;  %v8629_v17 = vld [vmem:[%s12092_s2 + $0x5ac] ss:$16 sps:$4 sm:$0xff]  }
  0x9f   : > { %v8624_v18 = vld [vmem:[%s12092_s2 + $0x5a0] ss:$16 sps:$4 sm:$0xff]   ;;  %v519_v8 = vld [vmem:[%s9593_s23 + $0x2c8] sm:$0xff] }
  0xa0   : > { %1987 = vmatmul.mubr.bf16.gmra.mrb[8].mxu0 %v558_v20  ;;  %2439 = vmatmul.mubr.bf16.gmra.mrb[8].mxu1 %v558_v20  ;;  %v594_v20 = vpack.c.bf16 %v538_v12, %v531_v11  ;;  %v518_v12 = vld [vmem:[%s9593_s23 + $0x2c0] sm:$0xff] }
  0xa1   : > { %2056 = vmatpush1.bf16.msra.mxu0 %v8570_v19  ;;  %2508 = vmatpush1.bf16.msra.mxu1 %v8573_v21  ;;  %v8627_v19 = vld [vmem:[%s12092_s2 + $0x5a8] ss:$16 sps:$4 sm:$0xff]   ;;  %v530_v21 = vld [vmem:[%s9593_s23 + $0x320] sm:$0xff] }
  0xa2   : > { %2057 = vmatprep.subr.bf16.mxu0 %v8578_v24  ;;  %2509 = vmatprep.subr.bf16.mxu1 %v8581_v25  ;;  %v8635_v24 = vld [vmem:[%s12092_s2 + $0x5cc] ss:$16 sps:$4 sm:$0xff]   ;;  %v593_v29 = vpack.c.bf16 %v537_v22, %v530_v21  ;;  %v436_v21 = vld [vmem:[%s9593_s23 + $0x30] sm:$0xff] }
  0xa3   : > { %1996 = vmatprep.mubr.bf16.mxu0 %v566_v27  ;;  %2448 = vmatprep.mubr.bf16.mxu1 %v566_v27  ;;  %v435_v25 = vld [vmem:[%s9593_s23 + $0x28] sm:$0xff]  ;;  %v8630_v27 = vld [vmem:[%s12092_s2 + $0x5c0] ss:$16 sps:$4 sm:$0xff]  }
  0xa4   : > { %v443_v22 = vld [vmem:[%s9593_s23 + $0x68] sm:$0xff] }
  0xa5   : > { %2058 = vmatpush1.bf16.msra.mxu0 %v8576_v26  ;;  %2510 = vmatpush1.bf16.msra.mxu1 %v8579_v28  ;;  %v442_v26 = vld [vmem:[%s9593_s23 + $0x60] sm:$0xff]  ;;  %v8633_v28 = vld [vmem:[%s12092_s2 + $0x5c8] ss:$16 sps:$4 sm:$0xff]  }
  0xa6   : > { %2059 = vmatprep.subr.bf16.mxu0 %v8584_v31  ;;  %2511 = vmatprep.subr.bf16.mxu1 %v8587_v32  ;;  %v8641_v31 = vld [vmem:[%s12092_s2 + $0x5ec] ss:$16 sps:$4 sm:$0xff]   ;;  %v547_v32 = vpack.c.bf16 %v442_v26, %v435_v25  ;;  %v8648_v25 = vld [vmem:[%s12094_s4] ss:$8 sps:$4 sm:$0xff]  }
  0xa7   : > { %v8653_v26 = vld [vmem:[%s12094_s4 + $0x14] ss:$8 sps:$4 sm:$0xff]  }
  0xa8   : > { %1997 = vmatmul.mubr.bf16.gmra.mrb[12].mxu0 %v565_v33  ;;  %2449 = vmatmul.mubr.bf16.gmra.mrb[12].mxu1 %v565_v33  ;;  %v8636_v33 = vld [vmem:[%s12092_s2 + $0x5e0] ss:$16 sps:$4 sm:$0xff]  }
  0xa9   : > { %2060 = vmatpush1.bf16.msra.mxu0 %v8582_v36  ;;  %2512 = vmatpush1.bf16.msra.mxu1 %v8585_v37  ;;  %v441_v36 = vld [vmem:[%s9593_s23 + $0x58] sm:$0xff]  ;;  %v8644_v37 = vld [vmem:[%s12092_s2 + $0x604] ss:$16 sps:$4 sm:$0xff]  }
  0xaa   : > { %2061 = vmatprep.subr.bf16.mxu0 %v8590_v38  ;;  %2513 = vmatprep.subr.bf16.mxu1 %v8593_v39  ;;  %v449_v38 = vld [vmem:[%s9593_s23 + $0x98] sm:$0xff]  ;;  %v456_v39 = vld [vmem:[%s9593_s23 + $0xd0] sm:$0xff] }
  0xab   : > { %2006 = vmatprep.mubr.bf16.mxu0 %v573_v40  ;;  %2458 = vmatprep.mubr.bf16.mxu1 %v573_v40  ;;  %v8647_v40 = vld [vmem:[%s12092_s2 + $0x60c] ss:$16 sps:$4 sm:$0xff]   ;;  %v554_v43 = vpack.c.bf16 %v456_v39, %v449_v38  ;;  %v8660_v39 = vld [vmem:[%s12094_s4 + $0x40] ss:$8 sps:$4 sm:$0xff]  }
  0xad   : > { %2062 = vmatpush1.bf16.msra.mxu0 %v8588_v41  ;;  %2514 = vmatpush1.bf16.msra.mxu1 %v8591_v42  ;;  %v546_v41 = vpack.c.bf16 %v441_v36, %v434_v35  ;;  %v8642_v42 = vld [vmem:[%s12092_s2 + $0x600] ss:$16 sps:$4 sm:$0xff]   ;;  %v471_v35 = vld [vmem:[%s9593_s23 + $0x148] sm:$0xff] }
  0xae   : > { %2063 = vmatprep.subr.bf16.mxu0 %v8596_v45  ;;  %2515 = vmatprep.subr.bf16.mxu1 %v8599_v46  ;;  %v8650_v45 = vld [vmem:[%s12094_s4 + $0x4] ss:$8 sps:$4 sm:$0xff]   ;;  %v448_v46 = vld [vmem:[%s9593_s23 + $0x90] sm:$0xff] }
  0xaf   : > { %v8657_v36 = vld [vmem:[%s12094_s4 + $0x30] ss:$8 sps:$4 sm:$0xff]  }
  0xb0   : > { %2007 = vmatmul.mubr.bf16.gmra.mrb[16].mxu0 %v572_v47  ;;  %2459 = vmatmul.mubr.bf16.gmra.mrb[16].mxu1 %v572_v47  ;;  %v455_v47 = vld [vmem:[%s9593_s23 + $0xc8] sm:$0xff] }
  0xb1   : > { %2064 = vmatpush1.bf16.msra.mxu0 %v8594_v50  ;;  %2516 = vmatpush1.bf16.msra.mxu1 %v8597_v51  ;;  %v553_v50 = vpack.c.bf16 %v455_v47, %v448_v46  ;;  %v561_v51 = vpack.c.bf16 %v470_v49, %v463_v48  ;;  %v8666_v46 = vld [vmem:[%s12094_s4 + $0x60] ss:$8 sps:$4 sm:$0xff]   ;;  %v8671_v47 = vld [vmem:[%s12094_s4 + $0x74] ss:$8 sps:$4 sm:$0xff]  }
  0xb2   : > { %2065 = vmatprep.subr.bf16.mxu0 %v8602_v52  ;;  %2517 = vmatprep.subr.bf16.mxu1 %v8605_v53  ;;  %v462_v52 = vld [vmem:[%s9593_s23 + $0x100] sm:$0xff]  ;;  %v469_v53 = vld [vmem:[%s9593_s23 + $0x138] sm:$0xff]  ;;  %v492_v48 = vld [vmem:[%s9593_s23 + $0x1f0] sm:$0xff] }
  0xb3   : > { %2016 = vmatprep.mubr.bf16.mxu0 %v580_v54  ;;  %2468 = vmatprep.mubr.bf16.mxu1 %v580_v54  ;;  %v477_v54 = vld [vmem:[%s9593_s23 + $0x178] sm:$0xff]  ;;  %v499_v49 = vld [vmem:[%s9593_s23 + $0x228] sm:$0xff] }
  0xb5   : > { %2066 = vmatpush1.bf16.msra.mxu0 %v8600_v55  ;;  %2518 = vmatpush1.bf16.msra.mxu1 %v8603_v56  ;;  %v484_v55 = vld [vmem:[%s9593_s23 + $0x1b0] sm:$0xff]  ;;  %v560_v56 = vpack.c.bf16 %v469_v53, %v462_v52  ;;  %v576_v52 = vpack.c.bf16 %v499_v49, %v492_v48  ;;  %v8672_v53 = vld [vmem:[%s12094_s4 + $0x80] ss:$8 sps:$4 sm:$0xff]  }
  0xb6   : > { %2067 = vmatprep.subr.bf16.mxu0 %v8608_v59  ;;  %2519 = vmatprep.subr.bf16.mxu1 %v8611_v60  ;;  %v568_v57 = vpack.c.bf16 %v484_v55, %v477_v54  ;;  %v483_v59 = vld [vmem:[%s9593_s23 + $0x1a8] sm:$0xff]  ;;  %v8677_v54 = vld [vmem:[%s12094_s4 + $0x94] ss:$8 sps:$4 sm:$0xff]   ;;  %v506_v55 = vld [vmem:[%s9593_s23 + $0x260] sm:$0xff] }
  0xb7   : > { %v491_v60 = vld [vmem:[%s9593_s23 + $0x1e8] sm:$0xff]  ;;  %v8728_v48 = vld [vmem:[%s12096_s6 + $0x24] ss:$16 sps:$4 sm:$0xff]  }
  0xb8   : > { %2017 = vmatmul.mubr.bf16.gmra.mrb[20].mxu0 %v579_v1  ;;  %2469 = vmatmul.mubr.bf16.gmra.mrb[20].mxu1 %v579_v1  ;;  %v497_v1 = vld [vmem:[%s9593_s23 + $0x218] sm:$0xff] }
  0xb9   : > { %2068 = vmatpush1.bf16.msra.mxu0 %v8606_v61  ;;  %2520 = vmatpush1.bf16.msra.mxu1 %v8609_v62  ;;  %v498_v61 = vld [vmem:[%s9593_s23 + $0x220] sm:$0xff]  ;;  %v567_v62 = vpack.c.bf16 %v483_v59, %v476_v58 }
  0xba   : > { %2069 = vmatprep.subr.bf16.mxu0 %v8614_v2  ;;  %2521 = vmatprep.subr.bf16.mxu1 %v8617_v3  ;;  %v575_v63 = vpack.c.bf16 %v498_v61, %v491_v60  ;;  %v505_v2 = vld [vmem:[%s9593_s23 + $0x258] sm:$0xff]  ;;  %v512_v3 = vld [vmem:[%s9593_s23 + $0x290] sm:$0xff]  ;;  %v8680_v58 = vld [vmem:[%s12094_s4 + $0xa4] ss:$8 sps:$4 sm:$0xff]  }
  0xbb   : > { %2026 = vmatprep.mubr.bf16.mxu0 %v587_v6  ;;  %2478 = vmatprep.mubr.bf16.mxu1 %v587_v6  ;;  %v504_v6 = vld [vmem:[%s9593_s23 + $0x250] sm:$0xff]  ;;  %v8678_v60 = vld [vmem:[%s12094_s4 + $0xa0] ss:$8 sps:$4 sm:$0xff]  }
  0xbc   : > { %v8683_v61 = vld [vmem:[%s12094_s4 + $0xb4] ss:$8 sps:$4 sm:$0xff]  }
  0xbd   : > { %2070 = vmatpush1.bf16.msra.mxu0 %v8612_v4  ;;  %2522 = vmatpush1.bf16.msra.mxu1 %v8615_v5  ;;  %v574_v4 = vpack.c.bf16 %v497_v1, %v490_v0  ;;  %v582_v5 = vpack.c.bf16 %v512_v3, %v505_v2  ;;  %v8681_v0 = vld [vmem:[%s12094_s4 + $0xb0] ss:$8 sps:$4 sm:$0xff]   ;;  %v8686_v1 = vld [vmem:[%s12094_s4 + $0xc4] ss:$8 sps:$4 sm:$0xff]   ;;  %v8684_v3 = vld [vmem:[%s12094_s4 + $0xc0] ss:$8 sps:$4 sm:$0xff]  }
  0xbe   : > { %2071 = vmatprep.subr.bf16.mxu0 %v8620_v9  ;;  %2523 = vmatprep.subr.bf16.mxu1 %v8623_v10  ;;  %v526_v9 = vld [vmem:[%s9593_s23 + $0x300] sm:$0xff]  ;;  %v581_v10 = vpack.c.bf16 %v511_v7, %v504_v6  ;;  %v541_v6 = vld [vmem:[%s9593_s23 + $0x378] sm:$0xff] }
  0xbf   : > { %v589_v11 = vpack.c.bf16 %v526_v9, %v519_v8  ;;  %v8687_v7 = vld [vmem:[%s12094_s4 + $0xd0] ss:$8 sps:$4 sm:$0xff]   ;;  %v8692_v9 = vld [vmem:[%s12094_s4 + $0xe4] ss:$8 sps:$4 sm:$0xff]  }
  0xc0   : > { %2027 = vmatmul.mubr.bf16.gmra.mrb[24].mxu0 %v586_v15  ;;  %2479 = vmatmul.mubr.bf16.gmra.mrb[24].mxu1 %v586_v15  ;;  %v540_v15 = vld [vmem:[%s9593_s23 + $0x370] sm:$0xff] }
  0xc1   : > { %2072 = vmatpush1.bf16.msra.mxu0 %v8618_v13  ;;  %2524 = vmatpush1.bf16.msra.mxu1 %v8621_v14  ;;  %v525_v13 = vld [vmem:[%s9593_s23 + $0x2f8] sm:$0xff] }
  0xc2   : > { %2073 = vmatprep.subr.bf16.mxu0 %v8626_v16  ;;  %2525 = vmatprep.subr.bf16.mxu1 %v8629_v17  ;;  %v533_v14 = vld [vmem:[%s9593_s23 + $0x338] sm:$0xff]  ;;  %v588_v16 = vpack.c.bf16 %v525_v13, %v518_v12  ;;  %v8698_v13 = vld [vmem:[%s12094_s4 + $0x104] ss:$8 sps:$4 sm:$0xff]  }
  0xc3   : > { %2036 = vmatprep.mubr.bf16.mxu0 %v594_v20  ;;  %2488 = vmatprep.mubr.bf16.mxu1 %v594_v20  ;;  %v596_v17 = vpack.c.bf16 %v540_v15, %v533_v14  ;;  %v8693_v12 = vld [vmem:[%s12094_s4 + $0xf0] ss:$8 sps:$4 sm:$0xff]   ;;  %v796_v14 = vlaneseq }
  0xc5   : > { %2074 = vmatpush1.bf16.msra.mxu0 %v8624_v18  ;;  %2526 = vmatpush1.bf16.msra.mxu1 %v8627_v19  ;;  %v532_v18 = vld [vmem:[%s9593_s23 + $0x330] sm:$0xff]  ;;  %v539_v19 = vld [vmem:[%s9593_s23 + $0x368] sm:$0xff]  ;;  %v10295_v15 = vshrl.u32 %v796_v14, 7 }
  0xc6   : > { %2075 = vmatprep.subr.bf16.mxu0 %v8632_v23  ;;  %2527 = vmatprep.subr.bf16.mxu1 %v8635_v24  ;;  %v595_v20 = vpack.c.bf16 %v539_v19, %v532_v18  ;;  %v9342_v23 = vmov 0   ;;  %v548_v24 = vpack.c.bf16 %v443_v22, %v436_v21  ;;  %v794_v18 = vld [vmem:[%s12093_s3] sm:$0xf]  ;;  %v8699_v14 = vld [vmem:[%s12094_s4 + $0x110] ss:$8 sps:$4 sm:$0xff]  }
  0xc7   : > { %v10307_v19 = vsub.s32 1, %v10295_v15 }
  0xc8   : > { %2037 = vmatmul.mubr.bf16.gmra.mrb[28].mxu0 %v593_v29  ;;  %2489 = vmatmul.mubr.bf16.gmra.mrb[28].mxu1 %v593_v29  ;;  %v8651_v29 = vld [vmem:[%s12094_s4 + $0x10] ss:$8 sps:$4 sm:$0xff]  }
  0xc9   : > { %2076 = vmatpush1.bf16.msra.mxu0 %v8630_v27  ;;  %2528 = vmatpush1.bf16.msra.mxu1 %v8633_v28  ;;  %v450_v27 = vld [vmem:[%s9593_s23 + $0xa0] sm:$0xff]  ;;  %v457_v28 = vld [vmem:[%s9593_s23 + $0xd8] sm:$0xff] }
  0xca   : > { %2077 = vmatprep.subr.bf16.mxu0 %v8638_v30  ;;  %2529 = vmatprep.subr.bf16.mxu1 %v8641_v31  ;;  %v8656_v30 = vld [vmem:[%s12094_s4 + $0x24] ss:$8 sps:$4 sm:$0xff]   ;;  %v555_v31 = vpack.c.bf16 %v457_v28, %v450_v27 }
  0xcb   : > { %2079 = vmatprep.mubr.bf16.mxu0 %v547_v32  ;;  %2531 = vmatprep.mubr.bf16.mxu1 %v547_v32  ;;  %v8654_v32 = vld [vmem:[%s12094_s4 + $0x20] ss:$8 sps:$4 sm:$0xff]  }
  0xcd   : > { %2078 = vmatpush1.bf16.msra.mxu0 %v8636_v33  ;;  %2530 = vmatpush1.bf16.msra.mxu1 %v8639_v34  ;;  %v8659_v33 = vld [vmem:[%s12094_s4 + $0x34] ss:$8 sps:$4 sm:$0xff]  }
  0xce   : > { %2160 = vmatprep.subr.bf16.mxu0 %v8644_v37  ;;  %2612 = vmatprep.subr.bf16.mxu1 %v8647_v40  ;;  %v464_v34 = vld [vmem:[%s9593_s23 + $0x110] sm:$0xff]  ;;  %v8662_v37 = vld [vmem:[%s12094_s4 + $0x44] ss:$8 sps:$4 sm:$0xff]  }
  0xcf   : > { %v562_v38 = vpack.c.bf16 %v471_v35, %v464_v34  ;;  %v8665_v40 = vld [vmem:[%s12094_s4 + $0x54] ss:$8 sps:$4 sm:$0xff]  }
  0xd0   : > { %2080 = vmatmul.mubr.bf16.vlgmr.msra.gmra.mrb[0].mxu0 %v546_v41  ;;  %2532 = vmatmul.mubr.bf16.vlgmr.msra.gmra.mrb[0].mxu1 %v546_v41  ;;  %v478_v41 = vld [vmem:[%s9593_s23 + $0x180] sm:$0xff] }
  0xd1   : > { %2161 = vmatpush1.bf16.msra.mxu0 %v8642_v42  ;;  %2089 = vmatprep.mubr.bf16.mxu0 %v554_v43  ;;  %v485_v42 = vld [vmem:[%s9593_s23 + $0x1b8] sm:$0xff] }
  0xd2   : > { %2541 = vmatprep.mubr.bf16.mxu1 %v554_v43  ;;  %2613 = vmatpush1.bf16.msra.mxu1 %v8645_v44  ;;  %v8663_v43 = vld [vmem:[%s12094_s4 + $0x50] ss:$8 sps:$4 sm:$0xff]   ;;  %v8668_v44 = vld [vmem:[%s12094_s4 + $0x64] ss:$8 sps:$4 sm:$0xff]  }
  0xd3   : > { %3157 = vmatprep.subr.bf16.mxu0 %v8650_v45  ;;  %v569_v45 = vpack.c.bf16 %v485_v42, %v478_v41 }
  0xd8   : > { %2090 = vmatmul.mubr.bf16.gmra.mrb[4].mxu0 %v553_v50  ;;  %2542 = vmatmul.mubr.bf16.gmra.mrb[4].mxu1 %v553_v50  ;;  %v8669_v50 = vld [vmem:[%s12094_s4 + $0x70] ss:$8 sps:$4 sm:$0xff]  }
  0xd9   : > { %2099 = vmatprep.mubr.bf16.mxu0 %v561_v51  ;;  %2551 = vmatprep.mubr.bf16.mxu1 %v561_v51  ;;  %v8674_v51 = vld [vmem:[%s12094_s4 + $0x84] ss:$8 sps:$4 sm:$0xff]  }
  0xe0   : > { %2100 = vmatmul.mubr.bf16.gmra.mrb[8].mxu0 %v560_v56  ;;  %2552 = vmatmul.mubr.bf16.gmra.mrb[8].mxu1 %v560_v56  ;;  %v513_v56 = vld [vmem:[%s9593_s23 + $0x298] sm:$0xff] }
  0xe1   : > { %2109 = vmatprep.mubr.bf16.mxu0 %v568_v57  ;;  %2561 = vmatprep.mubr.bf16.mxu1 %v568_v57  ;;  %v8675_v57 = vld [vmem:[%s12094_s4 + $0x90] ss:$8 sps:$4 sm:$0xff]   ;;  %v583_v59 = vpack.c.bf16 %v513_v56, %v506_v55 }
  0xe2   : > { %v8726_v55 = vld [vmem:[%s12096_s6 + $0x20] ss:$16 sps:$4 sm:$0xff]  }
  0xe8   : > { %2110 = vmatmul.mubr.bf16.gmra.mrb[12].mxu0 %v567_v62  ;;  %2562 = vmatmul.mubr.bf16.gmra.mrb[12].mxu1 %v567_v62  ;;  %v520_v62 = vld [vmem:[%s9593_s23 + $0x2d0] sm:$0xff] }
  0xe9   : > { %2119 = vmatprep.mubr.bf16.mxu0 %v575_v63  ;;  %2571 = vmatprep.mubr.bf16.mxu1 %v575_v63  ;;  %v527_v63 = vld [vmem:[%s9593_s23 + $0x308] sm:$0xff] }
  0xea   : > { %v590_v2 = vpack.c.bf16 %v527_v63, %v520_v62 }
  0xf0   : > { %2120 = vmatmul.mubr.bf16.gmra.mrb[16].mxu0 %v574_v4  ;;  %2572 = vmatmul.mubr.bf16.gmra.mrb[16].mxu1 %v574_v4  ;;  %v8689_v4 = vld [vmem:[%s12094_s4 + $0xd4] ss:$8 sps:$4 sm:$0xff]  }
  0xf1   : > { %2129 = vmatprep.mubr.bf16.mxu0 %v582_v5  ;;  %2581 = vmatprep.mubr.bf16.mxu1 %v582_v5  ;;  %v534_v5 = vld [vmem:[%s9593_s23 + $0x340] sm:$0xff] }
  0xf2   : > { %v597_v8 = vpack.c.bf16 %v541_v6, %v534_v5 }
  0xf8   : > { %2130 = vmatmul.mubr.bf16.gmra.mrb[20].mxu0 %v581_v10  ;;  %2582 = vmatmul.mubr.bf16.gmra.mrb[20].mxu1 %v581_v10  ;;  %v8690_v10 = vld [vmem:[%s12094_s4 + $0xe0] ss:$8 sps:$4 sm:$0xff]  }
  0xf9   : > { %2139 = vmatprep.mubr.bf16.mxu0 %v589_v11  ;;  %2591 = vmatprep.mubr.bf16.mxu1 %v589_v11  ;;  %v8695_v11 = vld [vmem:[%s12094_s4 + $0xf4] ss:$8 sps:$4 sm:$0xff]  }
 0x100   : > { %2140 = vmatmul.mubr.bf16.gmra.mrb[24].mxu0 %v588_v16  ;;  %2592 = vmatmul.mubr.bf16.gmra.mrb[24].mxu1 %v588_v16  ;;  %v10298_v16 = vsub.s32 0, %v10295_v15 }
 0x101   : > { %2149 = vmatprep.mubr.bf16.mxu0 %v596_v17  ;;  %2601 = vmatprep.mubr.bf16.mxu1 %v596_v17  ;;  %v10301_v17 = vsub.s32 2, %v10295_v15 }
 0x102   : > { %v10313_v21 = vrot.slane %v794_v18, %v10298_v16 }
 0x103   : > { %v10316_v22 = vrot.slane %v794_v18, %v10301_v17 }
 0x108   : > { %2150 = vmatmul.mubr.bf16.gmra.mrb[28].mxu0 %v595_v20  ;;  %2602 = vmatmul.mubr.bf16.gmra.mrb[28].mxu1 %v595_v20  ;;  %v10310_v20 = vsub.s32 3, %v10295_v15 }
 0x109   : > { %2192 = vmatprep.mubr.bf16.mxu0 %v9342_v23  ;;  %2644 = vmatprep.mubr.bf16.mxu1 %v9342_v23 }
 0x110   : > { %7285 = vmatmul.mubr.msk.bf16.vlgmr.msra.gmra.mrb[0].mxu0 %vm1796_vm0, %v548_v24  ;;  %7293 = vmatmul.mubr.msk.bf16.vlgmr.msra.gmra.mrb[0].mxu1 %vm1796_vm0, %v548_v24  ;;  %v10319_v24 = vrot.slane %v794_v18, %v10307_v19 }
 0x111   : > { %2202 = vmatprep.mubr.bf16.mxu0 %v9342_v23  ;;  %2654 = vmatprep.mubr.bf16.mxu1 %v9342_v23 }
 0x112   : > { %3158 = vmatpush1.bf16.msra.mxu0 %v8648_v25  ;;  %v10322_v25 = vrot.slane %v794_v18, %v10310_v20  ;;  %v8734_v18 = vld [vmem:[%s12096_s6 + $0x64] ss:$16 sps:$4 sm:$0xff]  }
 0x113   : > { %3159 = vmatprep.subr.bf16.mxu0 %v8653_v26 }
 0x116   : > { %3160 = vmatpush1.bf16.msra.mxu0 %v8651_v29 }
 0x117   : > { %3161 = vmatprep.subr.bf16.mxu0 %v8656_v30 }
 0x118   : > { %7286 = vmatmul.mubr.msk.bf16.gmra.mrb[4].mxu0 %vm1796_vm0, %v555_v31  ;;  %7294 = vmatmul.mubr.msk.bf16.gmra.mrb[4].mxu1 %vm1796_vm0, %v555_v31 }
 0x119   : > { %2212 = vmatprep.mubr.bf16.mxu0 %v9342_v23  ;;  %2664 = vmatprep.mubr.bf16.mxu1 %v9342_v23 }
 0x11a   : > { %3162 = vmatpush1.bf16.msra.mxu0 %v8654_v32 }
 0x11b   : > { %3163 = vmatprep.subr.bf16.mxu0 %v8659_v33 }
 0x11e   : > { %3164 = vmatpush1.bf16.msra.mxu0 %v8657_v36 }
 0x11f   : > { %3165 = vmatprep.subr.bf16.mxu0 %v8662_v37 }
 0x120   : > { %7287 = vmatmul.mubr.msk.bf16.gmra.mrb[8].mxu0 %vm1796_vm0, %v562_v38  ;;  %7295 = vmatmul.mubr.msk.bf16.gmra.mrb[8].mxu1 %vm1796_vm0, %v562_v38 }
 0x121   : > { %2222 = vmatprep.mubr.bf16.mxu0 %v9342_v23  ;;  %2674 = vmatprep.mubr.bf16.mxu1 %v9342_v23 }
 0x122   : > { %3166 = vmatpush1.bf16.msra.mxu0 %v8660_v39 }
 0x123   : > { %3167 = vmatprep.subr.bf16.mxu0 %v8665_v40  ;;  %v8723_v40 = vld [vmem:[%s12096_s6] ss:$16 sps:$4 sm:$0xff]  }
 0x126   : > { %3168 = vmatpush1.bf16.msra.mxu0 %v8663_v43  ;;  %v8725_v43 = vld [vmem:[%s12096_s6 + $0x4] ss:$16 sps:$4 sm:$0xff]  }
 0x127   : > { %3169 = vmatprep.subr.bf16.mxu0 %v8668_v44  ;;  %3733 = vmatprep.subr.bf16.mxu1 %v8725_v43  ;;  %v8737_v43 = vld [vmem:[%s12096_s6 + $0x84] ss:$16 sps:$4 sm:$0xff]  }
 0x128   : > { %7288 = vmatmul.mubr.msk.bf16.gmra.mrb[12].mxu0 %vm1796_vm0, %v569_v45  ;;  %7296 = vmatmul.mubr.msk.bf16.gmra.mrb[12].mxu1 %vm1796_vm0, %v569_v45 }
 0x129   : > { %2232 = vmatprep.mubr.bf16.mxu0 %v9342_v23  ;;  %2684 = vmatprep.mubr.bf16.mxu1 %v9342_v23 }
 0x12a   : > { %3170 = vmatpush1.bf16.msra.mxu0 %v8666_v46  ;;  %3734 = vmatpush1.bf16.msra.mxu1 %v8723_v40 }
 0x12b   : > { %3171 = vmatprep.subr.bf16.mxu0 %v8671_v47  ;;  %3735 = vmatprep.subr.bf16.mxu1 %v8728_v48  ;;  %v8707_v48 = vld [vmem:[%s12094_s4 + $0x134] ss:$8 sps:$4 sm:$0xff]  }
 0x12e   : > { %3172 = vmatpush1.bf16.msra.mxu0 %v8669_v50  ;;  %3736 = vmatpush1.bf16.msra.mxu1 %v8726_v55 }
 0x12f   : > { %3173 = vmatprep.subr.bf16.mxu0 %v8674_v51 }
 0x130   : > { %7289 = vmatmul.mubr.msk.bf16.gmra.mrb[16].mxu0 %vm1796_vm0, %v576_v52  ;;  %7297 = vmatmul.mubr.msk.bf16.gmra.mrb[16].mxu1 %vm1796_vm0, %v576_v52 }
 0x131   : > { %2242 = vmatprep.mubr.bf16.mxu0 %v9342_v23  ;;  %2694 = vmatprep.mubr.bf16.mxu1 %v9342_v23 }
 0x132   : > { %3174 = vmatpush1.bf16.msra.mxu0 %v8672_v53 }
 0x133   : > { %3175 = vmatprep.subr.bf16.mxu0 %v8677_v54 }
 0x136   : > { %3176 = vmatpush1.bf16.msra.mxu0 %v8675_v57 }
 0x137   : > { %3177 = vmatprep.subr.bf16.mxu0 %v8680_v58 }
 0x138   : > { %7290 = vmatmul.mubr.msk.bf16.gmra.mrb[20].mxu0 %vm1796_vm0, %v583_v59  ;;  %7298 = vmatmul.mubr.msk.bf16.gmra.mrb[20].mxu1 %vm1796_vm0, %v583_v59 }
 0x139   : > { %2252 = vmatprep.mubr.bf16.mxu0 %v9342_v23  ;;  %2704 = vmatprep.mubr.bf16.mxu1 %v9342_v23 }
 0x13a   : > { %3178 = vmatpush1.bf16.msra.mxu0 %v8678_v60  ;;  %v8696_v60 = vld [vmem:[%s12094_s4 + $0x100] ss:$8 sps:$4 sm:$0xff]  }
 0x13b   : > { %3179 = vmatprep.subr.bf16.mxu0 %v8683_v61  ;;  %v8731_v61 = vld [vmem:[%s12096_s6 + $0x44] ss:$16 sps:$4 sm:$0xff]  }
 0x13c   : > { %3737 = vmatprep.subr.bf16.mxu1 %v8731_v61 }
 0x13e   : > { %3180 = vmatpush1.bf16.msra.mxu0 %v8681_v0 }
 0x13f   : > { %3181 = vmatprep.subr.bf16.mxu0 %v8686_v1 }
 0x140   : > { %7291 = vmatmul.mubr.msk.bf16.gmra.mrb[24].mxu0 %vm1796_vm0, %v590_v2  ;;  %7299 = vmatmul.mubr.msk.bf16.gmra.mrb[24].mxu1 %vm1796_vm0, %v590_v2  ;;  %v8701_v2 = vld [vmem:[%s12094_s4 + $0x114] ss:$8 sps:$4 sm:$0xff]  }
 0x141   : > { %2262 = vmatprep.mubr.bf16.mxu0 %v9342_v23  ;;  %2714 = vmatprep.mubr.bf16.mxu1 %v9342_v23 }
 0x142   : > { %3182 = vmatpush1.bf16.msra.mxu0 %v8684_v3 }
 0x143   : > { %3183 = vmatprep.subr.bf16.mxu0 %v8689_v4 }
 0x146   : > { %3184 = vmatpush1.bf16.msra.mxu0 %v8687_v7 }
 0x147   : > { %3185 = vmatprep.subr.bf16.mxu0 %v8692_v9 }
 0x148   : > { %7292 = vmatmul.mubr.msk.bf16.gmra.mrb[28].mxu0 %vm1796_vm0, %v597_v8  ;;  %7300 = vmatmul.mubr.msk.bf16.gmra.mrb[28].mxu1 %vm1796_vm0, %v597_v8 }
 0x149   : > { %3765 = vmatprep.mubr.bf16.mxu1 %v9342_v23 }
 0x14a   : > { %3186 = vmatpush1.bf16.msra.mxu0 %v8690_v10 }
 0x14b   : > { %3187 = vmatprep.subr.bf16.mxu0 %v8695_v11  ;;  %v8729_v11 = vld [vmem:[%s12096_s6 + $0x40] ss:$16 sps:$4 sm:$0xff]  }
 0x14c   : > { %3738 = vmatpush1.bf16.msra.mxu1 %v8729_v11 }
 0x14d   : > { %3739 = vmatprep.subr.bf16.mxu1 %v8734_v18 }
 0x14e   : > { %3188 = vmatpush1.bf16.msra.mxu0 %v8693_v12 }
 0x14f   : > { %3270 = vmatprep.subr.bf16.mxu0 %v8698_v13 }
 0x1e3   : > { %v2194_v26 = vpop.f32.mrb[0].mxu0  ;;  %v2646_v27 = vpop.f32.mrb[0].mxu1 }
 0x1e4   : > { %v7798_v28 = vadd.f32 %v2194_v26, %v10313_v21  ;;  %v7830_v29 = vadd.f32 %v2646_v27, %v10316_v22  ;;  %v2196_v30 = vpop.f32.mrb[1].mxu0  ;;  %v2648_v31 = vpop.f32.mrb[1].mxu1 }
 0x1e5   : > { %v7799_v32 = vadd.f32 %v2196_v30, %v10319_v24  ;;  %v7831_v33 = vadd.f32 %v2648_v31, %v10322_v25  ;;  %v2198_v34 = vpop.f32.mrb[2].mxu0  ;;  %v2650_v35 = vpop.f32.mrb[2].mxu1  ;;  %v8704_v30 = vld [vmem:[%s12094_s4 + $0x124] ss:$8 sps:$4 sm:$0xff]  }
 0x1e6   : > { %v7800_v36 = vadd.f32 %v2198_v34, %v10313_v21  ;;  %v7832_v37 = vadd.f32 %v2650_v35, %v10316_v22  ;;  %v2200_v38 = vpop.f32.mrb[3].mxu0  ;;  %v2652_v39 = vpop.f32.mrb[3].mxu1  ;;  %v2725_v44 = vmax.f32 %v7798_v28, 0.0  ;;  %v2727_v45 = vmax.f32 %v7830_v29, 0.0 }
 0x1e7   : > { %v7801_v41 = vadd.f32 %v2200_v38, %v10319_v24  ;;  %v7833_v42 = vadd.f32 %v2652_v39, %v10322_v25  ;;  %v2726_v49 = vmax.f32 %v7799_v32, 0.0  ;;  %v2728_v50 = vmax.f32 %v7831_v33, 0.0 }
 0x1e8   : > { %v2729_v46 = vmax.f32 %v7800_v36, 0.0  ;;  %v2731_v47 = vmax.f32 %v7832_v37, 0.0  ;;  %v8732_v37 = vld [vmem:[%s12096_s6 + $0x60] ss:$16 sps:$4 sm:$0xff]  }
 0x1e9   : > { %v2730_v51 = vmax.f32 %v7801_v41, 0.0  ;;  %v2732_v52 = vmax.f32 %v7833_v42, 0.0  ;;  %v8702_v42 = vld [vmem:[%s12094_s4 + $0x120] ss:$8 sps:$4 sm:$0xff]   ;;  %3740 = vmatpush1.bf16.msra.mxu1 %v8732_v37 }
 0x1ea   : > { %v2789_v53 = vpack.c.bf16 %v2729_v46, %v2725_v44  ;;  %v10341_v54 = vpack.c.bf16 %v2731_v47, %v2727_v45  ;;  %3741 = vmatprep.subr.bf16.mxu1 %v8737_v43 }
 0x1eb   : > { %v2790_v56 = vpack.c.bf16 %v2730_v51, %v2726_v49  ;;  %v10346_v57 = vpack.c.bf16 %v2732_v52, %v2728_v50  ;;  %v2204_v58 = vpop.f32.mrb[4].mxu0  ;;  %v2656_v59 = vpop.f32.mrb[4].mxu1 }
 0x1ec   : > { %v7802_v62 = vadd.f32 %v2204_v58, %v10313_v21  ;;  %v7834_v63 = vadd.f32 %v2656_v59, %v10316_v22  ;;  %v2206_v0 = vpop.f32.mrb[5].mxu0  ;;  %v2658_v1 = vpop.f32.mrb[5].mxu1  ;;  %v8735_v59 = vld [vmem:[%s12096_s6 + $0x80] ss:$16 sps:$4 sm:$0xff]  }
 0x1ed   : > { %v7803_v3 = vadd.f32 %v2206_v0, %v10319_v24  ;;  %v7835_v4 = vadd.f32 %v2658_v1, %v10322_v25  ;;  %v2208_v5 = vpop.f32.mrb[6].mxu0  ;;  %v2660_v6 = vpop.f32.mrb[6].mxu1  ;;  %3189 = vmatprep.mubr.bf16.mxu0 %v2790_v56  ;;  %3742 = vmatpush1.bf16.msra.mxu1 %v8735_v59 }
 0x1ee   : > { %v7804_v7 = vadd.f32 %v2208_v5, %v10313_v21  ;;  %v7836_v8 = vadd.f32 %v2660_v6, %v10316_v22  ;;  %v2210_v9 = vpop.f32.mrb[7].mxu0  ;;  %v2662_v10 = vpop.f32.mrb[7].mxu1  ;;  %3190 = vmatmul.mubr.bf16.vlgmr.msra.gmra.mrb[32].mxu0 %v2789_v53  ;;  %v2733_v26 = vmax.f32 %v7802_v62, 0.0  ;;  %v2735_v27 = vmax.f32 %v7834_v63, 0.0  ;;  %v8705_v62 = vld [vmem:[%s12094_s4 + $0x130] ss:$8 sps:$4 sm:$0xff]  }
 0x1ef   : > { %v7805_v12 = vadd.f32 %v2210_v9, %v10319_v24  ;;  %v7837_v13 = vadd.f32 %v2662_v10, %v10322_v25  ;;  %3271 = vmatpush1.bf16.msra.mxu0 %v8696_v60  ;;  %v2734_v31 = vmax.f32 %v7803_v3, 0.0  ;;  %v2736_v32 = vmax.f32 %v7835_v4, 0.0  ;;  %v8710_v3 = vld [vmem:[%s12094_s4 + $0x144] ss:$8 sps:$4 sm:$0xff]  }
 0x1f0   : > { %v2737_v28 = vmax.f32 %v7804_v7, 0.0  ;;  %v2739_v29 = vmax.f32 %v7836_v8, 0.0  ;;  %3272 = vmatprep.subr.bf16.mxu0 %v8701_v2 }
 0x1f1   : > { %v2738_v33 = vmax.f32 %v7805_v12, 0.0  ;;  %v2740_v34 = vmax.f32 %v7837_v13, 0.0 }
 0x1f2   : > { %v2793_v35 = vpack.c.bf16 %v2737_v28, %v2733_v26  ;;  %v10377_v36 = vpack.c.bf16 %v2739_v29, %v2735_v27  ;;  %v8713_v29 = vld [vmem:[%s12094_s4 + $0x154] ss:$8 sps:$4 sm:$0xff]  }
 0x1f3   : > { %v2794_v38 = vpack.c.bf16 %v2738_v33, %v2734_v31  ;;  %v10382_v39 = vpack.c.bf16 %v2740_v34, %v2736_v32  ;;  %v2214_v40 = vpop.f32.mrb[8].mxu0  ;;  %v2666_v41 = vpop.f32.mrb[8].mxu1  ;;  %3273 = vmatpush1.bf16.msra.mxu0 %v8699_v14  ;;  %v8708_v14 = vld [vmem:[%s12094_s4 + $0x140] ss:$8 sps:$4 sm:$0xff]  }
 0x1f4   : > { %v7806_v44 = vadd.f32 %v2214_v40, %v10313_v21  ;;  %v7838_v45 = vadd.f32 %v2666_v41, %v10316_v22  ;;  %v2216_v46 = vpop.f32.mrb[9].mxu0  ;;  %v2668_v47 = vpop.f32.mrb[9].mxu1  ;;  %3274 = vmatprep.subr.bf16.mxu0 %v8704_v30 }
 0x1f5   : > { %v7807_v49 = vadd.f32 %v2216_v46, %v10319_v24  ;;  %v7839_v50 = vadd.f32 %v2668_v47, %v10322_v25  ;;  %v2218_v51 = vpop.f32.mrb[10].mxu0  ;;  %v2670_v52 = vpop.f32.mrb[10].mxu1  ;;  %3199 = vmatprep.mubr.bf16.mxu0 %v2794_v38  ;;  %v8716_v47 = vld [vmem:[%s12094_s4 + $0x164] ss:$8 sps:$4 sm:$0xff]  }
 0x1f6   : > { %v7808_v53 = vadd.f32 %v2218_v51, %v10313_v21  ;;  %v7840_v55 = vadd.f32 %v2670_v52, %v10316_v22  ;;  %v2220_v56 = vpop.f32.mrb[11].mxu0  ;;  %v2672_v58 = vpop.f32.mrb[11].mxu1  ;;  %3200 = vmatmul.mubr.bf16.gmra.mrb[36].mxu0 %v2793_v35  ;;  %v2741_v63 = vmax.f32 %v7806_v44, 0.0  ;;  %v2743_v0 = vmax.f32 %v7838_v45, 0.0 }
 0x1f7   : > { %v7809_v60 = vadd.f32 %v2220_v56, %v10319_v24  ;;  %v7841_v61 = vadd.f32 %v2672_v58, %v10322_v25  ;;  %3275 = vmatpush1.bf16.msra.mxu0 %v8702_v42  ;;  %v2742_v4 = vmax.f32 %v7807_v49, 0.0  ;;  %v2744_v5 = vmax.f32 %v7839_v50, 0.0  ;;  %v8711_v42 = vld [vmem:[%s12094_s4 + $0x150] ss:$8 sps:$4 sm:$0xff]  }
 0x1f8   : > { %v2745_v1 = vmax.f32 %v7808_v53, 0.0  ;;  %v2747_v2 = vmax.f32 %v7840_v55, 0.0  ;;  %3276 = vmatprep.subr.bf16.mxu0 %v8707_v48 }
 0x1f9   : > { %v2746_v6 = vmax.f32 %v7809_v60, 0.0  ;;  %v2748_v7 = vmax.f32 %v7841_v61, 0.0  ;;  %v8714_v60 = vld [vmem:[%s12094_s4 + $0x160] ss:$8 sps:$4 sm:$0xff]  }
 0x1fa   : > { %v2797_v8 = vpack.c.bf16 %v2745_v1, %v2741_v63  ;;  %v10410_v9 = vpack.c.bf16 %v2747_v2, %v2743_v0  ;;  %v8719_v1 = vld [vmem:[%s12094_s4 + $0x174] ss:$8 sps:$4 sm:$0xff]  }
 0x1fb   : > { %v2798_v10 = vpack.c.bf16 %v2746_v6, %v2742_v4  ;;  %v10412_v11 = vpack.c.bf16 %v2748_v7, %v2744_v5  ;;  %v2224_v12 = vpop.f32.mrb[12].mxu0  ;;  %v2676_v13 = vpop.f32.mrb[12].mxu1  ;;  %3277 = vmatpush1.bf16.msra.mxu0 %v8705_v62 }
 0x1fc   : > { %v7810_v18 = vadd.f32 %v2224_v12, %v10313_v21  ;;  %v7842_v26 = vadd.f32 %v2676_v13, %v10316_v22  ;;  %v2226_v27 = vpop.f32.mrb[13].mxu0  ;;  %v2678_v28 = vpop.f32.mrb[13].mxu1  ;;  %3278 = vmatprep.subr.bf16.mxu0 %v8710_v3 }
 0x1fd   : > { %v7811_v30 = vadd.f32 %v2226_v27, %v10319_v24  ;;  %v7843_v31 = vadd.f32 %v2678_v28, %v10322_v25  ;;  %v2228_v32 = vpop.f32.mrb[14].mxu0  ;;  %v2680_v33 = vpop.f32.mrb[14].mxu1  ;;  %3209 = vmatprep.mubr.bf16.mxu0 %v2798_v10 }
 0x1fe   : > { %v7812_v34 = vadd.f32 %v2228_v32, %v10313_v21  ;;  %v7844_v35 = vadd.f32 %v2680_v33, %v10316_v22  ;;  %v2230_v37 = vpop.f32.mrb[15].mxu0  ;;  %v2682_v38 = vpop.f32.mrb[15].mxu1  ;;  %3210 = vmatmul.mubr.bf16.gmra.mrb[40].mxu0 %v2797_v8  ;;  %v2749_v43 = vmax.f32 %v7810_v18, 0.0  ;;  %v2751_v44 = vmax.f32 %v7842_v26, 0.0 }
 0x1ff   : > { %v7813_v40 = vadd.f32 %v2230_v37, %v10319_v24  ;;  %v7845_v41 = vadd.f32 %v2682_v38, %v10322_v25  ;;  %3279 = vmatpush1.bf16.msra.mxu0 %v8708_v14  ;;  %v2750_v48 = vmax.f32 %v7811_v30, 0.0  ;;  %v2752_v49 = vmax.f32 %v7843_v31, 0.0  ;;  %v8717_v14 = vld [vmem:[%s12094_s4 + $0x170] ss:$8 sps:$4 sm:$0xff]  }
 0x200   : > { %v2753_v45 = vmax.f32 %v7812_v34, 0.0  ;;  %v2755_v46 = vmax.f32 %v7844_v35, 0.0  ;;  %3280 = vmatprep.subr.bf16.mxu0 %v8713_v29  ;;  %v8722_v29 = vld [vmem:[%s12094_s4 + $0x184] ss:$8 sps:$4 sm:$0xff]  }
 0x201   : > { %v2754_v50 = vmax.f32 %v7813_v40, 0.0  ;;  %v2756_v51 = vmax.f32 %v7845_v41, 0.0 }
 0x202   : > { %v2801_v52 = vpack.c.bf16 %v2753_v45, %v2749_v43  ;;  %v10434_v53 = vpack.c.bf16 %v2755_v46, %v2751_v44 }
 0x203   : > { %v2802_v55 = vpack.c.bf16 %v2754_v50, %v2750_v48  ;;  %v10436_v56 = vpack.c.bf16 %v2756_v51, %v2752_v49  ;;  %v2234_v58 = vpop.f32.mrb[16].mxu0  ;;  %v2686_v59 = vpop.f32.mrb[16].mxu1  ;;  %3281 = vmatpush1.bf16.msra.mxu0 %v8711_v42  ;;  %v8720_v42 = vld [vmem:[%s12094_s4 + $0x180] ss:$8 sps:$4 sm:$0xff]  }
 0x204   : > { %v7814_v61 = vadd.f32 %v2234_v58, %v10313_v21  ;;  %v7846_v62 = vadd.f32 %v2686_v59, %v10316_v22  ;;  %v2236_v63 = vpop.f32.mrb[17].mxu0  ;;  %v2688_v0 = vpop.f32.mrb[17].mxu1  ;;  %3282 = vmatprep.subr.bf16.mxu0 %v8716_v47 }
 0x205   : > { %v7815_v2 = vadd.f32 %v2236_v63, %v10319_v24  ;;  %v7847_v3 = vadd.f32 %v2688_v0, %v10322_v25  ;;  %v2238_v4 = vpop.f32.mrb[18].mxu0  ;;  %v2690_v5 = vpop.f32.mrb[18].mxu1  ;;  %3219 = vmatprep.mubr.bf16.mxu0 %v2802_v55 }
 0x206   : > { %v7816_v6 = vadd.f32 %v2238_v4, %v10313_v21  ;;  %v7848_v7 = vadd.f32 %v2690_v5, %v10316_v22  ;;  %v2240_v8 = vpop.f32.mrb[19].mxu0  ;;  %v2692_v10 = vpop.f32.mrb[19].mxu1  ;;  %3220 = vmatmul.mubr.bf16.gmra.mrb[44].mxu0 %v2801_v52  ;;  %v2757_v18 = vmax.f32 %v7814_v61, 0.0  ;;  %v2759_v26 = vmax.f32 %v7846_v62, 0.0 }
 0x207   : > { %v7817_v12 = vadd.f32 %v2240_v8, %v10319_v24  ;;  %v7849_v13 = vadd.f32 %v2692_v10, %v10322_v25  ;;  %3283 = vmatpush1.bf16.msra.mxu0 %v8714_v60  ;;  %v2758_v30 = vmax.f32 %v7815_v2, 0.0  ;;  %v2760_v31 = vmax.f32 %v7847_v3, 0.0 }
 0x208   : > { %v2761_v27 = vmax.f32 %v7816_v6, 0.0  ;;  %v2763_v28 = vmax.f32 %v7848_v7, 0.0  ;;  %3284 = vmatprep.subr.bf16.mxu0 %v8719_v1 }
 0x209   : > { %v2762_v32 = vmax.f32 %v7817_v12, 0.0  ;;  %v2764_v33 = vmax.f32 %v7849_v13, 0.0 }
 0x20a   : > { %v2805_v34 = vpack.c.bf16 %v2761_v27, %v2757_v18  ;;  %v10458_v35 = vpack.c.bf16 %v2763_v28, %v2759_v26 }
 0x20b   : > { %v2806_v37 = vpack.c.bf16 %v2762_v32, %v2758_v30  ;;  %v10460_v38 = vpack.c.bf16 %v2764_v33, %v2760_v31  ;;  %v2244_v40 = vpop.f32.mrb[20].mxu0  ;;  %v2696_v41 = vpop.f32.mrb[20].mxu1  ;;  %3285 = vmatpush1.bf16.msra.mxu0 %v8717_v14 }
 0x20c   : > { %v7818_v43 = vadd.f32 %v2244_v40, %v10313_v21  ;;  %v7850_v44 = vadd.f32 %v2696_v41, %v10316_v22  ;;  %v2246_v45 = vpop.f32.mrb[21].mxu0  ;;  %v2698_v46 = vpop.f32.mrb[21].mxu1  ;;  %3286 = vmatprep.subr.bf16.mxu0 %v8722_v29 }
 0x20d   : > { %v7819_v47 = vadd.f32 %v2246_v45, %v10319_v24  ;;  %v7851_v48 = vadd.f32 %v2698_v46, %v10322_v25  ;;  %v2248_v49 = vpop.f32.mrb[22].mxu0  ;;  %v2700_v50 = vpop.f32.mrb[22].mxu1  ;;  %3229 = vmatprep.mubr.bf16.mxu0 %v2806_v37 }
 0x20e   : > { %v7820_v51 = vadd.f32 %v2248_v49, %v10313_v21  ;;  %v7852_v52 = vadd.f32 %v2700_v50, %v10316_v22  ;;  %v2250_v55 = vpop.f32.mrb[23].mxu0  ;;  %v2702_v58 = vpop.f32.mrb[23].mxu1  ;;  %3230 = vmatmul.mubr.bf16.gmra.mrb[48].mxu0 %v2805_v34  ;;  %v2765_v61 = vmax.f32 %v7818_v43, 0.0  ;;  %v2767_v62 = vmax.f32 %v7850_v44, 0.0 }
 0x20f   : > { %v7821_v59 = vadd.f32 %v2250_v55, %v10319_v24  ;;  %v7853_v60 = vadd.f32 %v2702_v58, %v10322_v25  ;;  %3287 = vmatpush1.bf16.msra.mxu0 %v8720_v42  ;;  %v2766_v1 = vmax.f32 %v7819_v47, 0.0  ;;  %v2768_v2 = vmax.f32 %v7851_v48, 0.0 }
 0x210   : > { %v2769_v63 = vmax.f32 %v7820_v51, 0.0  ;;  %v2771_v0 = vmax.f32 %v7852_v52, 0.0 }
 0x211   : > { %v2770_v3 = vmax.f32 %v7821_v59, 0.0  ;;  %v2772_v4 = vmax.f32 %v7853_v60, 0.0 }
 0x212   : > { %v2809_v5 = vpack.c.bf16 %v2769_v63, %v2765_v61  ;;  %v10473_v6 = vpack.c.bf16 %v2771_v0, %v2767_v62 }
 0x213   : > { %v2810_v7 = vpack.c.bf16 %v2770_v3, %v2766_v1  ;;  %v10475_v8 = vpack.c.bf16 %v2772_v4, %v2768_v2  ;;  %v2254_v10 = vpop.f32.mrb[24].mxu0  ;;  %v2706_v12 = vpop.f32.mrb[24].mxu1 }
 0x214   : > { %v7822_v13 = vadd.f32 %v2254_v10, %v10313_v21  ;;  %v7854_v14 = vadd.f32 %v2706_v12, %v10316_v22  ;;  %v2256_v18 = vpop.f32.mrb[25].mxu0  ;;  %v2708_v26 = vpop.f32.mrb[25].mxu1 }
 0x215   : > { %v7823_v27 = vadd.f32 %v2256_v18, %v10319_v24  ;;  %v7855_v28 = vadd.f32 %v2708_v26, %v10322_v25  ;;  %v2258_v29 = vpop.f32.mrb[26].mxu0  ;;  %v2710_v30 = vpop.f32.mrb[26].mxu1  ;;  %3239 = vmatprep.mubr.bf16.mxu0 %v2810_v7 }
 0x216   : > { %v7824_v31 = vadd.f32 %v2258_v29, %v10313_v21  ;;  %v7856_v32 = vadd.f32 %v2710_v30, %v10316_v22  ;;  %v2260_v33 = vpop.f32.mrb[27].mxu0  ;;  %v2712_v34 = vpop.f32.mrb[27].mxu1  ;;  %3240 = vmatmul.mubr.bf16.gmra.mrb[52].mxu0 %v2809_v5  ;;  %v2773_v41 = vmax.f32 %v7822_v13, 0.0  ;;  %v2775_v42 = vmax.f32 %v7854_v14, 0.0 }
 0x217   : > { %v7825_v37 = vadd.f32 %v2260_v33, %v10319_v24  ;;  %v7857_v40 = vadd.f32 %v2712_v34, %v10322_v25  ;;  %v2774_v45 = vmax.f32 %v7823_v27, 0.0  ;;  %v2776_v46 = vmax.f32 %v7855_v28, 0.0 }
 0x218   : > { %v2777_v43 = vmax.f32 %v7824_v31, 0.0  ;;  %v2779_v44 = vmax.f32 %v7856_v32, 0.0 }
 0x219   : > { %v2778_v47 = vmax.f32 %v7825_v37, 0.0  ;;  %v2780_v48 = vmax.f32 %v7857_v40, 0.0 }
 0x21a   : > { %v2813_v49 = vpack.c.bf16 %v2777_v43, %v2773_v41  ;;  %v2815_v50 = vpack.c.bf16 %v2779_v44, %v2775_v42 }
 0x21b   : > { %v2814_v51 = vpack.c.bf16 %v2778_v47, %v2774_v45  ;;  %v2816_v52 = vpack.c.bf16 %v2780_v48, %v2776_v46  ;;  %v2264_v55 = vpop.f32.mrb[28].mxu0  ;;  %v2716_v58 = vpop.f32.mrb[28].mxu1 }
 0x21c   : > { %v7826_v59 = vadd.f32 %v2264_v55, %v10313_v21  ;;  %v7858_v60 = vadd.f32 %v2716_v58, %v10316_v22  ;;  %v2266_v61 = vpop.f32.mrb[29].mxu0  ;;  %v2718_v62 = vpop.f32.mrb[29].mxu1 }
 0x21d   : > { %v7827_v63 = vadd.f32 %v2266_v61, %v10319_v24  ;;  %v7859_v0 = vadd.f32 %v2718_v62, %v10322_v25  ;;  %v2268_v1 = vpop.f32.mrb[30].mxu0  ;;  %v2720_v2 = vpop.f32.mrb[30].mxu1  ;;  %3249 = vmatprep.mubr.bf16.mxu0 %v2814_v51 }
 0x21e   : > { %v7828_v3 = vadd.f32 %v2268_v1, %v10313_v21  ;;  %v7860_v4 = vadd.f32 %v2720_v2, %v10316_v22  ;;  %v2270_v5 = vpop.f32.mrb[31].mxu0  ;;  %v2722_v7 = vpop.f32.mrb[31].mxu1  ;;  %3250 = vmatmul.mubr.bf16.gmra.mrb[56].mxu0 %v2813_v49  ;;  %v2781_v13 = vmax.f32 %v7826_v59, 0.0  ;;  %v2783_v14 = vmax.f32 %v7858_v60, 0.0  ;;  %v8740_v22 = vld [vmem:[%s12096_s6 + $0xa4] ss:$16 sps:$4 sm:$0xff]  }
 0x21f   : > { %v7829_v10 = vadd.f32 %v2270_v5, %v10319_v24  ;;  %v7861_v12 = vadd.f32 %v2722_v7, %v10322_v25  ;;  %v2782_v27 = vmax.f32 %v7827_v63, 0.0  ;;  %v2784_v28 = vmax.f32 %v7859_v0, 0.0  ;;  %v8738_v24 = vld [vmem:[%s12096_s6 + $0xa0] ss:$16 sps:$4 sm:$0xff]   ;;  %3743 = vmatprep.subr.bf16.mxu1 %v8740_v22  ;;  %v8743_v25 = vld [vmem:[%s12096_s6 + $0xc4] ss:$16 sps:$4 sm:$0xff]  }
 0x220   : > { %v2785_v18 = vmax.f32 %v7828_v3, 0.0  ;;  %v2787_v26 = vmax.f32 %v7860_v4, 0.0  ;;  %3744 = vmatpush1.bf16.msra.mxu1 %v8738_v24  ;;  %v3415_v60 = vld [vmem:[%s10571_s12] sm:$0xff]  ;;  %v3416_v2 = vld [vmem:[%s10571_s12 + $0x8] sm:$0xff] }
 0x221   : > { %v2786_v29 = vmax.f32 %v7829_v10, 0.0  ;;  %v2788_v30 = vmax.f32 %v7861_v12, 0.0  ;;  %3745 = vmatprep.subr.bf16.mxu1 %v8743_v25  ;;  %v8771_v12 = vld [vmem:[%s12098_s8] ss:$28 sps:$4 sm:$0xff]   ;;  %v8747_v25 = vld [vmem:[%s12096_s6 + $0x8] ss:$16 sps:$4 sm:$0xff]  }
 0x222   : > { %v2817_v31 = vpack.c.bf16 %v2785_v18, %v2781_v13  ;;  %v2819_v32 = vpack.c.bf16 %v2787_v26, %v2783_v14  ;;  %v8773_v13 = vld [vmem:[%s12098_s8 + $0x4] ss:$28 sps:$4 sm:$0xff]  }
 0x223   : > { %v2818_v21 = vpack.c.bf16 %v2786_v29, %v2782_v27  ;;  %v2820_v33 = vpack.c.bf16 %v2788_v30, %v2784_v28  ;;  %5216 = vmatprep.subr.bf16.mxu0 %v8773_v13  ;;  %v8779_v29 = vld [vmem:[%s12098_s8 + $0x3c] ss:$28 sps:$4 sm:$0xff]  }
 0x225   : > { %3259 = vmatprep.mubr.bf16.mxu0 %v2818_v21 }
 0x226   : > { %3260 = vmatmul.mubr.bf16.gmra.mrb[60].mxu0 %v2817_v31 }
 0x227   : > { %7351 = vmatprep.mubr.msk.bf16.mxu0 %vm1796_vm0, %v10346_v57  ;;  %v8746_v57 = vld [vmem:[%s12096_s6 + $0xe4] ss:$16 sps:$4 sm:$0xff]  }
 0x22e   : > { %3303 = vmatmul.mubr.bf16.vlgmr.msra.gmra.mrb[32].mxu0 %v10341_v54  ;;  %v8741_v54 = vld [vmem:[%s12096_s6 + $0xc0] ss:$16 sps:$4 sm:$0xff]  }
 0x22f   : > { %7352 = vmatprep.mubr.msk.bf16.mxu0 %vm1796_vm0, %v10382_v39  ;;  %3746 = vmatpush1.bf16.msra.mxu1 %v8741_v54  ;;  %v8749_v39 = vld [vmem:[%s12096_s6 + $0xc] ss:$16 sps:$4 sm:$0xff]   ;;  %v3417_v54 = vld [vmem:[%s10571_s12 + $0x10] sm:$0xff] }
 0x230   : > { %3747 = vmatprep.subr.bf16.mxu1 %v8746_v57  ;;  %5217 = vmatpush1.bf16.msra.mxu0 %v8771_v12  ;;  %v8795_v12 = vld [vmem:[%s12098_s8 + $0xe0] ss:$28 sps:$4 sm:$0xff]  }
 0x231   : > { %5218 = vmatprep.subr.bf16.mxu0 %v8779_v29 }
 0x236   : > { %3313 = vmatmul.mubr.bf16.gmra.mrb[36].mxu0 %v10377_v36  ;;  %v8744_v36 = vld [vmem:[%s12096_s6 + $0xe0] ss:$16 sps:$4 sm:$0xff]  }
 0x237   : > { %7353 = vmatprep.mubr.msk.bf16.mxu0 %vm1796_vm0, %v10412_v11  ;;  %3748 = vmatpush1.bf16.msra.mxu1 %v8744_v36 }
 0x238   : > { %3846 = vmatprep.subr.bf16.mxu1 %v8749_v39 }
 0x23e   : > { %3323 = vmatmul.mubr.bf16.gmra.mrb[40].mxu0 %v10410_v9  ;;  %v2871_v9 = vld [vmem:[%s12095_s5] sm:$0x3] }
 0x23f   : > { %7354 = vmatprep.mubr.msk.bf16.mxu0 %vm1796_vm0, %v10436_v56  ;;  %v10541_v11 = vrot.slane %v2871_v9, %v10298_v16 }
 0x246   : > { %3333 = vmatmul.mubr.bf16.gmra.mrb[44].mxu0 %v10434_v53  ;;  %v10544_v53 = vrot.slane %v2871_v9, %v10307_v19  ;;  %v8752_v9 = vld [vmem:[%s12096_s6 + $0x2c] ss:$16 sps:$4 sm:$0xff]  }
 0x247   : > { %7355 = vmatprep.mubr.msk.bf16.mxu0 %vm1796_vm0, %v10460_v38 }
 0x24e   : > { %3343 = vmatmul.mubr.bf16.gmra.mrb[48].mxu0 %v10458_v35 }
 0x24f   : > { %7356 = vmatprep.mubr.msk.bf16.mxu0 %vm1796_vm0, %v10475_v8 }
 0x256   : > { %3353 = vmatmul.mubr.bf16.gmra.mrb[52].mxu0 %v10473_v6 }
 0x257   : > { %7357 = vmatprep.mubr.msk.bf16.mxu0 %vm1796_vm0, %v2816_v52 }
 0x25e   : > { %3363 = vmatmul.mubr.bf16.gmra.mrb[56].mxu0 %v2815_v50 }
 0x25f   : > { %7358 = vmatprep.mubr.msk.bf16.mxu0 %vm1796_vm0, %v2820_v33  ;;  %v8785_v33 = vld [vmem:[%s12098_s8 + $0x74] ss:$28 sps:$4 sm:$0xff]  }
 0x266   : > { %3373 = vmatmul.mubr.bf16.gmra.mrb[60].mxu0 %v2819_v32  ;;  %v8777_v32 = vld [vmem:[%s12098_s8 + $0x38] ss:$28 sps:$4 sm:$0xff]  }
 0x267   : > { %5219 = vmatpush1.bf16.msra.mxu0 %v8777_v32 }
 0x268   : > { %5220 = vmatprep.subr.bf16.mxu0 %v8785_v33 }
 0x301   : > { %v3304_v56 = vpop.f32.mrb[32].mxu0 }
 0x302   : > { %v7862_v35 = vadd.f32 %v3304_v56, %v10541_v11  ;;  %v3306_v38 = vpop.f32.mrb[33].mxu0 }
 0x303   : > { %v7863_v6 = vadd.f32 %v3306_v38, %v10544_v53  ;;  %v3308_v8 = vpop.f32.mrb[34].mxu0 }
 0x304   : > { %3383 = vst [vmem:[%s10548_s25] sm:$0xff] %v7862_v35  ;;  %v7864_v34 = vadd.f32 %v3308_v8, %v10541_v11  ;;  %v3310_v37 = vpop.f32.mrb[35].mxu0  ;;  %v8783_v8 = vld [vmem:[%s12098_s8 + $0x70] ss:$28 sps:$4 sm:$0xff]  }
 0x305   : > { %3384 = vst [vmem:[%s10548_s25 + $0x8] sm:$0xff] %v7863_v6  ;;  %v3431_v40 = vmul.f32 0.5, %v7863_v6  ;;  %v7865_v41 = vadd.f32 %v3310_v37, %v10544_v53  ;;  %v3418_v6 = vld [vmem:[%s10571_s12 + $0x18] sm:$0xff]  ;;  %5221 = vmatpush1.bf16.msra.mxu0 %v8783_v8 }
 0x306   : > { %3385 = vst [vmem:[%s10548_s25 + $0x10] sm:$0xff] %v7864_v34 }
 0x307   : > { %v3447_v42 = vmul.f32 1.442695, %v3431_v40  ;;  %3386 = vst [vmem:[%s10548_s25 + $0x18] sm:$0xff] %v7865_v41  ;;  %v3432_v43 = vmul.f32 0.5, %v7865_v41  ;;  %v8791_v41 = vld [vmem:[%s12098_s8 + $0xac] ss:$28 sps:$4 sm:$0xff]  }
 0x308   : > { %5222 = vmatprep.subr.bf16.mxu0 %v8791_v41  ;;  %v3422_v41 = vld [vmem:[%s10571_s12 + $0x38] sm:$0xff] }
 0x309   : > { %9021 = vpow2.f32 %v3447_v42  ;;  %v3449_v44 = vmul.f32 1.442695, %v3432_v43  ;;  %v3314_v45 = vpop.f32.mrb[36].mxu0 }
 0x30a   : > { %v10557_v46 = vadd.f32 %v3314_v45, %v10541_v11  ;;  %v3316_v47 = vpop.f32.mrb[37].mxu0  ;;  %v8750_v45 = vld [vmem:[%s12096_s6 + $0x28] ss:$16 sps:$4 sm:$0xff]  }
 0x30b   : > { %9023 = vpow2.f32 %v3449_v44  ;;  %v7867_v48 = vadd.f32 %v3316_v47, %v10544_v53  ;;  %v3318_v49 = vpop.f32.mrb[38].mxu0 }
 0x30c   : > { %3387 = vst [vmem:[%s10548_s25 + $0x20] sm:$0xff] %v10557_v46  ;;  %v10564_v50 = vadd.f32 %v3318_v49, %v10541_v11  ;;  %v3320_v51 = vpop.f32.mrb[39].mxu0  ;;  %v8755_v49 = vld [vmem:[%s12096_s6 + $0x4c] ss:$16 sps:$4 sm:$0xff]  }
 0x30d   : > { %3388 = vst [vmem:[%s10548_s25 + $0x28] sm:$0xff] %v7867_v48  ;;  %v3433_v52 = vmul.f32 0.5, %v7867_v48  ;;  %v7869_v55 = vadd.f32 %v3320_v51, %v10544_v53 }
 0x30e   : > { %3389 = vst [vmem:[%s10548_s25 + $0x30] sm:$0xff] %v10564_v50 }
 0x30f   : > { %v3451_v58 = vmul.f32 1.442695, %v3433_v52  ;;  %3390 = vst [vmem:[%s10548_s25 + $0x38] sm:$0xff] %v7869_v55  ;;  %v3434_v59 = vmul.f32 0.5, %v7869_v55  ;;  %v8789_v55 = vld [vmem:[%s12098_s8 + $0xa8] ss:$28 sps:$4 sm:$0xff]  }
 0x310   : > { %5223 = vmatpush1.bf16.msra.mxu0 %v8789_v55 }
 0x311   : > { %9025 = vpow2.f32 %v3451_v58  ;;  %v3453_v61 = vmul.f32 1.442695, %v3434_v59  ;;  %v3324_v62 = vpop.f32.mrb[40].mxu0 }
 0x312   : > { %v10578_v63 = vadd.f32 %v3324_v62, %v10541_v11  ;;  %v3326_v0 = vpop.f32.mrb[41].mxu0  ;;  %v8753_v62 = vld [vmem:[%s12096_s6 + $0x48] ss:$16 sps:$4 sm:$0xff]  }
 0x313   : > { %v9022_v1 = vpop.eup %9021  ;;  %9027 = vpow2.f32 %v3453_v61  ;;  %v7871_v3 = vadd.f32 %v3326_v0, %v10544_v53  ;;  %v3328_v4 = vpop.f32.mrb[42].mxu0  ;;  %v3419_v61 = vld [vmem:[%s10571_s12 + $0x20] sm:$0xff] }
 0x314   : > { %v3479_v5 = vmul.f32 %v9022_v1, %v3415_v60  ;;  %3391 = vst [vmem:[%s10548_s25 + $0x40] sm:$0xff] %v10578_v63  ;;  %v10585_v7 = vadd.f32 %v3328_v4, %v10541_v11  ;;  %v3330_v10 = vpop.f32.mrb[43].mxu0 }
 0x315   : > { %v9024_v14 = vpop.eup %9023  ;;  %3392 = vst [vmem:[%s10548_s25 + $0x48] sm:$0xff] %v7871_v3  ;;  %v3435_v18 = vmul.f32 0.5, %v7871_v3  ;;  %v7873_v26 = vadd.f32 %v3330_v10, %v10544_v53  ;;  %v3420_v10 = vld [vmem:[%s10571_s12 + $0x28] sm:$0xff] }
 0x316   : > { %v3480_v27 = vmul.f32 %v9024_v14, %v3416_v2  ;;  %3393 = vst [vmem:[%s10548_s25 + $0x50] sm:$0xff] %v10585_v7  ;;  %v3495_v28 = vadd.f32 %v7862_v35, %v3479_v5  ;;  %v8758_v2 = vld [vmem:[%s12096_s6 + $0x6c] ss:$16 sps:$4 sm:$0xff]  }
 0x317   : > { %v3455_v30 = vmul.f32 1.442695, %v3435_v18  ;;  %3394 = vst [vmem:[%s10548_s25 + $0x58] sm:$0xff] %v7873_v26  ;;  %v3436_v31 = vmul.f32 0.5, %v7873_v26  ;;  %v8803_v26 = vld [vmem:[%s12098_s8 + $0x11c] ss:$28 sps:$4 sm:$0xff]  }
 0x318   : > { %v3496_v21 = vadd.f32 %v7864_v34, %v3480_v27 }
 0x319   : > { %9029 = vpow2.f32 %v3455_v30  ;;  %v3457_v22 = vmul.f32 1.442695, %v3436_v31  ;;  %v3334_v24 = vpop.f32.mrb[44].mxu0  ;;  %v8756_v30 = vld [vmem:[%s12096_s6 + $0x68] ss:$16 sps:$4 sm:$0xff]  }
 0x31a   : > { %v10612_v57 = vadd.f32 %v3334_v24, %v10541_v11  ;;  %v3336_v36 = vpop.f32.mrb[45].mxu0  ;;  %v10614_v39 = vpack.c.bf16 %v3496_v21, %v3495_v28  ;;  %v8761_v21 = vld [vmem:[%s12096_s6 + $0x8c] ss:$16 sps:$4 sm:$0xff]   ;;  %v8801_v24 = vld [vmem:[%s12098_s8 + $0x118] ss:$28 sps:$4 sm:$0xff]  }
 0x31b   : > { %v9026_v56 = vpop.eup %9025  ;;  %9031 = vpow2.f32 %v3457_v22  ;;  %v7875_v35 = vadd.f32 %v3336_v36, %v10544_v53  ;;  %v3338_v38 = vpop.f32.mrb[46].mxu0 }
 0x31c   : > { %3395 = vst [vmem:[%s10548_s25 + $0x60] sm:$0xff] %v10612_v57  ;;  %v10627_v34 = vadd.f32 %v3338_v38, %v10541_v11  ;;  %v3340_v37 = vpop.f32.mrb[47].mxu0  ;;  %3766 = vmatmul.mubr.bf16.vlgmr.msra.gmra.mrb[32].mxu1 %v10614_v39  ;;  %v3481_v40 = vmul.f32 %v9026_v56, %v3417_v54  ;;  %v8759_v56 = vld [vmem:[%s12096_s6 + $0x88] ss:$16 sps:$4 sm:$0xff]  }
 0x31d   : > { %v9028_v42 = vpop.eup %9027  ;;  %3396 = vst [vmem:[%s10548_s25 + $0x68] sm:$0xff] %v7875_v35  ;;  %v3437_v43 = vmul.f32 0.5, %v7875_v35  ;;  %v7877_v44 = vadd.f32 %v3340_v37, %v10544_v53  ;;  %3847 = vmatpush1.bf16.msra.mxu1 %v8747_v25  ;;  %3775 = vmatprep.mubr.bf16.mxu1 %v9342_v23 }
 0x31e   : > { %3397 = vst [vmem:[%s10548_s25 + $0x70] sm:$0xff] %v10627_v34  ;;  %v3482_v47 = vmul.f32 %v9028_v42, %v3418_v6  ;;  %v3497_v48 = vadd.f32 %v10557_v46, %v3481_v40  ;;  %3848 = vmatprep.subr.bf16.mxu1 %v8752_v9  ;;  %v8797_v46 = vld [vmem:[%s12098_s8 + $0xe4] ss:$28 sps:$4 sm:$0xff]   ;;  %v3421_v9 = vld [vmem:[%s10571_s12 + $0x30] sm:$0xff]  ;;  %v8764_v6 = vld [vmem:[%s12096_s6 + $0xac] ss:$16 sps:$4 sm:$0xff]  }
 0x31f   : > { %v3459_v51 = vmul.f32 1.442695, %v3437_v43  ;;  %3398 = vst [vmem:[%s10548_s25 + $0x78] sm:$0xff] %v7877_v44  ;;  %v3438_v52 = vmul.f32 0.5, %v7877_v44  ;;  %5224 = vmatprep.subr.bf16.mxu0 %v8797_v46  ;;  %v8807_v42 = vld [vmem:[%s12098_s8 + $0x150] ss:$28 sps:$4 sm:$0xff]  }
 0x320   : > { %v3498_v58 = vadd.f32 %v10564_v50, %v3482_v47  ;;  %5225 = vmatpush1.bf16.msra.mxu0 %v8795_v12  ;;  %v8815_v47 = vld [vmem:[%s12098_s8 + $0x18c] ss:$28 sps:$4 sm:$0xff]  }
 0x321   : > { %9033 = vpow2.f32 %v3459_v51  ;;  %v3461_v59 = vmul.f32 1.442695, %v3438_v52  ;;  %v3344_v60 = vpop.f32.mrb[48].mxu0  ;;  %3849 = vmatpush1.bf16.msra.mxu1 %v8750_v45  ;;  %5226 = vmatprep.subr.bf16.mxu0 %v8803_v26  ;;  %v8762_v52 = vld [vmem:[%s12096_s6 + $0xa8] ss:$16 sps:$4 sm:$0xff]  }
 0x322   : > { %v10658_v0 = vadd.f32 %v3344_v60, %v10541_v11  ;;  %v3346_v50 = vpop.f32.mrb[49].mxu0  ;;  %v10660_v1 = vpack.c.bf16 %v3498_v58, %v3497_v48  ;;  %3850 = vmatprep.subr.bf16.mxu1 %v8755_v49  ;;  %v8767_v46 = vld [vmem:[%s12096_s6 + $0xcc] ss:$16 sps:$4 sm:$0xff]  }
 0x323   : > { %v9030_v3 = vpop.eup %9029  ;;  %9035 = vpow2.f32 %v3461_v59  ;;  %v7879_v4 = vadd.f32 %v3346_v50, %v10544_v53  ;;  %v3348_v5 = vpop.f32.mrb[50].mxu0  ;;  %v8770_v12 = vld [vmem:[%s12096_s6 + $0xec] ss:$16 sps:$4 sm:$0xff]  }
 0x324   : > { %3399 = vst [vmem:[%s10548_s25 + $0x80] sm:$0xff] %v10658_v0  ;;  %v10673_v13 = vadd.f32 %v3348_v5, %v10541_v11  ;;  %v3350_v14 = vpop.f32.mrb[51].mxu0  ;;  %3776 = vmatmul.mubr.bf16.gmra.mrb[36].mxu1 %v10660_v1  ;;  %v3483_v18 = vmul.f32 %v9030_v3, %v3419_v61  ;;  %5227 = vmatpush1.bf16.msra.mxu0 %v8801_v24  ;;  %v8813_v61 = vld [vmem:[%s12098_s8 + $0x188] ss:$28 sps:$4 sm:$0xff]  }
 0x325   : > { %v9032_v27 = vpop.eup %9031  ;;  %3400 = vst [vmem:[%s10548_s25 + $0x88] sm:$0xff] %v7879_v4  ;;  %v3439_v28 = vmul.f32 0.5, %v7879_v4  ;;  %v7881_v29 = vadd.f32 %v3350_v14, %v10544_v53  ;;  %3785 = vmatprep.mubr.bf16.mxu1 %v9342_v23  ;;  %3851 = vmatpush1.bf16.msra.mxu1 %v8753_v62  ;;  %v3423_v3 = vld [vmem:[%s10571_s12 + $0x40] sm:$0xff]  ;;  %v8765_v4 = vld [vmem:[%s12096_s6 + $0xc8] ss:$16 sps:$4 sm:$0xff]  }
 0x326   : > { %3401 = vst [vmem:[%s10548_s25 + $0x90] sm:$0xff] %v10673_v13  ;;  %v3484_v31 = vmul.f32 %v9032_v27, %v3420_v10  ;;  %v3499_v32 = vadd.f32 %v10578_v63, %v3483_v18  ;;  %3852 = vmatprep.subr.bf16.mxu1 %v8758_v2  ;;  %v8809_v63 = vld [vmem:[%s12098_s8 + $0x154] ss:$28 sps:$4 sm:$0xff]   ;;  %v3424_v27 = vld [vmem:[%s10571_s12 + $0x48] sm:$0xff] }
 0x327   : > { %v3463_v33 = vmul.f32 1.442695, %v3439_v28  ;;  %3402 = vst [vmem:[%s10548_s25 + $0x98] sm:$0xff] %v7881_v29  ;;  %v3440_v22 = vmul.f32 0.5, %v7881_v29  ;;  %5228 = vmatprep.subr.bf16.mxu0 %v8809_v63  ;;  %v8819_v28 = vld [vmem:[%s12098_s8 + $0x1c0] ss:$28 sps:$4 sm:$0xff]  }
 0x328   : > { %v3500_v25 = vadd.f32 %v10585_v7, %v3484_v31  ;;  %5229 = vmatpush1.bf16.msra.mxu0 %v8807_v42  ;;  %v8768_v24 = vld [vmem:[%s12096_s6 + $0xe8] ss:$16 sps:$4 sm:$0xff]  }
 0x329   : > { %9037 = vpow2.f32 %v3463_v33  ;;  %v3465_v54 = vmul.f32 1.442695, %v3440_v22  ;;  %v3354_v36 = vpop.f32.mrb[52].mxu0  ;;  %3853 = vmatpush1.bf16.msra.mxu1 %v8756_v30  ;;  %5230 = vmatprep.subr.bf16.mxu0 %v8815_v47  ;;  %v3426_v47 = vld [vmem:[%s10571_s12 + $0x58] sm:$0xff] }
 0x32a   : > { %v10704_v35 = vadd.f32 %v3354_v36, %v10541_v11  ;;  %v3356_v7 = vpop.f32.mrb[53].mxu0  ;;  %v10706_v38 = vpack.c.bf16 %v3500_v25, %v3499_v32  ;;  %3854 = vmatprep.subr.bf16.mxu1 %v8761_v21  ;;  %v8827_v32 = vld [vmem:[%s12098_s8 + $0x1fc] ss:$28 sps:$4 sm:$0xff]  }
 0x32b   : > { %v9034_v8 = vpop.eup %9033  ;;  %9039 = vpow2.f32 %v3465_v54  ;;  %v7883_v37 = vadd.f32 %v3356_v7, %v10544_v53  ;;  %v3358_v40 = vpop.f32.mrb[54].mxu0  ;;  %v8776_v54 = vld [vmem:[%s12098_s8 + $0xc] ss:$28 sps:$4 sm:$0xff]  }
 0x32c   : > { %3403 = vst [vmem:[%s10548_s25 + $0xa0] sm:$0xff] %v10704_v35  ;;  %v10719_v43 = vadd.f32 %v3358_v40, %v10541_v11  ;;  %v3360_v44 = vpop.f32.mrb[55].mxu0  ;;  %3786 = vmatmul.mubr.bf16.gmra.mrb[40].mxu1 %v10706_v38  ;;  %v3485_v45 = vmul.f32 %v9034_v8, %v3421_v9  ;;  %5231 = vmatpush1.bf16.msra.mxu0 %v8813_v61 }
 0x32d   : > { %v9036_v48 = vpop.eup %9035  ;;  %3404 = vst [vmem:[%s10548_s25 + $0xa8] sm:$0xff] %v7883_v37  ;;  %v3441_v49 = vmul.f32 0.5, %v7883_v37  ;;  %v7885_v51 = vadd.f32 %v3360_v44, %v10544_v53  ;;  %3795 = vmatprep.mubr.bf16.mxu1 %v9342_v23  ;;  %3855 = vmatpush1.bf16.msra.mxu1 %v8759_v56  ;;  %v8825_v56 = vld [vmem:[%s12098_s8 + $0x1f8] ss:$28 sps:$4 sm:$0xff]  }
 0x32e   : > { %3405 = vst [vmem:[%s10548_s25 + $0xb0] sm:$0xff] %v10719_v43  ;;  %v3486_v55 = vmul.f32 %v9036_v48, %v3422_v41  ;;  %v3501_v58 = vadd.f32 %v10612_v57, %v3485_v45  ;;  %3856 = vmatprep.subr.bf16.mxu1 %v8764_v6  ;;  %v8821_v57 = vld [vmem:[%s12098_s8 + $0x1c4] ss:$28 sps:$4 sm:$0xff]   ;;  %v3425_v37 = vld [vmem:[%s10571_s12 + $0x50] sm:$0xff] }
 0x32f   : > { %v3467_v59 = vmul.f32 1.442695, %v3441_v49  ;;  %3406 = vst [vmem:[%s10548_s25 + $0xb8] sm:$0xff] %v7885_v51  ;;  %v3442_v60 = vmul.f32 0.5, %v7885_v51  ;;  %5232 = vmatprep.subr.bf16.mxu0 %v8821_v57  ;;  %v8831_v48 = vld [vmem:[%s12098_s8 + $0x230] ss:$28 sps:$4 sm:$0xff]  }
 0x330   : > { %v3502_v62 = vadd.f32 %v10627_v34, %v3486_v55  ;;  %5233 = vmatpush1.bf16.msra.mxu0 %v8819_v28  ;;  %v8839_v55 = vld [vmem:[%s12098_s8 + $0x26c] ss:$28 sps:$4 sm:$0xff]   ;;  %v8849_v28 = vld [vmem:[%s12098_s8 + $0x2d8] ss:$28 sps:$4 sm:$0xff]  }
 0x331   : > { %9041 = vpow2.f32 %v3467_v59  ;;  %v3469_v50 = vmul.f32 1.442695, %v3442_v60  ;;  %v3364_v2 = vpop.f32.mrb[56].mxu0  ;;  %3857 = vmatpush1.bf16.msra.mxu1 %v8762_v52  ;;  %5234 = vmatprep.subr.bf16.mxu0 %v8827_v32  ;;  %v8837_v57 = vld [vmem:[%s12098_s8 + $0x268] ss:$28 sps:$4 sm:$0xff]  }
 0x332   : > { %v10750_v5 = vadd.f32 %v3364_v2, %v10541_v11  ;;  %v3366_v34 = vpop.f32.mrb[57].mxu0  ;;  %v10752_v10 = vpack.c.bf16 %v3502_v62, %v3501_v58  ;;  %3858 = vmatprep.subr.bf16.mxu1 %v8767_v46 }
 0x333   : > { %v9038_v14 = vpop.eup %9037  ;;  %9043 = vpow2.f32 %v3469_v50  ;;  %v7887_v18 = vadd.f32 %v3366_v34, %v10544_v53  ;;  %v3368_v26 = vpop.f32.mrb[58].mxu0  ;;  %v3428_v34 = vld [vmem:[%s10571_s12 + $0x68] sm:$0xff] }
 0x334   : > { %3407 = vst [vmem:[%s10548_s25 + $0xc0] sm:$0xff] %v10750_v5  ;;  %v10765_v29 = vadd.f32 %v3368_v26, %v10541_v11  ;;  %v3370_v30 = vpop.f32.mrb[59].mxu0  ;;  %3796 = vmatmul.mubr.bf16.gmra.mrb[44].mxu1 %v10752_v10  ;;  %v3487_v31 = vmul.f32 %v9038_v14, %v3423_v3  ;;  %5235 = vmatpush1.bf16.msra.mxu0 %v8825_v56  ;;  %v3427_v3 = vld [vmem:[%s10571_s12 + $0x60] sm:$0xff]  ;;  %v8851_v14 = vld [vmem:[%s12098_s8 + $0x2dc] ss:$28 sps:$4 sm:$0xff]  }
 0x335   : > { %v9040_v21 = vpop.eup %9039  ;;  %3408 = vst [vmem:[%s10548_s25 + $0xc8] sm:$0xff] %v7887_v18  ;;  %v3443_v33 = vmul.f32 0.5, %v7887_v18  ;;  %v7889_v22 = vadd.f32 %v3370_v30, %v10544_v53  ;;  %3805 = vmatprep.mubr.bf16.mxu1 %v9342_v23  ;;  %3859 = vmatpush1.bf16.msra.mxu1 %v8765_v4  ;;  %v8788_v56 = vld [vmem:[%s12098_s8 + $0x7c] ss:$28 sps:$4 sm:$0xff]  }
 0x336   : > { %3409 = vst [vmem:[%s10548_s25 + $0xd0] sm:$0xff] %v10765_v29  ;;  %v3488_v25 = vmul.f32 %v9040_v21, %v3424_v27  ;;  %v3503_v63 = vadd.f32 %v10658_v0, %v3487_v31  ;;  %3860 = vmatprep.subr.bf16.mxu1 %v8770_v12  ;;  %v8833_v0 = vld [vmem:[%s12098_s8 + $0x234] ss:$28 sps:$4 sm:$0xff]   ;;  %v8843_v12 = vld [vmem:[%s12098_s8 + $0x2a0] ss:$28 sps:$4 sm:$0xff]  }
 0x337   : > { %v3471_v36 = vmul.f32 1.442695, %v3443_v33  ;;  %3410 = vst [vmem:[%s10548_s25 + $0xd8] sm:$0xff] %v7889_v22  ;;  %v3444_v9 = vmul.f32 0.5, %v7889_v22  ;;  %5236 = vmatprep.subr.bf16.mxu0 %v8833_v0  ;;  %v3429_v31 = vld [vmem:[%s10571_s12 + $0x70] sm:$0xff]  ;;  %v3430_v33 = vld [vmem:[%s10571_s12 + $0x78] sm:$0xff]  ;;  %s11861_s12 = scalar_lea.hbm %s12101_s11, %s7733_s29 }
 0x338   : > { %v3504_v7 = vadd.f32 %v10673_v13, %v3488_v25  ;;  %5237 = vmatpush1.bf16.msra.mxu0 %v8831_v48  ;;  %v8792_v0 = vld [vmem:[%s12098_s8 + $0xb0] ss:$28 sps:$4 sm:$0xff]   ;;  %v8861_v48 = vld [vmem:[%s12098_s8 + $0x348] ss:$28 sps:$4 sm:$0xff]  }
 0x339   : > { %9045 = vpow2.f32 %v3471_v36  ;;  %v3473_v6 = vmul.f32 1.442695, %v3444_v9  ;;  %v3374_v8 = vpop.f32.mrb[60].mxu0  ;;  %3861 = vmatpush1.bf16.msra.mxu1 %v8768_v24  ;;  %5238 = vmatprep.subr.bf16.mxu0 %v8839_v55  ;;  %v8782_v36 = vld [vmem:[%s12098_s8 + $0x44] ss:$28 sps:$4 sm:$0xff]  }
 0x33a   : > { %v10793_v40 = vadd.f32 %v3374_v8, %v10541_v11  ;;  %v3376_v41 = vpop.f32.mrb[61].mxu0  ;;  %v10795_v42 = vpack.c.bf16 %v3504_v7, %v3503_v63  ;;  %5442 = vmatprep.subr.bf16.mxu1 %v8776_v54  ;;  %v8780_v9 = vld [vmem:[%s12098_s8 + $0x40] ss:$28 sps:$4 sm:$0xff]   ;;  %v8786_v7 = vld [vmem:[%s12098_s8 + $0x78] ss:$28 sps:$4 sm:$0xff]  }
 0x33b   : > { %v9042_v13 = vpop.eup %9041  ;;  %9047 = vpow2.f32 %v3473_v6  ;;  %v7891_v44 = vadd.f32 %v3376_v41, %v10544_v53  ;;  %v3378_v45 = vpop.f32.mrb[62].mxu0  ;;  %v8800_v6 = vld [vmem:[%s12098_s8 + $0xec] ss:$28 sps:$4 sm:$0xff]   ;;  %v8857_v41 = vld [vmem:[%s12098_s8 + $0x314] ss:$28 sps:$4 sm:$0xff]  }
 0x33c   : > { %3411 = vst [vmem:[%s10548_s25 + $0xe0] sm:$0xff] %v10793_v40  ;;  %v7892_v49 = vadd.f32 %v3378_v45, %v10541_v11  ;;  %v3380_v51 = vpop.f32.mrb[63].mxu0  ;;  %3806 = vmatmul.mubr.bf16.gmra.mrb[48].mxu1 %v10795_v42  ;;  %v3489_v52 = vmul.f32 %v9042_v13, %v3425_v37  ;;  %5239 = vmatpush1.bf16.msra.mxu0 %v8837_v57  ;;  %v8798_v8 = vld [vmem:[%s12098_s8 + $0xe8] ss:$28 sps:$4 sm:$0xff]   ;;  %v8804_v37 = vld [vmem:[%s12098_s8 + $0x120] ss:$28 sps:$4 sm:$0xff]  }
 0x33d   : > { %v9044_v58 = vpop.eup %9043  ;;  %3412 = vst [vmem:[%s10548_s25 + $0xe8] sm:$0xff] %v7891_v44  ;;  %v3445_v46 = vmul.f32 0.5, %v7891_v44  ;;  %v7893_v59 = vadd.f32 %v3380_v51, %v10544_v53  ;;  %3815 = vmatprep.mubr.bf16.mxu1 %v9342_v23  ;;  %v8845_v53 = vld [vmem:[%s12098_s8 + $0x2a4] ss:$28 sps:$4 sm:$0xff]   ;;  %v8855_v13 = vld [vmem:[%s12098_s8 + $0x310] ss:$28 sps:$4 sm:$0xff]  }
 0x33e   : > { %3413 = vst [vmem:[%s10548_s25 + $0xf0] sm:$0xff] %v7892_v49  ;;  %v3490_v60 = vmul.f32 %v9044_v58, %v3426_v47  ;;  %v3505_v11 = vadd.f32 %v10704_v35, %v3489_v52  ;;  %5240 = vmatprep.subr.bf16.mxu0 %v8845_v53  ;;  %v8818_v44 = vld [vmem:[%s12098_s8 + $0x194] ss:$28 sps:$4 sm:$0xff]   ;;  %v8863_v45 = vld [vmem:[%s12098_s8 + $0x34c] ss:$28 sps:$4 sm:$0xff]  }
 0x33f   : > { %v3475_v61 = vmul.f32 1.442695, %v3445_v46  ;;  %3414 = vst [vmem:[%s10548_s25 + $0xf8] sm:$0xff] %v7893_v59  ;;  %v3446_v62 = vmul.f32 0.5, %v7893_v59  ;;  %v8816_v47 = vld [vmem:[%s12098_s8 + $0x190] ss:$28 sps:$4 sm:$0xff]  }
 0x340   : > { %v3506_v50 = vadd.f32 %v10719_v43, %v3490_v60  ;;  %5241 = vmatpush1.bf16.msra.mxu0 %v8843_v12  ;;  %v8830_v51 = vld [vmem:[%s12098_s8 + $0x204] ss:$28 sps:$4 sm:$0xff]   ;;  %v8836_v55 = vld [vmem:[%s12098_s8 + $0x23c] ss:$28 sps:$4 sm:$0xff]   ;;  %v8842_v46 = vld [vmem:[%s12098_s8 + $0x274] ss:$28 sps:$4 sm:$0xff]  }
 0x341   : > { %9049 = vpow2.f32 %v3475_v61  ;;  %v3477_v2 = vmul.f32 1.442695, %v3446_v62  ;;  %5242 = vmatprep.subr.bf16.mxu0 %v8851_v14  ;;  %v8828_v52 = vld [vmem:[%s12098_s8 + $0x200] ss:$28 sps:$4 sm:$0xff]   ;;  %v8840_v59 = vld [vmem:[%s12098_s8 + $0x270] ss:$28 sps:$4 sm:$0xff]  }
 0x342   : > { %v10823_v4 = vpack.c.bf16 %v3506_v50, %v3505_v11  ;;  %v8869_v58 = vld [vmem:[%s12098_s8 + $0x384] ss:$28 sps:$4 sm:$0xff]   ;;  %v8848_v60 = vld [vmem:[%s12098_s8 + $0x2ac] ss:$28 sps:$4 sm:$0xff]   ;;  %v8860_v57 = vld [vmem:[%s12098_s8 + $0x31c] ss:$28 sps:$4 sm:$0xff]  }
 0x343   : > { %v9046_v35 = vpop.eup %9045  ;;  %9051 = vpow2.f32 %v3477_v2  ;;  %v8846_v11 = vld [vmem:[%s12098_s8 + $0x2a8] ss:$28 sps:$4 sm:$0xff]   ;;  %v8852_v62 = vld [vmem:[%s12098_s8 + $0x2e0] ss:$28 sps:$4 sm:$0xff]   ;;  %v8858_v50 = vld [vmem:[%s12098_s8 + $0x318] ss:$28 sps:$4 sm:$0xff]  }
 0x344   : > { %3816 = vmatmul.mubr.bf16.gmra.mrb[52].mxu1 %v10823_v4  ;;  %v3491_v43 = vmul.f32 %v9046_v35, %v3427_v3  ;;  %5243 = vmatpush1.bf16.msra.mxu0 %v8849_v28  ;;  %v8854_v61 = vld [vmem:[%s12098_s8 + $0x2e4] ss:$28 sps:$4 sm:$0xff]   ;;  %v8866_v53 = vld [vmem:[%s12098_s8 + $0x354] ss:$28 sps:$4 sm:$0xff]   ;;  %v8872_v3 = vld [vmem:[%s12098_s8 + $0x38c] ss:$28 sps:$4 sm:$0xff]  }
 0x345   : > { %v9048_v18 = vpop.eup %9047  ;;  %3825 = vmatprep.mubr.bf16.mxu1 %v9342_v23  ;;  %5244 = vmatprep.subr.bf16.mxu0 %v8857_v41  ;;  %v8864_v2 = vld [vmem:[%s12098_s8 + $0x350] ss:$28 sps:$4 sm:$0xff]   ;;  %s9278_s25 = scalar_lea.vmem %s11867_s13, 4096 }
 0x346   : > { %v3492_v26 = vmul.f32 %v9048_v18, %v3428_v34  ;;  %v3507_v27 = vadd.f32 %v10750_v5, %v3491_v43  ;;  %v8881_v41 = vld [vmem:[%s12098_s8 + $0x3f4] ss:$28 sps:$4 sm:$0xff]   ;;  %p9279_p11 = scmp.ne.s32.totalorder %s11867_s13, %s9278_s25  ;;  %p9286_p1 = scmp.lt.s32.totalorder %s9284_s16, %s9278_s25 }
 0x348   : > { %v3508_v30 = vadd.f32 %v10765_v29, %v3492_v26  ;;  %v8774_v29 = vld [vmem:[%s12098_s8 + $0x8] ss:$28 sps:$4 sm:$0xff]   ;;  %5245 = vmatpush1.bf16.msra.mxu0 %v8855_v13  ;;  %p9280_p12 = pnand %p9279_p11, %p9444_p5  ;;  %p9287_p2 = por %p9286_p1, %p9285_p0 }
 0x349   : > { %5246 = vmatprep.subr.bf16.mxu0 %v8863_v45 }
 0x34a   : > { %v10840_v32 = vpack.c.bf16 %v3508_v30, %v3507_v27  ;;  %p9281_p13 = pneg %p9280_p12 }
 0x34b   : > { %v9050_v21 = vpop.eup %9049 }
 0x34c   : > { %3826 = vmatmul.mubr.bf16.gmra.mrb[56].mxu1 %v10840_v32  ;;  %v3493_v22 = vmul.f32 %v9050_v21, %v3429_v31  ;;  %5247 = vmatpush1.bf16.msra.mxu0 %v8861_v48  ;;  %p9288_p3 = pnand %p9287_p2, %p9281_p13 }
 0x34d   : > { %v9052_v24 = vpop.eup %9051  ;;  %3835 = vmatprep.mubr.bf16.mxu1 %v9342_v23  ;;  %5329 = vmatprep.subr.bf16.mxu0 %v8869_v58  ;;  %v8890_v58 = vld [vmem:[%s12098_s8 + $0x434] ss:$28 sps:$4 sm:$0xff]  }
 0x34e   : > { %v3494_v5 = vmul.f32 %v9052_v24, %v3430_v33  ;;  %v3509_v25 = vadd.f32 %v10793_v40, %v3493_v22  ;;  %v8812_v40 = vld [vmem:[%s12098_s8 + $0x15c] ss:$28 sps:$4 sm:$0xff]  }
 0x350   : > { %v3510_v63 = vadd.f32 %v7892_v49, %v3494_v5  ;;  %v8822_v49 = vld [vmem:[%s12098_s8 + $0x1c8] ss:$28 sps:$4 sm:$0xff]  }
 0x352   : > { %v10846_v54 = vpack.c.bf16 %v3510_v63, %v3509_v25  ;;  %v8867_v25 = vld [vmem:[%s12098_s8 + $0x380] ss:$28 sps:$4 sm:$0xff]   ;;  %v8870_v63 = vld [vmem:[%s12098_s8 + $0x388] ss:$28 sps:$4 sm:$0xff]  }
 0x354   : > { %3836 = vmatmul.mubr.bf16.gmra.mrb[60].mxu1 %v10846_v54 }
 0x355   : > { %3878 = vmatprep.mubr.bf16.mxu1 %v9342_v23 }
 0x35c   : > { %3879 = vmatmul.mubr.bf16.vlgmr.msra.gmra.mrb[64].mxu1 %v10614_v39  ;;  %v8794_v39 = vld [vmem:[%s12098_s8 + $0xb4] ss:$28 sps:$4 sm:$0xff]  }
 0x35d   : > { %3888 = vmatprep.mubr.bf16.mxu1 %v9342_v23  ;;  %5443 = vmatpush1.bf16.msra.mxu1 %v8774_v29 }
 0x35e   : > { %5444 = vmatprep.subr.bf16.mxu1 %v8782_v36  ;;  %v8875_v36 = vld [vmem:[%s12098_s8 + $0x3bc] ss:$28 sps:$4 sm:$0xff]  }
 0x361   : > { %5445 = vmatpush1.bf16.msra.mxu1 %v8780_v9  ;;  %v8878_v9 = vld [vmem:[%s12098_s8 + $0x3c4] ss:$28 sps:$4 sm:$0xff]  }
 0x362   : > { %5446 = vmatprep.subr.bf16.mxu1 %v8788_v56 }
 0x364   : > { %3889 = vmatmul.mubr.bf16.gmra.mrb[68].mxu1 %v10660_v1  ;;  %v8806_v1 = vld [vmem:[%s12098_s8 + $0x124] ss:$28 sps:$4 sm:$0xff]  }
 0x365   : > { %3898 = vmatprep.mubr.bf16.mxu1 %v9342_v23  ;;  %5447 = vmatpush1.bf16.msra.mxu1 %v8786_v7 }
 0x366   : > { %5448 = vmatprep.subr.bf16.mxu1 %v8794_v39 }
 0x369   : > { %5449 = vmatpush1.bf16.msra.mxu1 %v8792_v0 }
 0x36a   : > { %5450 = vmatprep.subr.bf16.mxu1 %v8800_v6 }
 0x36c   : > { %3899 = vmatmul.mubr.bf16.gmra.mrb[72].mxu1 %v10706_v38  ;;  %v8810_v38 = vld [vmem:[%s12098_s8 + $0x158] ss:$28 sps:$4 sm:$0xff]  }
 0x36d   : > { %3908 = vmatprep.mubr.bf16.mxu1 %v9342_v23  ;;  %5451 = vmatpush1.bf16.msra.mxu1 %v8798_v8  ;;  %v8873_v8 = vld [vmem:[%s12098_s8 + $0x3b8] ss:$28 sps:$4 sm:$0xff]  }
 0x36e   : > { %5452 = vmatprep.subr.bf16.mxu1 %v8806_v1  ;;  %v8876_v1 = vld [vmem:[%s12098_s8 + $0x3c0] ss:$28 sps:$4 sm:$0xff]  }
 0x371   : > { %5453 = vmatpush1.bf16.msra.mxu1 %v8804_v37 }
 0x372   : > { %5454 = vmatprep.subr.bf16.mxu1 %v8812_v40 }
 0x374   : > { %3909 = vmatmul.mubr.bf16.gmra.mrb[76].mxu1 %v10752_v10  ;;  %v8824_v10 = vld [vmem:[%s12098_s8 + $0x1cc] ss:$28 sps:$4 sm:$0xff]  }
 0x375   : > { %3918 = vmatprep.mubr.bf16.mxu1 %v9342_v23  ;;  %5455 = vmatpush1.bf16.msra.mxu1 %v8810_v38  ;;  %v8884_v38 = vld [vmem:[%s12098_s8 + $0x3fc] ss:$28 sps:$4 sm:$0xff]  }
 0x376   : > { %5456 = vmatprep.subr.bf16.mxu1 %v8818_v44 }
 0x379   : > { %5457 = vmatpush1.bf16.msra.mxu1 %v8816_v47 }
 0x37a   : > { %5458 = vmatprep.subr.bf16.mxu1 %v8824_v10  ;;  %v8879_v10 = vld [vmem:[%s12098_s8 + $0x3f0] ss:$28 sps:$4 sm:$0xff]  }
 0x37c   : > { %3919 = vmatmul.mubr.bf16.gmra.mrb[80].mxu1 %v10795_v42  ;;  %v8834_v42 = vld [vmem:[%s12098_s8 + $0x238] ss:$28 sps:$4 sm:$0xff]  }
 0x37d   : > { %3928 = vmatprep.mubr.bf16.mxu1 %v9342_v23  ;;  %5459 = vmatpush1.bf16.msra.mxu1 %v8822_v49  ;;  %v8882_v49 = vld [vmem:[%s12098_s8 + $0x3f8] ss:$28 sps:$4 sm:$0xff]  }
 0x37e   : > { %5460 = vmatprep.subr.bf16.mxu1 %v8830_v51 }
 0x381   : > { %5461 = vmatpush1.bf16.msra.mxu1 %v8828_v52 }
 0x382   : > { %5462 = vmatprep.subr.bf16.mxu1 %v8836_v55  ;;  %v8887_v55 = vld [vmem:[%s12098_s8 + $0x42c] ss:$28 sps:$4 sm:$0xff]  }
 0x384   : > { %3929 = vmatmul.mubr.bf16.gmra.mrb[84].mxu1 %v10823_v4  ;;  %v10979_v4 = vld [vmem:[%s12097_s7] sm:$0xf] }
 0x385   : > { %3938 = vmatprep.mubr.bf16.mxu1 %v9342_v23  ;;  %5463 = vmatpush1.bf16.msra.mxu1 %v8834_v42  ;;  %v10983_v35 = vrot.slane %v10979_v4, %v10298_v16  ;;  %v10987_v34 = vrot.slane %v10979_v4, %v10307_v19 }
 0x386   : > { %5464 = vmatprep.subr.bf16.mxu1 %v8842_v46 }
 0x389   : > { %5465 = vmatpush1.bf16.msra.mxu1 %v8840_v59 }
 0x38a   : > { %5466 = vmatprep.subr.bf16.mxu1 %v8848_v60 }
 0x38c   : > { %3939 = vmatmul.mubr.bf16.gmra.mrb[88].mxu1 %v10840_v32 }
 0x38d   : > { %3948 = vmatprep.mubr.bf16.mxu1 %v9342_v23  ;;  %5467 = vmatpush1.bf16.msra.mxu1 %v8846_v11 }
 0x38e   : > { %5468 = vmatprep.subr.bf16.mxu1 %v8854_v61  ;;  %v8885_v61 = vld [vmem:[%s12098_s8 + $0x428] ss:$28 sps:$4 sm:$0xff]  }
 0x391   : > { %5469 = vmatpush1.bf16.msra.mxu1 %v8852_v62  ;;  %v8888_v62 = vld [vmem:[%s12098_s8 + $0x430] ss:$28 sps:$4 sm:$0xff]  }
 0x392   : > { %5470 = vmatprep.subr.bf16.mxu1 %v8860_v57 }
 0x394   : > { %3949 = vmatmul.mubr.bf16.gmra.mrb[92].mxu1 %v10846_v54 }
 0x395   : > { %5471 = vmatpush1.bf16.msra.mxu1 %v8858_v50 }
 0x396   : > { %5472 = vmatprep.subr.bf16.mxu1 %v8866_v53  ;;  %v8893_v53 = vld [vmem:[%s12098_s8 + $0x464] ss:$28 sps:$4 sm:$0xff]  }
 0x399   : > { %5473 = vmatpush1.bf16.msra.mxu1 %v8864_v2  ;;  %v8896_v2 = vld [vmem:[%s12098_s8 + $0x46c] ss:$28 sps:$4 sm:$0xff]  }
 0x39a   : > { %5555 = vmatprep.subr.bf16.mxu1 %v8872_v3 }
 0x3ef   : > { %v3767_v12 = vpop.f32.mrb[32].mxu1 }
 0x3f0   : > { %v3768_v43 = vadd.f32 %v3767_v12, %v10983_v35  ;;  %v3769_v14 = vpop.f32.mrb[33].mxu1 }
 0x3f1   : > { %v3770_v18 = vadd.f32 %v3769_v14, %v10987_v34  ;;  %v3771_v26 = vpop.f32.mrb[34].mxu1 }
 0x3f2   : > { %v3772_v27 = vadd.f32 %v3771_v26, %v10983_v35  ;;  %v3773_v28 = vpop.f32.mrb[35].mxu1  ;;  %v3959_v31 = vmax.f32 %v3768_v43, 0.0  ;;  %v8891_v26 = vld [vmem:[%s12098_s8 + $0x460] ss:$28 sps:$4 sm:$0xff]  }
 0x3f3   : > { %v3774_v30 = vadd.f32 %v3773_v28, %v10987_v34  ;;  %v3960_v21 = vmax.f32 %v3770_v18, 0.0 }
 0x3f4   : > { %v3963_v32 = vmax.f32 %v3772_v27, 0.0  ;;  %v8894_v27 = vld [vmem:[%s12098_s8 + $0x468] ss:$28 sps:$4 sm:$0xff]  }
 0x3f5   : > { %v3964_v33 = vmax.f32 %v3774_v30, 0.0 }
 0x3f6   : > { %v10993_v22 = vpack.c.bf16 %v3963_v32, %v3959_v31  ;;  %v8899_v31 = vld [vmem:[%s12098_s8 + $0x49c] ss:$28 sps:$4 sm:$0xff]   ;;  %v8902_v32 = vld [vmem:[%s12098_s8 + $0x4a4] ss:$28 sps:$4 sm:$0xff]  }
 0x3f7   : > { %v10995_v24 = vpack.c.bf16 %v3964_v33, %v3960_v21  ;;  %v3777_v5 = vpop.f32.mrb[36].mxu1 }
 0x3f8   : > { %v3778_v54 = vadd.f32 %v3777_v5, %v10983_v35  ;;  %v3779_v29 = vpop.f32.mrb[37].mxu1 }
 0x3f9   : > { %v3780_v56 = vadd.f32 %v3779_v29, %v10987_v34  ;;  %v3781_v7 = vpop.f32.mrb[38].mxu1  ;;  %5248 = vmatprep.mubr.bf16.mxu0 %v10995_v24  ;;  %5474 = vmatprep.mubr.bf16.mxu1 %v10995_v24  ;;  %v8900_v29 = vld [vmem:[%s12098_s8 + $0x4a0] ss:$28 sps:$4 sm:$0xff]  }
 0x3fa   : > { %v3782_v39 = vadd.f32 %v3781_v7, %v10983_v35  ;;  %v3783_v0 = vpop.f32.mrb[39].mxu1  ;;  %5249 = vmatmul.mubr.bf16.vlgmr.msra.gmra.mrb[64].mxu0 %v10993_v22  ;;  %5475 = vmatmul.mubr.bf16.vlgmr.msra.gmra.mrb[96].mxu1 %v10993_v22  ;;  %v3967_v37 = vmax.f32 %v3778_v54, 0.0  ;;  %v8897_v54 = vld [vmem:[%s12098_s8 + $0x498] ss:$28 sps:$4 sm:$0xff]  }
 0x3fb   : > { %v3784_v6 = vadd.f32 %v3783_v0, %v10987_v34  ;;  %5330 = vmatpush1.bf16.msra.mxu0 %v8867_v25  ;;  %5556 = vmatpush1.bf16.msra.mxu1 %v8870_v63  ;;  %v3968_v13 = vmax.f32 %v3780_v56, 0.0  ;;  %v8905_v56 = vld [vmem:[%s12098_s8 + $0x4d4] ss:$28 sps:$4 sm:$0xff]   ;;  %v8908_v7 = vld [vmem:[%s12098_s8 + $0x4dc] ss:$28 sps:$4 sm:$0xff]  }
 0x3fc   : > { %v3971_v40 = vmax.f32 %v3782_v39, 0.0  ;;  %5331 = vmatprep.subr.bf16.mxu0 %v8875_v36  ;;  %5557 = vmatprep.subr.bf16.mxu1 %v8878_v9 }
 0x3fd   : > { %v3972_v44 = vmax.f32 %v3784_v6, 0.0 }
 0x3fe   : > { %v11029_v45 = vpack.c.bf16 %v3971_v40, %v3967_v37  ;;  %v8903_v37 = vld [vmem:[%s12098_s8 + $0x4d0] ss:$28 sps:$4 sm:$0xff]   ;;  %v8906_v40 = vld [vmem:[%s12098_s8 + $0x4d8] ss:$28 sps:$4 sm:$0xff]  }
 0x3ff   : > { %v11031_v47 = vpack.c.bf16 %v3972_v44, %v3968_v13  ;;  %v3787_v48 = vpop.f32.mrb[40].mxu1  ;;  %5332 = vmatpush1.bf16.msra.mxu0 %v8873_v8  ;;  %5558 = vmatpush1.bf16.msra.mxu1 %v8876_v1  ;;  %v8911_v13 = vld [vmem:[%s12098_s8 + $0x50c] ss:$28 sps:$4 sm:$0xff]   ;;  %v8914_v44 = vld [vmem:[%s12098_s8 + $0x514] ss:$28 sps:$4 sm:$0xff]  }
 0x400   : > { %v3788_v51 = vadd.f32 %v3787_v48, %v10983_v35  ;;  %v3789_v52 = vpop.f32.mrb[41].mxu1  ;;  %5333 = vmatprep.subr.bf16.mxu0 %v8881_v41  ;;  %5559 = vmatprep.subr.bf16.mxu1 %v8884_v38 }
 0x401   : > { %v3790_v42 = vadd.f32 %v3789_v52, %v10987_v34  ;;  %v3791_v46 = vpop.f32.mrb[42].mxu1  ;;  %5258 = vmatprep.mubr.bf16.mxu0 %v11031_v47  ;;  %5484 = vmatprep.mubr.bf16.mxu1 %v11031_v47 }
 0x402   : > { %v3792_v59 = vadd.f32 %v3791_v46, %v10983_v35  ;;  %v3793_v60 = vpop.f32.mrb[43].mxu1  ;;  %5259 = vmatmul.mubr.bf16.gmra.mrb[68].mxu0 %v11029_v45  ;;  %5485 = vmatmul.mubr.bf16.gmra.mrb[100].mxu1 %v11029_v45  ;;  %v3975_v57 = vmax.f32 %v3788_v51, 0.0 }
 0x403   : > { %v3794_v11 = vadd.f32 %v3793_v60, %v10987_v34  ;;  %5334 = vmatpush1.bf16.msra.mxu0 %v8879_v10  ;;  %5560 = vmatpush1.bf16.msra.mxu1 %v8882_v49  ;;  %v3976_v3 = vmax.f32 %v3790_v42, 0.0  ;;  %v8920_v60 = vld [vmem:[%s12098_s8 + $0x54c] ss:$28 sps:$4 sm:$0xff]  }
 0x404   : > { %v3979_v50 = vmax.f32 %v3792_v59, 0.0  ;;  %5335 = vmatprep.subr.bf16.mxu0 %v8887_v55  ;;  %5561 = vmatprep.subr.bf16.mxu1 %v8890_v58  ;;  %v8909_v55 = vld [vmem:[%s12098_s8 + $0x508] ss:$28 sps:$4 sm:$0xff]   ;;  %v8912_v58 = vld [vmem:[%s12098_s8 + $0x510] ss:$28 sps:$4 sm:$0xff]  }
 0x405   : > { %v3980_v12 = vmax.f32 %v3794_v11, 0.0  ;;  %v8917_v59 = vld [vmem:[%s12098_s8 + $0x544] ss:$28 sps:$4 sm:$0xff]  }
 0x406   : > { %v11065_v43 = vpack.c.bf16 %v3979_v50, %v3975_v57 }
 0x407   : > { %v11067_v14 = vpack.c.bf16 %v3980_v12, %v3976_v3  ;;  %v3797_v18 = vpop.f32.mrb[44].mxu1  ;;  %5336 = vmatpush1.bf16.msra.mxu0 %v8885_v61  ;;  %5562 = vmatpush1.bf16.msra.mxu1 %v8888_v62 }
 0x408   : > { %v3798_v28 = vadd.f32 %v3797_v18, %v10983_v35  ;;  %v3799_v30 = vpop.f32.mrb[45].mxu1  ;;  %5337 = vmatprep.subr.bf16.mxu0 %v8893_v53  ;;  %5563 = vmatprep.subr.bf16.mxu1 %v8896_v2  ;;  %v8915_v53 = vld [vmem:[%s12098_s8 + $0x540] ss:$28 sps:$4 sm:$0xff]   ;;  %v8918_v2 = vld [vmem:[%s12098_s8 + $0x548] ss:$28 sps:$4 sm:$0xff]  }
 0x409   : > { %v3800_v21 = vadd.f32 %v3799_v30, %v10987_v34  ;;  %v3801_v33 = vpop.f32.mrb[46].mxu1  ;;  %5268 = vmatprep.mubr.bf16.mxu0 %v11067_v14  ;;  %5494 = vmatprep.mubr.bf16.mxu1 %v11067_v14  ;;  %v8923_v18 = vld [vmem:[%s12098_s8 + $0x14] ss:$28 sps:$4 sm:$0xff]  }
 0x40a   : > { %v3802_v5 = vadd.f32 %v3801_v33, %v10983_v35  ;;  %v3803_v25 = vpop.f32.mrb[47].mxu1  ;;  %5269 = vmatmul.mubr.bf16.gmra.mrb[72].mxu0 %v11065_v43  ;;  %5495 = vmatmul.mubr.bf16.gmra.mrb[104].mxu1 %v11065_v43  ;;  %v3983_v36 = vmax.f32 %v3798_v28, 0.0 }
 0x40b   : > { %v3804_v63 = vadd.f32 %v3803_v25, %v10987_v34  ;;  %5338 = vmatpush1.bf16.msra.mxu0 %v8891_v26  ;;  %5564 = vmatpush1.bf16.msra.mxu1 %v8894_v27  ;;  %v3984_v39 = vmax.f32 %v3800_v21, 0.0  ;;  %v8924_v26 = vld [vmem:[%s12098_s8 + $0x1d8] ss:$28 sps:$4 sm:$0xff]  }
 0x40c   : > { %v3987_v9 = vmax.f32 %v3802_v5, 0.0  ;;  %5339 = vmatprep.subr.bf16.mxu0 %v8899_v31  ;;  %5565 = vmatprep.subr.bf16.mxu1 %v8902_v32 }
 0x40d   : > { %v3988_v0 = vmax.f32 %v3804_v63, 0.0 }
 0x40e   : > { %v11101_v6 = vpack.c.bf16 %v3987_v9, %v3983_v36 }
 0x40f   : > { %v11103_v8 = vpack.c.bf16 %v3988_v0, %v3984_v39  ;;  %v3807_v1 = vpop.f32.mrb[48].mxu1  ;;  %5340 = vmatpush1.bf16.msra.mxu0 %v8897_v54  ;;  %5566 = vmatpush1.bf16.msra.mxu1 %v8900_v29 }
 0x410   : > { %v3808_v41 = vadd.f32 %v3807_v1, %v10983_v35  ;;  %v3809_v38 = vpop.f32.mrb[49].mxu1  ;;  %5341 = vmatprep.subr.bf16.mxu0 %v8905_v56  ;;  %5567 = vmatprep.subr.bf16.mxu1 %v8908_v7 }
 0x411   : > { %v3810_v48 = vadd.f32 %v3809_v38, %v10987_v34  ;;  %v3811_v10 = vpop.f32.mrb[50].mxu1  ;;  %5278 = vmatprep.mubr.bf16.mxu0 %v11103_v8  ;;  %5504 = vmatprep.mubr.bf16.mxu1 %v11103_v8 }
 0x412   : > { %v3812_v49 = vadd.f32 %v3811_v10, %v10983_v35  ;;  %v3813_v51 = vpop.f32.mrb[51].mxu1  ;;  %5279 = vmatmul.mubr.bf16.gmra.mrb[76].mxu0 %v11101_v6  ;;  %5505 = vmatmul.mubr.bf16.gmra.mrb[108].mxu1 %v11101_v6  ;;  %v3991_v42 = vmax.f32 %v3808_v41, 0.0 }
 0x413   : > { %v3814_v52 = vadd.f32 %v3813_v51, %v10987_v34  ;;  %5342 = vmatpush1.bf16.msra.mxu0 %v8903_v37  ;;  %5568 = vmatpush1.bf16.msra.mxu1 %v8906_v40  ;;  %v3992_v11 = vmax.f32 %v3810_v48, 0.0 }
 0x414   : > { %v3995_v46 = vmax.f32 %v3812_v49, 0.0  ;;  %5343 = vmatprep.subr.bf16.mxu0 %v8911_v13  ;;  %5569 = vmatprep.subr.bf16.mxu1 %v8914_v44 }
 0x415   : > { %v3996_v61 = vmax.f32 %v3814_v52, 0.0 }
 0x416   : > { %v11137_v62 = vpack.c.bf16 %v3995_v46, %v3991_v42 }
 0x417   : > { %v11139_v57 = vpack.c.bf16 %v3996_v61, %v3992_v11  ;;  %v3817_v50 = vpop.f32.mrb[52].mxu1  ;;  %5344 = vmatpush1.bf16.msra.mxu0 %v8909_v55  ;;  %5570 = vmatpush1.bf16.msra.mxu1 %v8912_v58 }
 0x418   : > { %v3818_v3 = vadd.f32 %v3817_v50, %v10983_v35  ;;  %v3819_v12 = vpop.f32.mrb[53].mxu1  ;;  %5345 = vmatprep.subr.bf16.mxu0 %v8917_v59  ;;  %5571 = vmatprep.subr.bf16.mxu1 %v8920_v60  ;;  %v11187_v60 = vrot.slane %v10979_v4, %v10301_v17  ;;  %v11191_v50 = vrot.slane %v10979_v4, %v10310_v20 }
 0x419   : > { %v3820_v27 = vadd.f32 %v3819_v12, %v10987_v34  ;;  %v3821_v28 = vpop.f32.mrb[54].mxu1  ;;  %5288 = vmatprep.mubr.bf16.mxu0 %v11139_v57  ;;  %5514 = vmatprep.mubr.bf16.mxu1 %v11139_v57 }
 0x41a   : > { %v3822_v30 = vadd.f32 %v3821_v28, %v10983_v35  ;;  %v3823_v31 = vpop.f32.mrb[55].mxu1  ;;  %5289 = vmatmul.mubr.bf16.gmra.mrb[80].mxu0 %v11137_v62  ;;  %5515 = vmatmul.mubr.bf16.gmra.mrb[112].mxu1 %v11137_v62  ;;  %v3999_v21 = vmax.f32 %v3818_v3, 0.0 }
 0x41b   : > { %v3824_v32 = vadd.f32 %v3823_v31, %v10987_v34  ;;  %5346 = vmatpush1.bf16.msra.mxu0 %v8915_v53  ;;  %5572 = vmatpush1.bf16.msra.mxu1 %v8918_v2  ;;  %v4000_v5 = vmax.f32 %v3820_v27, 0.0 }
 0x41c   : > { %v4003_v33 = vmax.f32 %v3822_v30, 0.0  ;;  %5668 = vmatprep.subr.bf16.mxu0 %v8923_v18  ;;  %7734 = vmatprep.subr.bf16.mxu1 %v8924_v26 }
 0x41d   : > { %v4004_v25 = vmax.f32 %v3824_v32, 0.0 }
 0x41e   : > { %v11161_v63 = vpack.c.bf16 %v4003_v33, %v3999_v21 }
 0x41f   : > { %v11163_v54 = vpack.c.bf16 %v4004_v25, %v4000_v5  ;;  %v3827_v29 = vpop.f32.mrb[56].mxu1  ;;  %v8921_v25 = vld [vmem:[%s12098_s8 + $0x10] ss:$28 sps:$4 sm:$0xff]  }
 0x420   : > { %v3828_v36 = vadd.f32 %v3827_v29, %v10983_v35  ;;  %v3829_v9 = vpop.f32.mrb[57].mxu1  ;;  %v8925_v29 = vld [vmem:[%s12098_s8 + $0x18] ss:$28 sps:$4 sm:$0xff]  }
 0x421   : > { %v3830_v56 = vadd.f32 %v3829_v9, %v10987_v34  ;;  %v3831_v7 = vpop.f32.mrb[58].mxu1  ;;  %5298 = vmatprep.mubr.bf16.mxu0 %v11163_v54  ;;  %5524 = vmatprep.mubr.bf16.mxu1 %v11163_v54 }
 0x422   : > { %v3832_v39 = vadd.f32 %v3831_v7, %v10983_v35  ;;  %v3833_v0 = vpop.f32.mrb[59].mxu1  ;;  %5299 = vmatmul.mubr.bf16.gmra.mrb[84].mxu0 %v11161_v63  ;;  %5525 = vmatmul.mubr.bf16.gmra.mrb[116].mxu1 %v11161_v63  ;;  %v4007_v37 = vmax.f32 %v3828_v36, 0.0  ;;  %v8932_v7 = vld [vmem:[%s12098_s8 + $0x210] ss:$28 sps:$4 sm:$0xff]  }
 0x423   : > { %v3834_v1 = vadd.f32 %v3833_v0, %v10987_v34  ;;  %v4008_v41 = vmax.f32 %v3830_v56, 0.0  ;;  %v8928_v56 = vld [vmem:[%s12098_s8 + $0x4c] ss:$28 sps:$4 sm:$0xff]  }
 0x424   : > { %v4011_v40 = vmax.f32 %v3832_v39, 0.0 }
 0x425   : > { %v4012_v38 = vmax.f32 %v3834_v1, 0.0 }
 0x426   : > { %v11173_v13 = vpack.c.bf16 %v4011_v40, %v4007_v37 }
 0x427   : > { %v11175_v44 = vpack.c.bf16 %v4012_v38, %v4008_v41  ;;  %v3837_v48 = vpop.f32.mrb[60].mxu1  ;;  %v8926_v41 = vld [vmem:[%s12098_s8 + $0x48] ss:$28 sps:$4 sm:$0xff]   ;;  %v8933_v38 = vld [vmem:[%s12098_s8 + $0x50] ss:$28 sps:$4 sm:$0xff]  }
 0x428   : > { %v3838_v10 = vadd.f32 %v3837_v48, %v10983_v35  ;;  %v3839_v49 = vpop.f32.mrb[61].mxu1 }
 0x429   : > { %v3840_v51 = vadd.f32 %v3839_v49, %v10987_v34  ;;  %v3841_v52 = vpop.f32.mrb[62].mxu1  ;;  %5308 = vmatprep.mubr.bf16.mxu0 %v11175_v44  ;;  %5534 = vmatprep.mubr.bf16.mxu1 %v11175_v44  ;;  %v8931_v49 = vld [vmem:[%s12098_s8 + $0x84] ss:$28 sps:$4 sm:$0xff]  }
 0x42a   : > { %v3842_v55 = vadd.f32 %v3841_v52, %v10983_v35  ;;  %v3843_v58 = vpop.f32.mrb[63].mxu1  ;;  %5309 = vmatmul.mubr.bf16.gmra.mrb[88].mxu0 %v11173_v13  ;;  %5535 = vmatmul.mubr.bf16.gmra.mrb[120].mxu1 %v11173_v13  ;;  %v4015_v46 = vmax.f32 %v3838_v10, 0.0 }
 0x42b   : > { %v3844_v42 = vadd.f32 %v3843_v58, %v10987_v34  ;;  %v4016_v11 = vmax.f32 %v3840_v51, 0.0  ;;  %v8940_v51 = vld [vmem:[%s12098_s8 + $0x248] ss:$28 sps:$4 sm:$0xff]  }
 0x42c   : > { %v4019_v59 = vmax.f32 %v3842_v55, 0.0 }
 0x42d   : > { %v4020_v61 = vmax.f32 %v3844_v42, 0.0 }
 0x42e   : > { %v11193_v35 = vpack.c.bf16 %v4019_v59, %v4015_v46  ;;  %v8929_v59 = vld [vmem:[%s12098_s8 + $0x80] ss:$28 sps:$4 sm:$0xff]  }
 0x42f   : > { %v11195_v53 = vpack.c.bf16 %v4020_v61, %v4016_v11  ;;  %v3880_v2 = vpop.f32.mrb[64].mxu1  ;;  %v8941_v11 = vld [vmem:[%s12098_s8 + $0x88] ss:$28 sps:$4 sm:$0xff]  }
 0x430   : > { %v3881_v3 = vadd.f32 %v3880_v2, %v11187_v60  ;;  %v3882_v34 = vpop.f32.mrb[65].mxu1 }
 0x431   : > { %v3883_v12 = vadd.f32 %v3882_v34, %v11191_v50  ;;  %v3884_v18 = vpop.f32.mrb[66].mxu1  ;;  %5318 = vmatprep.mubr.bf16.mxu0 %v11195_v53  ;;  %5544 = vmatprep.mubr.bf16.mxu1 %v11195_v53  ;;  %v8948_v34 = vld [vmem:[%s12098_s8 + $0x280] ss:$28 sps:$4 sm:$0xff]  }
 0x432   : > { %v3885_v26 = vadd.f32 %v3884_v18, %v11187_v60  ;;  %v3886_v27 = vpop.f32.mrb[67].mxu1  ;;  %5319 = vmatmul.mubr.bf16.gmra.mrb[92].mxu0 %v11193_v35  ;;  %5545 = vmatmul.mubr.bf16.gmra.mrb[124].mxu1 %v11193_v35  ;;  %v3961_v28 = vmax.f32 %v3881_v3, 0.0  ;;  %v8936_v3 = vld [vmem:[%s12098_s8 + $0xbc] ss:$28 sps:$4 sm:$0xff]  }
 0x433   : > { %v3887_v4 = vadd.f32 %v3886_v27, %v11191_v50  ;;  %v3962_v31 = vmax.f32 %v3883_v12, 0.0 }
 0x434   : > { %v3965_v30 = vmax.f32 %v3885_v26, 0.0 }
 0x435   : > { %v3966_v32 = vmax.f32 %v3887_v4, 0.0 }
 0x436   : > { %v11205_v21 = vpack.c.bf16 %v3965_v30, %v3961_v28  ;;  %v8934_v28 = vld [vmem:[%s12098_s8 + $0xb8] ss:$28 sps:$4 sm:$0xff]   ;;  %v8949_v30 = vld [vmem:[%s12098_s8 + $0xc0] ss:$28 sps:$4 sm:$0xff]  }
 0x437   : > { %v11207_v33 = vpack.c.bf16 %v3966_v32, %v3962_v31  ;;  %v3890_v5 = vpop.f32.mrb[68].mxu1 }
 0x438   : > { %v3891_v36 = vadd.f32 %v3890_v5, %v11187_v60  ;;  %v3892_v9 = vpop.f32.mrb[69].mxu1  ;;  %v8939_v5 = vld [vmem:[%s12098_s8 + $0xf4] ss:$28 sps:$4 sm:$0xff]  }
 0x439   : > { %v3893_v39 = vadd.f32 %v3892_v9, %v11191_v50  ;;  %v3894_v0 = vpop.f32.mrb[70].mxu1  ;;  %7566 = vmatprep.mubr.msk.bf16.mxu0 %vm1796_vm0, %v11207_v33  ;;  %7574 = vmatprep.mubr.msk.bf16.mxu1 %vm1796_vm0, %v11207_v33 }
 0x43a   : > { %v3895_v1 = vadd.f32 %v3894_v0, %v11187_v60  ;;  %v3896_v37 = vpop.f32.mrb[71].mxu1  ;;  %5362 = vmatmul.mubr.bf16.vlgmr.msra.gmra.mrb[64].mxu0 %v11205_v21  ;;  %5588 = vmatmul.mubr.bf16.vlgmr.msra.gmra.mrb[96].mxu1 %v11205_v21  ;;  %v3969_v48 = vmax.f32 %v3891_v36, 0.0  ;;  %v8957_v0 = vld [vmem:[%s12098_s8 + $0xf8] ss:$28 sps:$4 sm:$0xff]  }
 0x43b   : > { %v3897_v40 = vadd.f32 %v3896_v37, %v11191_v50  ;;  %5669 = vmatpush1.bf16.msra.mxu0 %v8921_v25  ;;  %7735 = vmatpush3.bf16.msra.mxu1 %v8925_v29  ;;  %v3970_v52 = vmax.f32 %v3893_v39, 0.0  ;;  %v8956_v25 = vld [vmem:[%s12098_s8 + $0x2b8] ss:$28 sps:$4 sm:$0xff]   ;;  %v8937_v39 = vld [vmem:[%s12098_s8 + $0xf0] ss:$28 sps:$4 sm:$0xff]  }
 0x43c   : > { %v3973_v10 = vmax.f32 %v3895_v1, 0.0  ;;  %5670 = vmatprep.subr.bf16.mxu0 %v8928_v56  ;;  %7736 = vmatprep.subr.bf16.mxu1 %v8932_v7 }
 0x43d   : > { %v3974_v55 = vmax.f32 %v3897_v40, 0.0  ;;  %v8944_v40 = vld [vmem:[%s12098_s8 + $0x12c] ss:$28 sps:$4 sm:$0xff]  }
 0x43e   : > { %v11243_v58 = vpack.c.bf16 %v3973_v10, %v3969_v48 }
 0x43f   : > { %v11245_v42 = vpack.c.bf16 %v3974_v55, %v3970_v52  ;;  %v3900_v46 = vpop.f32.mrb[72].mxu1  ;;  %5671 = vmatpush1.bf16.msra.mxu0 %v8926_v41  ;;  %7737 = vmatpush3.bf16.msra.mxu1 %v8933_v38  ;;  %v8964_v41 = vld [vmem:[%s12098_s8 + $0x2f0] ss:$28 sps:$4 sm:$0xff]   ;;  %v8942_v52 = vld [vmem:[%s12098_s8 + $0x128] ss:$28 sps:$4 sm:$0xff]  }
 0x440   : > { %v3901_v61 = vadd.f32 %v3900_v46, %v11187_v60  ;;  %v3902_v2 = vpop.f32.mrb[73].mxu1  ;;  %5672 = vmatprep.subr.bf16.mxu0 %v8931_v49  ;;  %7738 = vmatprep.subr.bf16.mxu1 %v8940_v51  ;;  %v8965_v55 = vld [vmem:[%s12098_s8 + $0x130] ss:$28 sps:$4 sm:$0xff]  }
 0x441   : > { %v3903_v12 = vadd.f32 %v3902_v2, %v11191_v50  ;;  %v3904_v18 = vpop.f32.mrb[74].mxu1  ;;  %7567 = vmatprep.mubr.msk.bf16.mxu0 %vm1796_vm0, %v11245_v42  ;;  %7575 = vmatprep.mubr.msk.bf16.mxu1 %vm1796_vm0, %v11245_v42 }
 0x442   : > { %v3905_v26 = vadd.f32 %v3904_v18, %v11187_v60  ;;  %v3906_v27 = vpop.f32.mrb[75].mxu1  ;;  %5372 = vmatmul.mubr.bf16.gmra.mrb[68].mxu0 %v11243_v58  ;;  %5598 = vmatmul.mubr.bf16.gmra.mrb[100].mxu1 %v11243_v58  ;;  %v3977_v31 = vmax.f32 %v3901_v61, 0.0  ;;  %v8972_v61 = vld [vmem:[%s12098_s8 + $0x328] ss:$28 sps:$4 sm:$0xff]  }
 0x443   : > { %v3907_v4 = vadd.f32 %v3906_v27, %v11191_v50  ;;  %5673 = vmatpush1.bf16.msra.mxu0 %v8929_v59  ;;  %7739 = vmatpush3.bf16.msra.mxu1 %v8941_v11  ;;  %v3978_v29 = vmax.f32 %v3903_v12, 0.0  ;;  %v8947_v11 = vld [vmem:[%s12098_s8 + $0x164] ss:$28 sps:$4 sm:$0xff]  }
 0x444   : > { %v3981_v32 = vmax.f32 %v3905_v26, 0.0  ;;  %5674 = vmatprep.subr.bf16.mxu0 %v8936_v3  ;;  %7740 = vmatprep.subr.bf16.mxu1 %v8948_v34  ;;  %v8945_v26 = vld [vmem:[%s12098_s8 + $0x160] ss:$28 sps:$4 sm:$0xff]   ;;  %v8973_v27 = vld [vmem:[%s12098_s8 + $0x168] ss:$28 sps:$4 sm:$0xff]  }
 0x445   : > { %v3982_v36 = vmax.f32 %v3907_v4, 0.0 }
 0x446   : > { %v11281_v9 = vpack.c.bf16 %v3981_v32, %v3977_v31  ;;  %v8980_v31 = vld [vmem:[%s12098_s8 + $0x360] ss:$28 sps:$4 sm:$0xff]  }
 0x447   : > { %v11283_v56 = vpack.c.bf16 %v3982_v36, %v3978_v29  ;;  %v3910_v7 = vpop.f32.mrb[76].mxu1  ;;  %5675 = vmatpush1.bf16.msra.mxu0 %v8934_v28  ;;  %7741 = vmatpush3.bf16.msra.mxu1 %v8949_v30  ;;  %v8952_v30 = vld [vmem:[%s12098_s8 + $0x19c] ss:$28 sps:$4 sm:$0xff]  }
 0x448   : > { %v3911_v1 = vadd.f32 %v3910_v7, %v11187_v60  ;;  %v3912_v37 = vpop.f32.mrb[77].mxu1  ;;  %5676 = vmatprep.subr.bf16.mxu0 %v8939_v5  ;;  %7742 = vmatprep.subr.bf16.mxu1 %v8956_v25  ;;  %v8950_v7 = vld [vmem:[%s12098_s8 + $0x198] ss:$28 sps:$4 sm:$0xff]  }
 0x449   : > { %v3913_v38 = vadd.f32 %v3912_v37, %v11191_v50  ;;  %v3914_v48 = vpop.f32.mrb[78].mxu1  ;;  %7568 = vmatprep.mubr.msk.bf16.mxu0 %vm1796_vm0, %v11283_v56  ;;  %7576 = vmatprep.mubr.msk.bf16.mxu1 %vm1796_vm0, %v11283_v56  ;;  %v8955_v37 = vld [vmem:[%s12098_s8 + $0x1d4] ss:$28 sps:$4 sm:$0xff]  }
 0x44a   : > { %v3915_v10 = vadd.f32 %v3914_v48, %v11187_v60  ;;  %v3916_v49 = vpop.f32.mrb[79].mxu1  ;;  %5382 = vmatmul.mubr.bf16.gmra.mrb[72].mxu0 %v11281_v9  ;;  %5608 = vmatmul.mubr.bf16.gmra.mrb[104].mxu1 %v11281_v9  ;;  %v3985_v46 = vmax.f32 %v3911_v1, 0.0 }
 0x44b   : > { %v3917_v51 = vadd.f32 %v3916_v49, %v11191_v50  ;;  %5677 = vmatpush1.bf16.msra.mxu0 %v8937_v39  ;;  %7743 = vmatpush3.bf16.msra.mxu1 %v8957_v0  ;;  %v3986_v2 = vmax.f32 %v3913_v38, 0.0  ;;  %v8981_v39 = vld [vmem:[%s12098_s8 + $0x1a0] ss:$28 sps:$4 sm:$0xff]   ;;  %v8953_v49 = vld [vmem:[%s12098_s8 + $0x1d0] ss:$28 sps:$4 sm:$0xff]  }
 0x44c   : > { %v3989_v59 = vmax.f32 %v3915_v10, 0.0  ;;  %5678 = vmatprep.subr.bf16.mxu0 %v8944_v40  ;;  %7744 = vmatprep.subr.bf16.mxu1 %v8964_v41 }
 0x44d   : > { %v3990_v3 = vmax.f32 %v3917_v51, 0.0 }
 0x44e   : > { %v11319_v34 = vpack.c.bf16 %v3989_v59, %v3985_v46 }
 0x44f   : > { %v11321_v12 = vpack.c.bf16 %v3990_v3, %v3986_v2  ;;  %v3920_v18 = vpop.f32.mrb[80].mxu1  ;;  %5679 = vmatpush1.bf16.msra.mxu0 %v8942_v52  ;;  %7745 = vmatpush3.bf16.msra.mxu1 %v8965_v55  ;;  %v8960_v55 = vld [vmem:[%s12098_s8 + $0x20c] ss:$28 sps:$4 sm:$0xff]  }
 0x450   : > { %v3921_v4 = vadd.f32 %v3920_v18, %v11187_v60  ;;  %v3922_v28 = vpop.f32.mrb[81].mxu1  ;;  %5680 = vmatprep.subr.bf16.mxu0 %v8947_v11  ;;  %7746 = vmatprep.subr.bf16.mxu1 %v8972_v61  ;;  %v8958_v3 = vld [vmem:[%s12098_s8 + $0x208] ss:$28 sps:$4 sm:$0xff]  }
 0x451   : > { %v3923_v32 = vadd.f32 %v3922_v28, %v11191_v50  ;;  %v3924_v5 = vpop.f32.mrb[82].mxu1  ;;  %7569 = vmatprep.mubr.msk.bf16.mxu0 %vm1796_vm0, %v11321_v12  ;;  %7577 = vmatprep.mubr.msk.bf16.mxu1 %vm1796_vm0, %v11321_v12 }
 0x452   : > { %v3925_v25 = vadd.f32 %v3924_v5, %v11187_v60  ;;  %v3926_v29 = vpop.f32.mrb[83].mxu1  ;;  %5392 = vmatmul.mubr.bf16.gmra.mrb[76].mxu0 %v11319_v34  ;;  %5618 = vmatmul.mubr.bf16.gmra.mrb[108].mxu1 %v11319_v34  ;;  %v3993_v0 = vmax.f32 %v3921_v4, 0.0  ;;  %v8961_v5 = vld [vmem:[%s12098_s8 + $0x240] ss:$28 sps:$4 sm:$0xff]  }
 0x453   : > { %v3927_v36 = vadd.f32 %v3926_v29, %v11191_v50  ;;  %5681 = vmatpush1.bf16.msra.mxu0 %v8945_v26  ;;  %7747 = vmatpush3.bf16.msra.mxu1 %v8973_v27  ;;  %v3994_v40 = vmax.f32 %v3923_v32, 0.0  ;;  %v8963_v27 = vld [vmem:[%s12098_s8 + $0x244] ss:$28 sps:$4 sm:$0xff]  }
 0x454   : > { %v3997_v1 = vmax.f32 %v3925_v25, 0.0  ;;  %5682 = vmatprep.subr.bf16.mxu0 %v8952_v30  ;;  %7748 = vmatprep.subr.bf16.mxu1 %v8980_v31 }
 0x455   : > { %v3998_v41 = vmax.f32 %v3927_v36, 0.0  ;;  %v8968_v36 = vld [vmem:[%s12098_s8 + $0x27c] ss:$28 sps:$4 sm:$0xff]  }
 0x456   : > { %v11354_v38 = vpack.c.bf16 %v3997_v1, %v3993_v0 }
 0x457   : > { %v11356_v48 = vpack.c.bf16 %v3998_v41, %v3994_v40  ;;  %v3930_v10 = vpop.f32.mrb[84].mxu1  ;;  %5683 = vmatpush1.bf16.msra.mxu0 %v8950_v7  ;;  %7749 = vmatpush3.bf16.msra.mxu1 %v8981_v39  ;;  %v8966_v40 = vld [vmem:[%s12098_s8 + $0x278] ss:$28 sps:$4 sm:$0xff]  }
 0x458   : > { %v3931_v51 = vadd.f32 %v3930_v10, %v11187_v60  ;;  %v3932_v52 = vpop.f32.mrb[85].mxu1  ;;  %5684 = vmatprep.subr.bf16.mxu0 %v8955_v37  ;;  %5991 = vmatprep.subr.bf16.mxu1 %v9342_v23 }
 0x459   : > { %v3933_v46 = vadd.f32 %v3932_v52, %v11191_v50  ;;  %v3934_v59 = vpop.f32.mrb[86].mxu1  ;;  %7570 = vmatprep.mubr.msk.bf16.mxu0 %vm1796_vm0, %v11356_v48  ;;  %7578 = vmatprep.mubr.msk.bf16.mxu1 %vm1796_vm0, %v11356_v48 }
 0x45a   : > { %v3935_v11 = vadd.f32 %v3934_v59, %v11187_v60  ;;  %v3936_v61 = vpop.f32.mrb[87].mxu1  ;;  %5402 = vmatmul.mubr.bf16.gmra.mrb[80].mxu0 %v11354_v38  ;;  %5628 = vmatmul.mubr.bf16.gmra.mrb[112].mxu1 %v11354_v38  ;;  %v4001_v18 = vmax.f32 %v3931_v51, 0.0 }
 0x45b   : > { %v3937_v2 = vadd.f32 %v3936_v61, %v11191_v50  ;;  %5685 = vmatpush1.bf16.msra.mxu0 %v8953_v49  ;;  %v4002_v4 = vmax.f32 %v3933_v46, 0.0  ;;  %v8971_v49 = vld [vmem:[%s12098_s8 + $0x2b4] ss:$28 sps:$4 sm:$0xff]  }
 0x45c   : > { %v4005_v26 = vmax.f32 %v3935_v11, 0.0  ;;  %5686 = vmatprep.subr.bf16.mxu0 %v8960_v55  ;;  %v8969_v11 = vld [vmem:[%s12098_s8 + $0x2b0] ss:$28 sps:$4 sm:$0xff]  }
 0x45d   : > { %v4006_v28 = vmax.f32 %v3937_v2, 0.0 }
 0x45e   : > { %v11381_v30 = vpack.c.bf16 %v4005_v26, %v4001_v18 }
 0x45f   : > { %v11383_v31 = vpack.c.bf16 %v4006_v28, %v4002_v4  ;;  %v3940_v32 = vpop.f32.mrb[88].mxu1  ;;  %5687 = vmatpush1.bf16.msra.mxu0 %v8958_v3  ;;  %v8976_v3 = vld [vmem:[%s12098_s8 + $0x2ec] ss:$28 sps:$4 sm:$0xff]  }
 0x460   : > { %v3941_v25 = vadd.f32 %v3940_v32, %v11187_v60  ;;  %v3942_v29 = vpop.f32.mrb[89].mxu1  ;;  %5688 = vmatprep.subr.bf16.mxu0 %v8963_v27  ;;  %v8974_v32 = vld [vmem:[%s12098_s8 + $0x2e8] ss:$28 sps:$4 sm:$0xff]  }
 0x461   : > { %v3943_v7 = vadd.f32 %v3942_v29, %v11191_v50  ;;  %v3944_v39 = vpop.f32.mrb[90].mxu1  ;;  %7571 = vmatprep.mubr.msk.bf16.mxu0 %vm1796_vm0, %v11383_v31  ;;  %7579 = vmatprep.mubr.msk.bf16.mxu1 %vm1796_vm0, %v11383_v31  ;;  %v8979_v29 = vld [vmem:[%s12098_s8 + $0x324] ss:$28 sps:$4 sm:$0xff]  }
 0x462   : > { %v3945_v0 = vadd.f32 %v3944_v39, %v11187_v60  ;;  %v3946_v1 = vpop.f32.mrb[91].mxu1  ;;  %5412 = vmatmul.mubr.bf16.gmra.mrb[84].mxu0 %v11381_v30  ;;  %5638 = vmatmul.mubr.bf16.gmra.mrb[116].mxu1 %v11381_v30  ;;  %v4009_v41 = vmax.f32 %v3941_v25, 0.0 }
 0x463   : > { %v3947_v37 = vadd.f32 %v3946_v1, %v11191_v50  ;;  %5689 = vmatpush1.bf16.msra.mxu0 %v8961_v5  ;;  %v4010_v51 = vmax.f32 %v3943_v7, 0.0  ;;  %v8982_v1 = vld [vmem:[%s12098_s8 + $0x358] ss:$28 sps:$4 sm:$0xff]  }
 0x464   : > { %v4013_v10 = vmax.f32 %v3945_v0, 0.0  ;;  %5690 = vmatprep.subr.bf16.mxu0 %v8968_v36  ;;  %v8984_v0 = vld [vmem:[%s12098_s8 + $0x35c] ss:$28 sps:$4 sm:$0xff]  }
 0x465   : > { %v4014_v52 = vmax.f32 %v3947_v37, 0.0  ;;  %v8987_v37 = vld [vmem:[%s12098_s8 + $0x394] ss:$28 sps:$4 sm:$0xff]  }
 0x466   : > { %v11407_v55 = vpack.c.bf16 %v4013_v10, %v4009_v41  ;;  %v8988_v41 = vld [vmem:[%s12098_s8 + $0x398] ss:$28 sps:$4 sm:$0xff]   ;;  %v8991_v10 = vld [vmem:[%s12098_s8 + $0x3cc] ss:$28 sps:$4 sm:$0xff]  }
 0x467   : > { %v11409_v46 = vpack.c.bf16 %v4014_v52, %v4010_v51  ;;  %v3950_v59 = vpop.f32.mrb[92].mxu1  ;;  %5691 = vmatpush1.bf16.msra.mxu0 %v8966_v40  ;;  %v8985_v40 = vld [vmem:[%s12098_s8 + $0x390] ss:$28 sps:$4 sm:$0xff]   ;;  %v8995_v51 = vld [vmem:[%s12098_s8 + $0x404] ss:$28 sps:$4 sm:$0xff]  }
 0x468   : > { %v3951_v61 = vadd.f32 %v3950_v59, %v11187_v60  ;;  %v3952_v2 = vpop.f32.mrb[93].mxu1  ;;  %5692 = vmatprep.subr.bf16.mxu0 %v8971_v49  ;;  %v8992_v49 = vld [vmem:[%s12098_s8 + $0x3d0] ss:$28 sps:$4 sm:$0xff]   ;;  %v8999_v52 = vld [vmem:[%s12098_s8 + $0x43c] ss:$28 sps:$4 sm:$0xff]  }
 0x469   : > { %v3953_v18 = vadd.f32 %v3952_v2, %v11191_v50  ;;  %v3954_v26 = vpop.f32.mrb[94].mxu1  ;;  %7572 = vmatprep.mubr.msk.bf16.mxu0 %vm1796_vm0, %v11409_v46  ;;  %7580 = vmatprep.mubr.msk.bf16.mxu1 %vm1796_vm0, %v11409_v46  ;;  %v8997_v59 = vld [vmem:[%s12098_s8 + $0x438] ss:$28 sps:$4 sm:$0xff]   ;;  %v9007_v2 = vld [vmem:[%s12098_s8 + $0x4ac] ss:$28 sps:$4 sm:$0xff]  }
 0x46a   : > { %v3955_v27 = vadd.f32 %v3954_v26, %v11187_v60  ;;  %v3956_v4 = vpop.f32.mrb[95].mxu1  ;;  %5422 = vmatmul.mubr.bf16.gmra.mrb[88].mxu0 %v11407_v55  ;;  %5648 = vmatmul.mubr.bf16.gmra.mrb[120].mxu1 %v11407_v55  ;;  %v4017_v5 = vmax.f32 %v3951_v61, 0.0  ;;  %v9004_v61 = vld [vmem:[%s12098_s8 + $0x478] ss:$28 sps:$4 sm:$0xff]   ;;  %v9012_v26 = vld [vmem:[%s12098_s8 + $0x4e8] ss:$28 sps:$4 sm:$0xff]  }
 0x46b   : > { %v3957_v28 = vadd.f32 %v3956_v4, %v11191_v50  ;;  %5693 = vmatpush1.bf16.msra.mxu0 %v8969_v11  ;;  %v4018_v60 = vmax.f32 %v3953_v18, 0.0  ;;  %v8977_v50 = vld [vmem:[%s12098_s8 + $0x320] ss:$28 sps:$4 sm:$0xff]   ;;  %v9008_v18 = vld [vmem:[%s12098_s8 + $0x4b0] ss:$28 sps:$4 sm:$0xff]  }
 0x46c   : > { %v4021_v25 = vmax.f32 %v3955_v27, 0.0  ;;  %5694 = vmatprep.subr.bf16.mxu0 %v8976_v3  ;;  %v9000_v11 = vld [vmem:[%s12098_s8 + $0x440] ss:$28 sps:$4 sm:$0xff]   ;;  %v9005_v3 = vld [vmem:[%s12098_s8 + $0x4a8] ss:$28 sps:$4 sm:$0xff]  }
 0x46d   : > { %v4022_v36 = vmax.f32 %v3957_v28, 0.0  ;;  %v9015_v27 = vld [vmem:[%s12098_s8 + $0x51c] ss:$28 sps:$4 sm:$0xff]  }
 0x46e   : > { %v11433_v7 = vpack.c.bf16 %v4021_v25, %v4017_v5  ;;  %v9013_v4 = vld [vmem:[%s12098_s8 + $0x518] ss:$28 sps:$4 sm:$0xff]   ;;  %v9016_v28 = vld [vmem:[%s12098_s8 + $0x520] ss:$28 sps:$4 sm:$0xff]  }
 0x46f   : > { %v11435_v39 = vpack.c.bf16 %v4022_v36, %v4018_v60  ;;  %5695 = vmatpush1.bf16.msra.mxu0 %v8974_v32  ;;  %v9020_v32 = vld [vmem:[%s12098_s8 + $0x558] ss:$28 sps:$4 sm:$0xff]  }
 0x470   : > { %5696 = vmatprep.subr.bf16.mxu0 %v8979_v29 }
 0x471   : > { %7573 = vmatprep.mubr.msk.bf16.mxu0 %vm1796_vm0, %v11435_v39  ;;  %7581 = vmatprep.mubr.msk.bf16.mxu1 %vm1796_vm0, %v11435_v39 }
 0x472   : > { %5432 = vmatmul.mubr.bf16.gmra.mrb[92].mxu0 %v11433_v7  ;;  %5658 = vmatmul.mubr.bf16.gmra.mrb[124].mxu1 %v11433_v7 }
 0x473   : > { %5697 = vmatpush1.bf16.msra.mxu0 %v8977_v50  ;;  %5700 = vmatprep.mubr.bf16.mxu0 %v10995_v24 }
 0x474   : > { %5926 = vmatprep.mubr.bf16.mxu1 %v10995_v24  ;;  %5698 = vmatprep.subr.bf16.mxu0 %v8984_v0  ;;  %v8989_v24 = vld [vmem:[%s12098_s8 + $0x3c8] ss:$28 sps:$4 sm:$0xff]  }
 0x477   : > { %5699 = vmatpush1.bf16.msra.mxu0 %v8982_v1 }
 0x478   : > { %5781 = vmatprep.subr.bf16.mxu0 %v8987_v37 }
 0x47a   : > { %5701 = vmatmul.mubr.bf16.vlgmr.msra.gmra.mrb[96].mxu0 %v10993_v22  ;;  %5927 = vmatmul.mubr.bf16.vlgmr.msra.gmra.mrb[128].mxu1 %v10993_v22  ;;  %v8993_v22 = vld [vmem:[%s12098_s8 + $0x400] ss:$28 sps:$4 sm:$0xff]  }
 0x47b   : > { %5710 = vmatprep.mubr.bf16.mxu0 %v11031_v47  ;;  %5782 = vmatpush1.bf16.msra.mxu0 %v8985_v40 }
 0x47c   : > { %5934 = vmatprep.mubr.bf16.mxu1 %v11031_v47  ;;  %5992 = vmatpush1.bf16.msra.mxu1 %v8988_v41  ;;  %v8996_v47 = vld [vmem:[%s12098_s8 + $0x408] ss:$28 sps:$4 sm:$0xff]  }
 0x47d   : > { %5783 = vmatprep.subr.bf16.mxu0 %v8991_v10  ;;  %5993 = vmatprep.subr.bf16.mxu1 %v9342_v23 }
 0x47f   : > { %5784 = vmatpush1.bf16.msra.mxu0 %v8989_v24 }
 0x480   : > { %5994 = vmatpush1.bf16.msra.mxu1 %v8992_v49  ;;  %5785 = vmatprep.subr.bf16.mxu0 %v8995_v51 }
 0x481   : > { %5995 = vmatprep.subr.bf16.mxu1 %v9342_v23 }
 0x482   : > { %5711 = vmatmul.mubr.bf16.gmra.mrb[100].mxu0 %v11029_v45  ;;  %5935 = vmatmul.mubr.bf16.gmra.mrb[132].mxu1 %v11029_v45  ;;  %v9003_v45 = vld [vmem:[%s12098_s8 + $0x474] ss:$28 sps:$4 sm:$0xff]  }
 0x483   : > { %5720 = vmatprep.mubr.bf16.mxu0 %v11067_v14  ;;  %5942 = vmatprep.mubr.bf16.mxu1 %v11067_v14  ;;  %v9001_v14 = vld [vmem:[%s12098_s8 + $0x470] ss:$28 sps:$4 sm:$0xff]  }
 0x484   : > { %5786 = vmatpush1.bf16.msra.mxu0 %v8993_v22  ;;  %5996 = vmatpush1.bf16.msra.mxu1 %v8996_v47 }
 0x485   : > { %5787 = vmatprep.subr.bf16.mxu0 %v8999_v52  ;;  %5997 = vmatprep.subr.bf16.mxu1 %v9342_v23 }
 0x488   : > { %5788 = vmatpush1.bf16.msra.mxu0 %v8997_v59  ;;  %5998 = vmatpush1.bf16.msra.mxu1 %v9000_v11 }
 0x489   : > { %5789 = vmatprep.subr.bf16.mxu0 %v9003_v45  ;;  %5999 = vmatprep.subr.bf16.mxu1 %v9342_v23 }
 0x48a   : > { %5721 = vmatmul.mubr.bf16.gmra.mrb[104].mxu0 %v11065_v43  ;;  %5943 = vmatmul.mubr.bf16.gmra.mrb[136].mxu1 %v11065_v43  ;;  %v9011_v43 = vld [vmem:[%s12098_s8 + $0x4e4] ss:$28 sps:$4 sm:$0xff]  }
 0x48b   : > { %5730 = vmatprep.mubr.bf16.mxu0 %v11103_v8  ;;  %5950 = vmatprep.mubr.bf16.mxu1 %v11103_v8  ;;  %v9009_v8 = vld [vmem:[%s12098_s8 + $0x4e0] ss:$28 sps:$4 sm:$0xff]  }
 0x48c   : > { %5790 = vmatpush1.bf16.msra.mxu0 %v9001_v14  ;;  %6000 = vmatpush1.bf16.msra.mxu1 %v9004_v61 }
 0x48d   : > { %5791 = vmatprep.subr.bf16.mxu0 %v9007_v2  ;;  %6001 = vmatprep.subr.bf16.mxu1 %v9342_v23 }
 0x490   : > { %5792 = vmatpush1.bf16.msra.mxu0 %v9005_v3  ;;  %6002 = vmatpush1.bf16.msra.mxu1 %v9008_v18 }
 0x491   : > { %5793 = vmatprep.subr.bf16.mxu0 %v9011_v43  ;;  %6003 = vmatprep.subr.bf16.mxu1 %v9342_v23 }
 0x492   : > { %5731 = vmatmul.mubr.bf16.gmra.mrb[108].mxu0 %v11101_v6  ;;  %5951 = vmatmul.mubr.bf16.gmra.mrb[140].mxu1 %v11101_v6  ;;  %v9019_v6 = vld [vmem:[%s12098_s8 + $0x554] ss:$28 sps:$4 sm:$0xff]  }
 0x493   : > { %5740 = vmatprep.mubr.bf16.mxu0 %v11139_v57  ;;  %5958 = vmatprep.mubr.bf16.mxu1 %v11139_v57  ;;  %v9017_v57 = vld [vmem:[%s12098_s8 + $0x550] ss:$28 sps:$4 sm:$0xff]  }
 0x494   : > { %5794 = vmatpush1.bf16.msra.mxu0 %v9009_v8  ;;  %6004 = vmatpush1.bf16.msra.mxu1 %v9012_v26 }
 0x495   : > { %5795 = vmatprep.subr.bf16.mxu0 %v9015_v27  ;;  %6005 = vmatprep.subr.bf16.mxu1 %v9342_v23 }
 0x498   : > { %5796 = vmatpush1.bf16.msra.mxu0 %v9013_v4  ;;  %6006 = vmatpush1.bf16.msra.mxu1 %v9016_v28 }
 0x499   : > { %5797 = vmatprep.subr.bf16.mxu0 %v9019_v6  ;;  %6007 = vmatprep.subr.bf16.mxu1 %v9342_v23  ;;  %v4255_v23 = vld [vmem:[%s12099_s9] sm:$0x7f] }
 0x49a   : > { %5741 = vmatmul.mubr.bf16.gmra.mrb[112].mxu0 %v11137_v62  ;;  %5959 = vmatmul.mubr.bf16.gmra.mrb[144].mxu1 %v11137_v62  ;;  %v11625_v62 = vrot.slane %v4255_v23, %v10298_v16 }
 0x49b   : > { %5750 = vmatprep.mubr.bf16.mxu0 %v11163_v54  ;;  %5966 = vmatprep.mubr.bf16.mxu1 %v11163_v54  ;;  %v11631_v54 = vrot.slane %v4255_v23, %v10307_v19 }
 0x49c   : > { %5798 = vmatpush1.bf16.msra.mxu0 %v9017_v57  ;;  %6008 = vmatpush1.bf16.msra.mxu1 %v9020_v32 }
 0x4a2   : > { %5751 = vmatmul.mubr.bf16.gmra.mrb[116].mxu0 %v11161_v63  ;;  %5967 = vmatmul.mubr.bf16.gmra.mrb[148].mxu1 %v11161_v63  ;;  %v11628_v63 = vrot.slane %v4255_v23, %v10301_v17 }
 0x4a3   : > { %5760 = vmatprep.mubr.bf16.mxu0 %v11175_v44  ;;  %5974 = vmatprep.mubr.bf16.mxu1 %v11175_v44 }
 0x4aa   : > { %5761 = vmatmul.mubr.bf16.gmra.mrb[120].mxu0 %v11173_v13  ;;  %5975 = vmatmul.mubr.bf16.gmra.mrb[152].mxu1 %v11173_v13  ;;  %v11634_v13 = vrot.slane %v4255_v23, %v10310_v20 }
 0x4ab   : > { %5770 = vmatprep.mubr.bf16.mxu0 %v11195_v53  ;;  %5982 = vmatprep.mubr.bf16.mxu1 %v11195_v53 }
 0x4b2   : > { %5771 = vmatmul.mubr.bf16.gmra.mrb[124].mxu0 %v11193_v35  ;;  %5983 = vmatmul.mubr.bf16.gmra.mrb[156].mxu1 %v11193_v35 }
 0x4b3   : > { %7582 = vmatprep.mubr.msk.bf16.mxu0 %vm1796_vm0, %v11207_v33  ;;  %7590 = vmatprep.mubr.msk.bf16.mxu1 %vm1796_vm0, %v11207_v33 }
 0x4ba   : > { %5814 = vmatmul.mubr.bf16.vlgmr.msra.gmra.mrb[96].mxu0 %v11205_v21  ;;  %6024 = vmatmul.mubr.bf16.vlgmr.msra.gmra.mrb[160].mxu1 %v11205_v21 }
 0x4bb   : > { %7583 = vmatprep.mubr.msk.bf16.mxu0 %vm1796_vm0, %v11245_v42  ;;  %7591 = vmatprep.mubr.msk.bf16.mxu1 %vm1796_vm0, %v11245_v42 }
 0x4c2   : > { %5824 = vmatmul.mubr.bf16.gmra.mrb[100].mxu0 %v11243_v58  ;;  %6032 = vmatmul.mubr.bf16.gmra.mrb[164].mxu1 %v11243_v58 }
 0x4c3   : > { %7584 = vmatprep.mubr.msk.bf16.mxu0 %vm1796_vm0, %v11283_v56  ;;  %7592 = vmatprep.mubr.msk.bf16.mxu1 %vm1796_vm0, %v11283_v56 }
 0x4ca   : > { %5834 = vmatmul.mubr.bf16.gmra.mrb[104].mxu0 %v11281_v9  ;;  %6040 = vmatmul.mubr.bf16.gmra.mrb[168].mxu1 %v11281_v9 }
 0x4cb   : > { %7585 = vmatprep.mubr.msk.bf16.mxu0 %vm1796_vm0, %v11321_v12  ;;  %7593 = vmatprep.mubr.msk.bf16.mxu1 %vm1796_vm0, %v11321_v12 }
 0x4d2   : > { %5844 = vmatmul.mubr.bf16.gmra.mrb[108].mxu0 %v11319_v34  ;;  %6048 = vmatmul.mubr.bf16.gmra.mrb[172].mxu1 %v11319_v34 }
 0x4d3   : > { %7586 = vmatprep.mubr.msk.bf16.mxu0 %vm1796_vm0, %v11356_v48  ;;  %7594 = vmatprep.mubr.msk.bf16.mxu1 %vm1796_vm0, %v11356_v48 }
 0x4da   : > { %5854 = vmatmul.mubr.bf16.gmra.mrb[112].mxu0 %v11354_v38  ;;  %6056 = vmatmul.mubr.bf16.gmra.mrb[176].mxu1 %v11354_v38 }
 0x4db   : > { %7587 = vmatprep.mubr.msk.bf16.mxu0 %vm1796_vm0, %v11383_v31  ;;  %7595 = vmatprep.mubr.msk.bf16.mxu1 %vm1796_vm0, %v11383_v31 }
 0x4e2   : > { %5864 = vmatmul.mubr.bf16.gmra.mrb[116].mxu0 %v11381_v30  ;;  %6064 = vmatmul.mubr.bf16.gmra.mrb[180].mxu1 %v11381_v30 }
 0x4e3   : > { %7588 = vmatprep.mubr.msk.bf16.mxu0 %vm1796_vm0, %v11409_v46  ;;  %7596 = vmatprep.mubr.msk.bf16.mxu1 %vm1796_vm0, %v11409_v46 }
 0x4ea   : > { %5874 = vmatmul.mubr.bf16.gmra.mrb[120].mxu0 %v11407_v55  ;;  %6072 = vmatmul.mubr.bf16.gmra.mrb[184].mxu1 %v11407_v55 }
 0x4eb   : > { %7589 = vmatprep.mubr.msk.bf16.mxu0 %vm1796_vm0, %v11435_v39  ;;  %7597 = vmatprep.mubr.msk.bf16.mxu1 %vm1796_vm0, %v11435_v39 }
 0x4f2   : > { %5884 = vmatmul.mubr.bf16.gmra.mrb[124].mxu0 %v11433_v7  ;;  %6080 = vmatmul.mubr.bf16.gmra.mrb[188].mxu1 %v11433_v7 }
 0x50d   : > { %v5363_v44 = vpop.f32.mrb[64].mxu0  ;;  %v5589_v35 = vpop.f32.mrb[96].mxu1 }
 0x50e   : > { %v7894_v53 = vadd.f32 %v5363_v44, %v11625_v62  ;;  %v7926_v21 = vadd.f32 %v5589_v35, %v11628_v63  ;;  %v5365_v33 = vpop.f32.mrb[65].mxu0  ;;  %v5591_v58 = vpop.f32.mrb[97].mxu1 }
 0x50f   : > { %v7895_v16 = vadd.f32 %v5365_v33, %v11631_v54  ;;  %v7927_v42 = vadd.f32 %v5591_v58, %v11634_v13  ;;  %v5367_v17 = vpop.f32.mrb[66].mxu0  ;;  %v5593_v9 = vpop.f32.mrb[98].mxu1 }
 0x510   : > { %v6088_v56 = vmul.f32 0.5, %v7894_v53  ;;  %v6090_v19 = vmul.f32 0.5, %v7926_v21  ;;  %v7896_v34 = vadd.f32 %v5367_v17, %v11625_v62  ;;  %v7928_v20 = vadd.f32 %v5593_v9, %v11628_v63  ;;  %v5369_v12 = vpop.f32.mrb[67].mxu0  ;;  %v5595_v38 = vpop.f32.mrb[99].mxu1 }
 0x511   : > { %v6089_v48 = vmul.f32 0.5, %v7895_v16  ;;  %v6091_v30 = vmul.f32 0.5, %v7927_v42  ;;  %v7897_v31 = vadd.f32 %v5369_v12, %v11631_v54  ;;  %v7929_v55 = vadd.f32 %v5595_v38, %v11634_v13 }
 0x512   : > { %9053 = vtanh.f32 %v6088_v56  ;;  %v6095_v46 = vmul.f32 0.5, %v7896_v34  ;;  %v6097_v5 = vmul.f32 0.5, %v7928_v20 }
 0x513   : > { %9055 = vtanh.f32 %v6090_v19  ;;  %v6096_v25 = vmul.f32 0.5, %v7897_v31  ;;  %v6098_v29 = vmul.f32 0.5, %v7929_v55 }
 0x514   : > { %9057 = vtanh.f32 %v6089_v48 }
 0x515   : > { %9059 = vtanh.f32 %v6091_v30  ;;  %v5373_v60 = vpop.f32.mrb[68].mxu0  ;;  %v5599_v36 = vpop.f32.mrb[100].mxu1 }
 0x516   : > { %9061 = vtanh.f32 %v6095_v46  ;;  %v7898_v7 = vadd.f32 %v5373_v60, %v11625_v62  ;;  %v7930_v39 = vadd.f32 %v5599_v36, %v11628_v63  ;;  %v5375_v50 = vpop.f32.mrb[69].mxu0  ;;  %v5601_v0 = vpop.f32.mrb[101].mxu1 }
 0x517   : > { %9063 = vtanh.f32 %v6097_v5  ;;  %v7899_v1 = vadd.f32 %v5375_v50, %v11631_v54  ;;  %v7931_v37 = vadd.f32 %v5601_v0, %v11634_v13  ;;  %v5377_v40 = vpop.f32.mrb[70].mxu0  ;;  %v5603_v41 = vpop.f32.mrb[102].mxu1 }
 0x518   : > { %9065 = vtanh.f32 %v6096_v25  ;;  %v6102_v10 = vmul.f32 0.5, %v7898_v7  ;;  %v6104_v24 = vmul.f32 0.5, %v7930_v39  ;;  %v7900_v49 = vadd.f32 %v5377_v40, %v11625_v62  ;;  %v5379_v51 = vpop.f32.mrb[71].mxu0  ;;  %v5605_v22 = vpop.f32.mrb[103].mxu1 }
 0x519   : > { %9067 = vtanh.f32 %v6098_v29  ;;  %v6103_v47 = vmul.f32 0.5, %v7899_v1  ;;  %v6105_v52 = vmul.f32 0.5, %v7931_v37  ;;  %v7932_v59 = vadd.f32 %v5603_v41, %v11628_v63 }
 0x51a   : > { %9069 = vtanh.f32 %v6102_v10  ;;  %v6109_v11 = vmul.f32 0.5, %v7900_v49  ;;  %v7901_v45 = vadd.f32 %v5379_v51, %v11631_v54  ;;  %v7933_v14 = vadd.f32 %v5605_v22, %v11634_v13 }
 0x51b   : > { %9071 = vtanh.f32 %v6104_v24  ;;  %v6111_v61 = vmul.f32 0.5, %v7932_v59 }
 0x51c   : > { %v9054_v2 = vpop.eup %9053  ;;  %9073 = vtanh.f32 %v6103_v47  ;;  %v6110_v3 = vmul.f32 0.5, %v7901_v45  ;;  %v6112_v8 = vmul.f32 0.5, %v7933_v14 }
 0x51d   : > { %v9056_v18 = vpop.eup %9055  ;;  %v6312_v43 = vadd.f32 1.0, %v9054_v2  ;;  %9075 = vtanh.f32 %v6105_v52  ;;  %v5383_v26 = vpop.f32.mrb[72].mxu0 }
 0x51e   : > { %v5609_v27 = vpop.f32.mrb[104].mxu1  ;;  %v9058_v4 = vpop.eup %9057  ;;  %v6314_v28 = vadd.f32 1.0, %v9056_v18  ;;  %9077 = vtanh.f32 %v6109_v11  ;;  %v7902_v6 = vadd.f32 %v5383_v26, %v11625_v62 }
 0x51f   : > { %v7934_v57 = vadd.f32 %v5609_v27, %v11628_v63  ;;  %v5385_v32 = vpop.f32.mrb[73].mxu0  ;;  %v5611_v23 = vpop.f32.mrb[105].mxu1  ;;  %v6424_v35 = vmul.f32 0.5, %v6312_v43  ;;  %v6313_v53 = vadd.f32 1.0, %v9058_v4  ;;  %9079 = vtanh.f32 %v6111_v61 }
 0x520   : > { %v9060_v44 = vpop.eup %9059  ;;  %v7903_v21 = vadd.f32 %v5385_v32, %v11631_v54  ;;  %v5387_v33 = vpop.f32.mrb[74].mxu0  ;;  %v6426_v42 = vmul.f32 0.5, %v6314_v28  ;;  %9081 = vtanh.f32 %v6110_v3  ;;  %v6116_v9 = vmul.f32 0.5, %v7902_v6 }
 0x521   : > { %v5613_v58 = vpop.f32.mrb[106].mxu1  ;;  %v9062_v16 = vpop.eup %9061  ;;  %v6315_v17 = vadd.f32 1.0, %v9060_v44  ;;  %v6425_v20 = vmul.f32 0.5, %v6313_v53  ;;  %9083 = vtanh.f32 %v6112_v8  ;;  %v6118_v38 = vmul.f32 0.5, %v7934_v57 }
 0x522   : > { %v5389_v56 = vpop.f32.mrb[75].mxu0  ;;  %v11656_v19 = vpop.f32.mrb[107].mxu1  ;;  %v6319_v12 = vadd.f32 1.0, %v9062_v16  ;;  %9085 = vtanh.f32 %v6116_v9  ;;  %v6117_v55 = vmul.f32 0.5, %v7903_v21  ;;  %v7935_v37 = vadd.f32 %v5611_v23, %v11634_v13 }
 0x523   : > { %v9064_v34 = vpop.eup %9063  ;;  %v6427_v30 = vmul.f32 0.5, %v6315_v17  ;;  %v7668_v5 = vpack.c.bf16 %v6425_v20, %v6424_v35  ;;  %9087 = vtanh.f32 %v6118_v38  ;;  %v7904_v40 = vadd.f32 %v5387_v33, %v11625_v62 }
 0x524   : > { %v9066_v48 = vpop.eup %9065  ;;  %v6321_v31 = vadd.f32 1.0, %v9064_v34  ;;  %v6431_v25 = vmul.f32 0.5, %v6319_v12  ;;  %9089 = vtanh.f32 %v6117_v55  ;;  %v7936_v22 = vadd.f32 %v5613_v58, %v11628_v63 }
 0x525   : > { %v9068_v46 = vpop.eup %9067  ;;  %v6320_v29 = vadd.f32 1.0, %v9066_v48  ;;  %v7669_v36 = vpack.c.bf16 %v6427_v30, %v6426_v42  ;;  %6888 = vst [vmem:[%s11661_s22] sm:$0xff] %v7668_v5  ;;  %v5393_v41 = vpop.f32.mrb[76].mxu0  ;;  %v7905_v47 = vadd.f32 %v5389_v56, %v11631_v54  ;;  %v6119_v2 = vmul.f32 0.5, %v7935_v37 }
 0x526   : > { %v9070_v60 = vpop.eup %9069  ;;  %v6433_v7 = vmul.f32 0.5, %v6321_v31  ;;  %v6322_v39 = vadd.f32 1.0, %v9068_v46  ;;  %v5619_v10 = vpop.f32.mrb[108].mxu1  ;;  %v6123_v4 = vmul.f32 0.5, %v7904_v40  ;;  %v6125_v44 = vmul.f32 0.5, %v7936_v22 }
 0x527   : > { %v9072_v50 = vpop.eup %9071  ;;  %v6432_v0 = vmul.f32 0.5, %v6320_v29  ;;  %v6326_v1 = vadd.f32 1.0, %v9070_v60  ;;  %6889 = vst [vmem:[%s11661_s22 + $0x8] sm:$0xff] %v7669_v36  ;;  %v5395_v52 = vpop.f32.mrb[77].mxu0  ;;  %9091 = vtanh.f32 %v6119_v2  ;;  %v6124_v33 = vmul.f32 0.5, %v7905_v47 }
 0x528   : > { %v9074_v24 = vpop.eup %9073  ;;  %v6434_v49 = vmul.f32 0.5, %v6322_v39  ;;  %v6328_v51 = vadd.f32 1.0, %v9072_v50  ;;  %v11669_v59 = vpop.f32.mrb[109].mxu1  ;;  %9093 = vtanh.f32 %v6123_v4  ;;  %v7937_v30 = vadd.f32 %v11656_v19, %v11634_v13 }
 0x529   : > { %v9076_v11 = vpop.eup %9075  ;;  %v7672_v45 = vpack.c.bf16 %v6432_v0, %v6431_v25  ;;  %v6438_v14 = vmul.f32 0.5, %v6326_v1  ;;  %v6327_v61 = vadd.f32 1.0, %v9074_v24  ;;  %v11671_v3 = vpop.f32.mrb[78].mxu0  ;;  %9095 = vtanh.f32 %v6125_v44 }
 0x52a   : > { %v11673_v18 = vpop.f32.mrb[110].mxu1  ;;  %v9078_v43 = vpop.eup %9077  ;;  %v7673_v8 = vpack.c.bf16 %v6434_v49, %v6433_v7  ;;  %v6440_v26 = vmul.f32 0.5, %v6328_v51  ;;  %v6329_v27 = vadd.f32 1.0, %v9076_v11  ;;  %9097 = vtanh.f32 %v6124_v33 }
 0x52b   : > { %v5399_v28 = vpop.f32.mrb[79].mxu0  ;;  %v11675_v6 = vpop.f32.mrb[111].mxu1  ;;  %6893 = vst [vmem:[%s11661_s22 + $0x1c] sm:$0xff] %v7672_v45  ;;  %v6439_v32 = vmul.f32 0.5, %v6327_v61  ;;  %v6333_v23 = vadd.f32 1.0, %v9078_v43  ;;  %v7906_v31 = vadd.f32 %v5393_v41, %v11625_v62  ;;  %v7938_v60 = vadd.f32 %v5619_v10, %v11628_v63 }
 0x52c   : > { %v9080_v57 = vpop.eup %9079  ;;  %6894 = vst [vmem:[%s11661_s22 + $0x24] sm:$0xff] %v7673_v8  ;;  %v6441_v53 = vmul.f32 0.5, %v6329_v27  ;;  %v7907_v36 = vadd.f32 %v5395_v52, %v11631_v54  ;;  %v6126_v1 = vmul.f32 0.5, %v7937_v30  ;;  %v7939_v11 = vadd.f32 %v11669_v59, %v11634_v13 }
 0x52d   : > { %v9082_v35 = vpop.eup %9081  ;;  %v6335_v21 = vadd.f32 1.0, %v9080_v57  ;;  %v7676_v16 = vpack.c.bf16 %v6439_v32, %v6438_v14  ;;  %v6445_v42 = vmul.f32 0.5, %v6333_v23  ;;  %v5403_v55 = vpop.f32.mrb[80].mxu0  ;;  %v6130_v49 = vmul.f32 0.5, %v7906_v31 }
 0x52e   : > { %v9084_v58 = vpop.eup %9083  ;;  %v6334_v17 = vadd.f32 1.0, %v9082_v35  ;;  %v7677_v56 = vpack.c.bf16 %v6441_v53, %v6440_v26  ;;  %v5629_v46 = vpop.f32.mrb[112].mxu1  ;;  %v6132_v51 = vmul.f32 0.5, %v7938_v60  ;;  %9099 = vtanh.f32 %v6126_v1 }
 0x52f   : > { %v9086_v9 = vpop.eup %9085  ;;  %v6447_v34 = vmul.f32 0.5, %v6335_v21  ;;  %v6336_v20 = vadd.f32 1.0, %v9084_v58  ;;  %6897 = vst [vmem:[%s11661_s22 + $0x38] sm:$0xff] %v7676_v16  ;;  %v11686_v7 = vpop.f32.mrb[81].mxu0  ;;  %v6131_v52 = vmul.f32 0.5, %v7907_v36  ;;  %9101 = vtanh.f32 %v6130_v49 }
 0x530   : > { %v9088_v12 = vpop.eup %9087  ;;  %v6446_v38 = vmul.f32 0.5, %v6334_v17  ;;  %v6340_v48 = vadd.f32 1.0, %v9086_v9  ;;  %6898 = vst [vmem:[%s11661_s22 + $0x40] sm:$0xff] %v7677_v56  ;;  %v11688_v39 = vpop.f32.mrb[113].mxu1  ;;  %v7908_v45 = vadd.f32 %v11671_v3, %v11625_v62  ;;  %v7940_v14 = vadd.f32 %v11673_v18, %v11628_v63 }
 0x531   : > { %v9090_v5 = vpop.eup %9089  ;;  %v6448_v25 = vmul.f32 0.5, %v6336_v20  ;;  %v6342_v29 = vadd.f32 1.0, %v9088_v12  ;;  %v5407_v37 = vpop.f32.mrb[82].mxu0  ;;  %v7909_v61 = vadd.f32 %v5399_v28, %v11631_v54  ;;  %9103 = vtanh.f32 %v6132_v51 }
 0x532   : > { %v7680_v50 = vpack.c.bf16 %v6446_v38, %v6445_v42  ;;  %v6452_v0 = vmul.f32 0.5, %v6340_v48  ;;  %v6341_v19 = vadd.f32 1.0, %v9090_v5  ;;  %v5633_v40 = vpop.f32.mrb[114].mxu1  ;;  %v5409_v22 = vpop.f32.mrb[83].mxu0  ;;  %v6133_v8 = vmul.f32 0.5, %v7939_v11 }
 0x533   : > { %v7681_v41 = vpack.c.bf16 %v6448_v25, %v6447_v34  ;;  %v6454_v24 = vmul.f32 0.5, %v6342_v29  ;;  %v11690_v10 = vpop.f32.mrb[115].mxu1  ;;  %v9092_v2 = vpop.eup %9091  ;;  %v7941_v26 = vadd.f32 %v11675_v6, %v11634_v13  ;;  %9105 = vtanh.f32 %v6131_v52 }
 0x534   : > { %6901 = vst [vmem:[%s11661_s22 + $0x54] sm:$0xff] %v7680_v50  ;;  %v6453_v47 = vmul.f32 0.5, %v6341_v19  ;;  %v9094_v27 = vpop.eup %9093  ;;  %v6343_v59 = vadd.f32 1.0, %v9092_v2  ;;  %v6137_v4 = vmul.f32 0.5, %v7908_v45  ;;  %v6139_v57 = vmul.f32 0.5, %v7940_v14 }
 0x535   : > { %6902 = vst [vmem:[%s11661_s22 + $0x5c] sm:$0xff] %v7681_v41  ;;  %v9096_v32 = vpop.eup %9095  ;;  %v6347_v3 = vadd.f32 1.0, %v9094_v27  ;;  %9107 = vtanh.f32 %v6133_v8  ;;  %v6138_v23 = vmul.f32 0.5, %v7909_v61  ;;  %v6140_v18 = vmul.f32 0.5, %v7941_v26  ;;  %v5413_v44 = vpop.f32.mrb[84].mxu0 }
 0x536   : > { %v7684_v43 = vpack.c.bf16 %v6453_v47, %v6452_v0  ;;  %v11704_v28 = vpop.f32.mrb[116].mxu1  ;;  %v9098_v35 = vpop.eup %9097  ;;  %v6455_v53 = vmul.f32 0.5, %v6343_v59  ;;  %v6349_v21 = vadd.f32 1.0, %v9096_v32  ;;  %9109 = vtanh.f32 %v6137_v4 }
 0x537   : > { %v7910_v6 = vadd.f32 %v5403_v55, %v11625_v62  ;;  %v11707_v33 = vpop.f32.mrb[85].mxu0  ;;  %v11709_v58 = vpop.f32.mrb[117].mxu1  ;;  %v6459_v16 = vmul.f32 0.5, %v6347_v3  ;;  %v6348_v42 = vadd.f32 1.0, %v9098_v35  ;;  %9111 = vtanh.f32 %v6139_v57 }
 0x538   : > { %6905 = vst [vmem:[%s11661_s22 + $0x70] sm:$0xff] %v7684_v43  ;;  %v7942_v17 = vadd.f32 %v5629_v46, %v11628_v63  ;;  %v11712_v9 = vpop.f32.mrb[86].mxu0  ;;  %v11714_v56 = vpop.f32.mrb[118].mxu1  ;;  %v7685_v34 = vpack.c.bf16 %v6455_v53, %v6454_v24  ;;  %v6461_v20 = vmul.f32 0.5, %v6349_v21  ;;  %9113 = vtanh.f32 %v6138_v23 }
 0x539   : > { %v6144_v12 = vmul.f32 0.5, %v7910_v6  ;;  %v11716_v38 = vpop.f32.mrb[87].mxu0  ;;  %v11718_v48 = vpop.f32.mrb[119].mxu1  ;;  %v6460_v30 = vmul.f32 0.5, %v6348_v42  ;;  %9115 = vtanh.f32 %v6140_v18  ;;  %v7911_v55 = vadd.f32 %v11686_v7, %v11631_v54 }
 0x53a   : > { %v6146_v31 = vmul.f32 0.5, %v7942_v17  ;;  %6906 = vst [vmem:[%s11661_s22 + $0x78] sm:$0xff] %v7685_v34  ;;  %v7943_v46 = vadd.f32 %v11688_v39, %v11634_v13  ;;  %v7912_v5 = vadd.f32 %v5407_v37, %v11625_v62  ;;  %v7944_v25 = vadd.f32 %v5633_v40, %v11628_v63  ;;  %v9100_v29 = vpop.eup %9099 }
 0x53b   : > { %9117 = vtanh.f32 %v6144_v12  ;;  %v7688_v60 = vpack.c.bf16 %v6460_v30, %v6459_v16  ;;  %v6145_v36 = vmul.f32 0.5, %v7911_v55  ;;  %v7913_v50 = vadd.f32 %v5409_v22, %v11631_v54  ;;  %v9102_v0 = vpop.eup %9101 }
 0x53c   : > { %9119 = vtanh.f32 %v6146_v31  ;;  %v6350_v19 = vadd.f32 1.0, %v9100_v29  ;;  %v6147_v1 = vmul.f32 0.5, %v7943_v46  ;;  %v6151_v7 = vmul.f32 0.5, %v7912_v5  ;;  %v9104_v24 = vpop.eup %9103 }
 0x53d   : > { %v6153_v41 = vmul.f32 0.5, %v7944_v25  ;;  %6909 = vst [vmem:[%s11661_s22 + $0x8c] sm:$0xff] %v7688_v60  ;;  %v6354_v49 = vadd.f32 1.0, %v9102_v0  ;;  %9121 = vtanh.f32 %v6145_v36  ;;  %v6152_v39 = vmul.f32 0.5, %v7913_v50  ;;  %v11731_v40 = vpop.f32.mrb[88].mxu0  ;;  %v11733_v51 = vpop.f32.mrb[120].mxu1 }
 0x53e   : > { %v7945_v37 = vadd.f32 %v11690_v10, %v11634_v13  ;;  %v9106_v47 = vpop.eup %9105  ;;  %v6462_v52 = vmul.f32 0.5, %v6350_v19  ;;  %v6356_v22 = vadd.f32 1.0, %v9104_v24  ;;  %9123 = vtanh.f32 %v6147_v1  ;;  %v11736_v45 = vpop.f32.mrb[89].mxu0 }
 0x53f   : > { %v7914_v11 = vadd.f32 %v5413_v44, %v11625_v62  ;;  %v11738_v14 = vpop.f32.mrb[121].mxu1  ;;  %v9108_v61 = vpop.eup %9107  ;;  %v6466_v2 = vmul.f32 0.5, %v6354_v49  ;;  %v6355_v43 = vadd.f32 1.0, %v9106_v47  ;;  %9125 = vtanh.f32 %v6151_v7 }
 0x540   : > { %v6154_v8 = vmul.f32 0.5, %v7945_v37  ;;  %v11740_v10 = vpop.f32.mrb[90].mxu0  ;;  %v11742_v26 = vpop.f32.mrb[122].mxu1  ;;  %v7689_v59 = vpack.c.bf16 %v6462_v52, %v6461_v20  ;;  %v6468_v4 = vmul.f32 0.5, %v6356_v22  ;;  %v6357_v57 = vadd.f32 1.0, %v9108_v61 }
 0x541   : > { %v9110_v27 = vpop.eup %9109  ;;  %9127 = vtanh.f32 %v6153_v41  ;;  %v11744_v32 = vpop.f32.mrb[91].mxu0  ;;  %v6467_v18 = vmul.f32 0.5, %v6355_v43  ;;  %v6158_v35 = vmul.f32 0.5, %v7914_v11  ;;  %v7946_v16 = vadd.f32 %v11704_v28, %v11628_v63 }
 0x542   : > { %v11746_v3 = vpop.f32.mrb[123].mxu1  ;;  %v9112_v23 = vpop.eup %9111  ;;  %v6361_v44 = vadd.f32 1.0, %v9110_v27  ;;  %9129 = vtanh.f32 %v6152_v39  ;;  %6910 = vst [vmem:[%s11661_s22 + $0x94] sm:$0xff] %v7689_v59  ;;  %v6469_v21 = vmul.f32 0.5, %v6357_v57  ;;  %v7915_v60 = vadd.f32 %v11707_v33, %v11631_v54 }
 0x543   : > { %v9114_v53 = vpop.eup %9113  ;;  %v6363_v6 = vadd.f32 1.0, %v9112_v23  ;;  %9131 = vtanh.f32 %v6154_v8  ;;  %v7692_v17 = vpack.c.bf16 %v6467_v18, %v6466_v2  ;;  %v6160_v46 = vmul.f32 0.5, %v7946_v16 }
 0x544   : > { %v9116_v42 = vpop.eup %9115  ;;  %v6473_v34 = vmul.f32 0.5, %v6361_v44  ;;  %v6362_v20 = vadd.f32 1.0, %v9114_v53  ;;  %9133 = vtanh.f32 %v6158_v35  ;;  %v7693_v30 = vpack.c.bf16 %v6469_v21, %v6468_v4 }
 0x545   : > { %v9118_v12 = vpop.eup %9117  ;;  %v6475_v31 = vmul.f32 0.5, %v6363_v6  ;;  %v6364_v55 = vadd.f32 1.0, %v9116_v42  ;;  %6913 = vst [vmem:[%s11661_s22 + $0xa8] sm:$0xff] %v7692_v17  ;;  %v7947_v28 = vadd.f32 %v11709_v58, %v11634_v13  ;;  %v11756_v36 = vpop.f32.mrb[92].mxu0  ;;  %9135 = vtanh.f32 %v6160_v46 }
 0x546   : > { %v9120_v5 = vpop.eup %9119  ;;  %v6474_v25 = vmul.f32 0.5, %v6362_v20  ;;  %v6368_v29 = vadd.f32 1.0, %v9118_v12  ;;  %v11758_v50 = vpop.f32.mrb[124].mxu1  ;;  %6914 = vst [vmem:[%s11661_s22 + $0xb0] sm:$0xff] %v7693_v30  ;;  %v7916_v1 = vadd.f32 %v11712_v9, %v11625_v62  ;;  %v6159_v58 = vmul.f32 0.5, %v7915_v60 }
 0x547   : > { %v6476_v0 = vmul.f32 0.5, %v6364_v55  ;;  %v6370_v19 = vadd.f32 1.0, %v9120_v5  ;;  %v11763_v7 = vpop.f32.mrb[93].mxu0  ;;  %v11765_v41 = vpop.f32.mrb[125].mxu1  ;;  %v6161_v39 = vmul.f32 0.5, %v7947_v28  ;;  %v7948_v59 = vadd.f32 %v11714_v56, %v11628_v63 }
 0x548   : > { %v9122_v33 = vpop.eup %9121  ;;  %v7696_v24 = vpack.c.bf16 %v6474_v25, %v6473_v34  ;;  %v6480_v49 = vmul.f32 0.5, %v6368_v29  ;;  %v11767_v37 = vpop.f32.mrb[94].mxu0  ;;  %v6165_v9 = vmul.f32 0.5, %v7916_v1  ;;  %9137 = vtanh.f32 %v6159_v58 }
 0x549   : > { %v11769_v47 = vpop.f32.mrb[126].mxu1  ;;  %v9124_v52 = vpop.eup %9123  ;;  %v7697_v22 = vpack.c.bf16 %v6476_v0, %v6475_v31  ;;  %v6482_v11 = vmul.f32 0.5, %v6370_v19  ;;  %v6369_v61 = vadd.f32 1.0, %v9122_v33  ;;  %v7917_v4 = vadd.f32 %v11716_v38, %v11631_v54 }
 0x54a   : > { %v11771_v2 = vpop.f32.mrb[95].mxu0  ;;  %v11773_v43 = vpop.f32.mrb[127].mxu1  ;;  %6917 = vst [vmem:[%s11661_s22 + $0xc4] sm:$0xff] %v7696_v24  ;;  %v6371_v27 = vadd.f32 1.0, %v9124_v52  ;;  %9139 = vtanh.f32 %v6161_v39  ;;  %v7949_v44 = vadd.f32 %v11718_v48, %v11634_v13  ;;  %v6167_v6 = vmul.f32 0.5, %v7948_v59 }
 0x54b   : > { %v9126_v8 = vpop.eup %9125  ;;  %6918 = vst [vmem:[%s11661_s22 + $0xcc] sm:$0xff] %v7697_v22  ;;  %v6481_v23 = vmul.f32 0.5, %v6369_v61  ;;  %9141 = vtanh.f32 %v6165_v9  ;;  %v6166_v38 = vmul.f32 0.5, %v7917_v4  ;;  %v7918_v29 = vadd.f32 %v11731_v40, %v11625_v62 }
 0x54c   : > { %v9128_v57 = vpop.eup %9127  ;;  %v6375_v18 = vadd.f32 1.0, %v9126_v8  ;;  %v6483_v53 = vmul.f32 0.5, %v6371_v27  ;;  %9143 = vtanh.f32 %v6167_v6  ;;  %v6168_v46 = vmul.f32 0.5, %v7949_v44 }
 0x54d   : > { %v9130_v35 = vpop.eup %9129  ;;  %v6377_v21 = vadd.f32 1.0, %v9128_v57  ;;  %v7700_v42 = vpack.c.bf16 %v6481_v23, %v6480_v49  ;;  %v11783_v31 = vpop.f32.mrb[128].mxu1  ;;  %9145 = vtanh.f32 %v6166_v38  ;;  %v7950_v60 = vadd.f32 %v11733_v51, %v11628_v63 }
 0x54e   : > { %v9132_v16 = vpop.eup %9131  ;;  %v6487_v56 = vmul.f32 0.5, %v6375_v18  ;;  %v6376_v17 = vadd.f32 1.0, %v9130_v35  ;;  %v7701_v20 = vpack.c.bf16 %v6483_v53, %v6482_v11  ;;  %v11786_v5 = vpop.f32.mrb[129].mxu1  ;;  %v7919_v28 = vadd.f32 %v11736_v45, %v11631_v54 }
 0x54f   : > { %v9134_v34 = vpop.eup %9133  ;;  %v6489_v12 = vmul.f32 0.5, %v6377_v21  ;;  %v6378_v30 = vadd.f32 1.0, %v9132_v16  ;;  %6921 = vst [vmem:[%s11661_s22 + $0xe0] sm:$0xff] %v7700_v42  ;;  %v11795_v0 = vpop.f32.mrb[130].mxu1  ;;  %9147 = vtanh.f32 %v6168_v46  ;;  %v7951_v24 = vadd.f32 %v11738_v14, %v11634_v13 }
 0x550   : > { %v6488_v48 = vmul.f32 0.5, %v6376_v17  ;;  %v6382_v55 = vadd.f32 1.0, %v9134_v34  ;;  %6922 = vst [vmem:[%s11661_s22 + $0xe8] sm:$0xff] %v7701_v20  ;;  %v9136_v19 = vpop.eup %9135  ;;  %v11799_v49 = vpop.f32.mrb[131].mxu1  ;;  %v6172_v39 = vmul.f32 0.5, %v7918_v29  ;;  %v6174_v52 = vmul.f32 0.5, %v7950_v60 }
 0x551   : > { %v6490_v25 = vmul.f32 0.5, %v6378_v30  ;;  %v6384_v40 = vadd.f32 1.0, %v9136_v19  ;;  %v6173_v51 = vmul.f32 0.5, %v7919_v28  ;;  %v6175_v22 = vmul.f32 0.5, %v7951_v24 }
 0x552   : > { %v7704_v1 = vpack.c.bf16 %v6488_v48, %v6487_v56  ;;  %v6494_v33 = vmul.f32 0.5, %v6382_v55  ;;  %v7920_v45 = vadd.f32 %v11740_v10, %v11625_v62  ;;  %v7952_v11 = vadd.f32 %v11742_v26, %v11628_v63  ;;  %v9138_v61 = vpop.eup %9137 }
 0x553   : > { %v7705_v58 = vpack.c.bf16 %v6490_v25, %v6489_v12  ;;  %v6496_v9 = vmul.f32 0.5, %v6384_v40  ;;  %9149 = vtanh.f32 %v6172_v39  ;;  %v7921_v14 = vadd.f32 %v11744_v32, %v11631_v54 }
 0x554   : > { %6925 = vst [vmem:[%s11661_s22 + $0xfc] sm:$0xff] %v7704_v1  ;;  %v7953_v8 = vadd.f32 %v11746_v3, %v11634_v13  ;;  %v9140_v27 = vpop.eup %9139  ;;  %v6383_v59 = vadd.f32 1.0, %v9138_v61  ;;  %9151 = vtanh.f32 %v6174_v52  ;;  %v6179_v4 = vmul.f32 0.5, %v7920_v45 }
 0x555   : > { %6926 = vst [vmem:[%s11661_s22 + $0x104] sm:$0xff] %v7705_v58  ;;  %v6181_v57 = vmul.f32 0.5, %v7952_v11  ;;  %v9142_v23 = vpop.eup %9141  ;;  %v6385_v10 = vadd.f32 1.0, %v9140_v27  ;;  %9153 = vtanh.f32 %v6173_v51  ;;  %v6180_v18 = vmul.f32 0.5, %v7921_v14  ;;  %v11811_v44 = vpop.f32.mrb[132].mxu1 }
 0x556   : > { %v6182_v26 = vmul.f32 0.5, %v7953_v8  ;;  %v6495_v35 = vmul.f32 0.5, %v6383_v59  ;;  %v6389_v53 = vadd.f32 1.0, %v9142_v23  ;;  %9155 = vtanh.f32 %v6175_v22  ;;  %v11815_v21 = vpop.f32.mrb[133].mxu1  ;;  %v9144_v3 = vpop.eup %9143 }
 0x557   : > { %v7922_v32 = vadd.f32 %v11756_v36, %v11625_v62  ;;  %v6497_v6 = vmul.f32 0.5, %v6385_v10  ;;  %9157 = vtanh.f32 %v6179_v4  ;;  %v7954_v16 = vadd.f32 %v11758_v50, %v11628_v63  ;;  %v11821_v56 = vpop.f32.mrb[134].mxu1  ;;  %v9146_v17 = vpop.eup %9145 }
 0x558   : > { %v7923_v42 = vadd.f32 %v11763_v7, %v11631_v54  ;;  %v7708_v38 = vpack.c.bf16 %v6495_v35, %v6494_v33  ;;  %v6501_v34 = vmul.f32 0.5, %v6389_v53  ;;  %v6391_v20 = vadd.f32 1.0, %v9144_v3  ;;  %v11823_v36 = vpop.f32.mrb[135].mxu1 }
 0x559   : > { %9159 = vtanh.f32 %v6181_v57  ;;  %v7709_v12 = vpack.c.bf16 %v6497_v6, %v6496_v9  ;;  %v6390_v30 = vadd.f32 1.0, %v9146_v17  ;;  %v6186_v48 = vmul.f32 0.5, %v7922_v32  ;;  %v9148_v55 = vpop.eup %9147 }
 0x55a   : > { %9161 = vtanh.f32 %v6180_v18  ;;  %6929 = vst [vmem:[%s11661_s22 + $0x118] sm:$0xff] %v7708_v38  ;;  %v6503_v50 = vmul.f32 0.5, %v6391_v20  ;;  %v6188_v46 = vmul.f32 0.5, %v7954_v16  ;;  %v6187_v7 = vmul.f32 0.5, %v7923_v42 }
 0x55b   : > { %9163 = vtanh.f32 %v6182_v26  ;;  %6930 = vst [vmem:[%s11661_s22 + $0x120] sm:$0xff] %v7709_v12  ;;  %v6502_v25 = vmul.f32 0.5, %v6390_v30  ;;  %v6392_v29 = vadd.f32 1.0, %v9148_v55  ;;  %v7955_v60 = vadd.f32 %v11765_v41, %v11634_v13 }
 0x55c   : > { %9165 = vtanh.f32 %v6186_v48  ;;  %v7924_v28 = vadd.f32 %v11767_v37, %v11625_v62  ;;  %v7956_v19 = vadd.f32 %v11769_v47, %v11628_v63  ;;  %v7925_v1 = vadd.f32 %v11771_v2, %v11631_v54 }
 0x55d   : > { %9167 = vtanh.f32 %v6188_v46  ;;  %v9150_v33 = vpop.eup %9149  ;;  %v7712_v24 = vpack.c.bf16 %v6502_v25, %v6501_v34  ;;  %v6504_v58 = vmul.f32 0.5, %v6392_v29  ;;  %v6189_v40 = vmul.f32 0.5, %v7955_v60  ;;  %v7762_v39 = vpop.f32.mrb[136].mxu1 }
 0x55e   : > { %9169 = vtanh.f32 %v6187_v7  ;;  %v9152_v52 = vpop.eup %9151  ;;  %v6396_v51 = vadd.f32 1.0, %v9150_v33  ;;  %v6193_v41 = vmul.f32 0.5, %v7924_v28  ;;  %v6195_v22 = vmul.f32 0.5, %v7956_v19  ;;  %v7763_v62 = vpop.f32.mrb[137].mxu1 }
 0x55f   : > { %v6194_v45 = vmul.f32 0.5, %v7925_v1  ;;  %v9154_v37 = vpop.eup %9153  ;;  %6933 = vst [vmem:[%s11661_s22 + $0x134] sm:$0xff] %v7712_v24  ;;  %v7713_v11 = vpack.c.bf16 %v6504_v58, %v6503_v50  ;;  %v6398_v63 = vadd.f32 1.0, %v9152_v52  ;;  %9171 = vtanh.f32 %v6189_v40  ;;  %v7765_v47 = vpop.f32.mrb[138].mxu1 }
 0x560   : > { %v7957_v54 = vadd.f32 %v11773_v43, %v11634_v13  ;;  %v9156_v2 = vpop.eup %9155  ;;  %v6508_v61 = vmul.f32 0.5, %v6396_v51  ;;  %v6397_v9 = vadd.f32 1.0, %v9154_v37  ;;  %9173 = vtanh.f32 %v6193_v41  ;;  %v7766_v8 = vpop.f32.mrb[139].mxu1 }
 0x561   : > { %v11840_v14 = vadd.f32 %v11786_v5, %v11783_v31  ;;  %v9158_v27 = vpop.eup %9157  ;;  %6934 = vst [vmem:[%s11661_s22 + $0x13c] sm:$0xff] %v7713_v11  ;;  %v6510_v59 = vmul.f32 0.5, %v6398_v63  ;;  %v6399_v4 = vadd.f32 1.0, %v9156_v2  ;;  %9175 = vtanh.f32 %v6195_v22 }
 0x562   : > { %v6196_v57 = vmul.f32 0.5, %v7957_v54  ;;  %v6509_v10 = vmul.f32 0.5, %v6397_v9  ;;  %v6403_v13 = vadd.f32 1.0, %v9158_v27  ;;  %9177 = vtanh.f32 %v6194_v45 }
 0x563   : > { %v9160_v23 = vpop.eup %9159  ;;  %v11845_v43 = vadd.f32 %v11799_v49, %v11795_v0  ;;  %v6511_v26 = vmul.f32 0.5, %v6399_v4  ;;  %v11849_v5 = vadd.f32 %v11815_v21, %v11811_v44  ;;  %v11853_v6 = vadd.f32 %v11823_v36, %v11821_v56 }
 0x564   : > { %v9162_v18 = vpop.eup %9161  ;;  %v6405_v31 = vadd.f32 1.0, %v9160_v23  ;;  %9179 = vtanh.f32 %v6196_v57  ;;  %v7716_v53 = vpack.c.bf16 %v6509_v10, %v6508_v61  ;;  %v6515_v32 = vmul.f32 0.5, %v6403_v13 }
 0x565   : > { %v9164_v35 = vpop.eup %9163  ;;  %v6404_v3 = vadd.f32 1.0, %v9162_v18  ;;  %v7717_v49 = vpack.c.bf16 %v6511_v26, %v6510_v59  ;;  %v11856_v17 = vadd.f32 %v7763_v62, %v7762_v39  ;;  %v7768_v38 = vpop.f32.mrb[140].mxu1  ;;  %v11865_v34 = vadd.f32 %v7766_v8, %v7765_v47 }
 0x566   : > { %v9166_v0 = vpop.eup %9165  ;;  %v6517_v16 = vmul.f32 0.5, %v6405_v31  ;;  %v6406_v42 = vadd.f32 1.0, %v9164_v35  ;;  %6937 = vst [vmem:[%s11661_s22 + $0x150] sm:$0xff] %v7716_v53  ;;  %v7769_v20 = vpop.f32.mrb[141].mxu1 }
 0x567   : > { %v9168_v44 = vpop.eup %9167  ;;  %v6516_v21 = vmul.f32 0.5, %v6404_v3  ;;  %v6410_v56 = vadd.f32 1.0, %v9166_v0  ;;  %6938 = vst [vmem:[%s11661_s22 + $0x158] sm:$0xff] %v7717_v49  ;;  %v11870_v48 = vadd.f32 %v7769_v20, %v7768_v38  ;;  %v7771_v55 = vpop.f32.mrb[142].mxu1 }
 0x568   : > { %v9170_v36 = vpop.eup %9169  ;;  %v6518_v12 = vmul.f32 0.5, %v6406_v42  ;;  %v6412_v30 = vadd.f32 1.0, %v9168_v44  ;;  %v7772_v25 = vpop.f32.mrb[143].mxu1 }
 0x569   : > { %v7720_v50 = vpack.c.bf16 %v6516_v21, %v6515_v32  ;;  %v6522_v46 = vmul.f32 0.5, %v6410_v56  ;;  %v6411_v7 = vadd.f32 1.0, %v9170_v36 }
 0x56a   : > { %9291 = shalt.err (!%p9288_p3)
}
 0x56b   : > { %s9292_s19 = scalar_lea.hbm %s11861_s12, 4096  ;;  %s9296_s29 = scalar_lea.hbm %s12101_s11, 8192 }
 0x56c   : > { %p9293_p4 = scmp.ne.s32.totalorder %s11861_s12, %s9292_s19  ;;  %p9297_p9 = scmp.lt.u32.totalorder %s11861_s12, %s12101_s11 }
 0x56d   : > { %p9298_p10 = scmp.lt.u32.totalorder %s9296_s29, %s9292_s19  ;;  %p9300_p12 = scmp.lt.u32.totalorder %s9292_s19, %s11861_s12 }
 0x56e   : > { %p9294_p7 = pnand %p9293_p4, %p9444_p5 }
 0x56f   : > { %p9299_p11 = por %p9298_p10, %p9297_p9 }
 0x570   : > { %p9295_p8 = pneg %p9294_p7 }
 0x571   : > { %p9301_p13 = por %p9300_p12, %p9299_p11 }
 0x573   : > { %p9302_p0 = pnand %p9301_p13, %p9295_p8 }
 0x575   : > { %9305 = shalt.err (!%p9302_p0)
}
 0x576   : > { %s9344_s25 = smov 256   ;;  %s9345_s14 = smov 16   ;;  %v9172_v29 = vpop.eup %9171  ;;  %v7721_v60 = vpack.c.bf16 %v6518_v12, %v6517_v16  ;;  %v11898_v28 = vadd.f32 %v7772_v25, %v7771_v55  ;;  %6941 = vst [vmem:[%s11661_s22 + $0x16c] sm:$0xff] %v7720_v50  ;;  %v6524_v1 = vmul.f32 0.5, %v6412_v30  ;;  %v6523_v33 = vmul.f32 0.5, %v6411_v7  ;;  %v7774_v37 = vpop.f32.mrb[144].mxu1 }
 0x577   : > { %8312 = dma.vmem_to_hbm [thread:$0]  (%p9444_p5), %s11867_s13, 4096, %s11861_s12, %s11874_s21, %s9344_s25, %s9344_s25, %s9345_s14   ;;  %v9174_v19 = vpop.eup %9173  ;;  %v6413_v24 = vadd.f32 1.0, %v9172_v29  ;;  %v7775_v47 = vpop.f32.mrb[145].mxu1  ;;  %v4283_v16 = vsub.s32 6, %v10295_v15  ;;  %v4275_v44 = vsub.s32 4, %v10295_v15  ;;  %v4279_v20 = vsub.s32 5, %v10295_v15 }
 0x578   : > { %v9176_v58 = vpop.eup %9175  ;;  %6942 = vst [vmem:[%s11661_s22 + $0x174] sm:$0xff] %v7721_v60  ;;  %v6417_v40 = vadd.f32 1.0, %v9174_v19  ;;  %v7724_v52 = vpack.c.bf16 %v6523_v33, %v6522_v46  ;;  %v11903_v61 = vadd.f32 %v7775_v47, %v7774_v37  ;;  %v7777_v9 = vpop.f32.mrb[146].mxu1  ;;  %v9277_v12 = vld [vmem:[%s12099_s9] sm:$0x7f]  ;;  %vm6891_vm1 = vcmask 125952  }
 0x579   : > { %v9178_v39 = vpop.eup %9177  ;;  %v6525_v51 = vmul.f32 0.5, %v6413_v24  ;;  %v6419_v41 = vadd.f32 1.0, %v9176_v58  ;;  %v7778_v27 = vpop.f32.mrb[147].mxu1  ;;  %v11926_v30 = vrot.slane %v9277_v12, %v4283_v16  ;;  %v11928_v50 = vrot.slane %v9277_v12, %v4275_v44 }
 0x57a   : > { %v9180_v22 = vpop.eup %9179  ;;  %v6529_v45 = vmul.f32 0.5, %v6417_v40  ;;  %v6418_v62 = vadd.f32 1.0, %v9178_v39  ;;  %6945 = vst [vmem:[%s11661_s22 + $0x188] sm:$0xff] %v7724_v52  ;;  %v11906_v4 = vadd.f32 %v7778_v27, %v7777_v9  ;;  %v7780_v23 = vpop.f32.mrb[148].mxu1  ;;  %v11930_v46 = vrot.slane %v9277_v12, %v4279_v20 }
 0x57b   : > { %v7725_v11 = vpack.c.bf16 %v6525_v51, %v6524_v1  ;;  %v6531_v63 = vmul.f32 0.5, %v6419_v41  ;;  %v6420_v54 = vadd.f32 1.0, %v9180_v22  ;;  %v7781_v10 = vpop.f32.mrb[149].mxu1  ;;  %v5929_v25 = vadd.f32 %v11840_v14, %v11926_v30 }
 0x57c   : > { %v6530_v2 = vmul.f32 0.5, %v6418_v62  ;;  %v11910_v13 = vadd.f32 %v7781_v10, %v7780_v23  ;;  %v7783_v18 = vpop.f32.mrb[150].mxu1  ;;  %v5932_v24 = vadd.f32 %v11845_v43, %v11926_v30  ;;  %v5937_v43 = vadd.f32 %v11849_v5, %v11926_v30 }
 0x57d   : > { %6946 = vst [vmem:[%s11661_s22 + $0x190] sm:$0xff] %v7725_v11  ;;  %v6532_v8 = vmul.f32 0.5, %v6420_v54  ;;  %v7784_v26 = vpop.f32.mrb[151].mxu1  ;;  %v11961_v12 = vadd.f32 %v11898_v28, %v11926_v30 }
 0x57e   : > { %v7728_v59 = vpack.c.bf16 %v6530_v2, %v6529_v45  ;;  %v11912_v31 = vadd.f32 %v7784_v26, %v7783_v18  ;;  %v7786_v35 = vpop.f32.mrb[152].mxu1 }
 0x57f   : > { %v7729_v57 = vpack.c.bf16 %v6532_v8, %v6531_v63  ;;  %v7787_v53 = vpop.f32.mrb[153].mxu1 }
 0x580   : > { %6949 = vst [vmem:[%s11661_s22 + $0x1a4] sm:$0xff] %v7728_v59  ;;  %v11914_v32 = vadd.f32 %v7787_v53, %v7786_v35  ;;  %v7789_v3 = vpop.f32.mrb[154].mxu1 }
 0x581   : > { %6950 = vst [vmem:[%s11661_s22 + $0x1ac] sm:$0xff] %v7729_v57  ;;  %v7790_v0 = vpop.f32.mrb[155].mxu1  ;;  %v5940_v57 = vadd.f32 %v11853_v6, %v11926_v30 }
 0x582   : > { %v11916_v49 = vadd.f32 %v7790_v0, %v7789_v3 }
 0x585   : > { %v7792_v42 = vpop.f32.mrb[156].mxu1 }
 0x586   : > { %v7793_v38 = vpop.f32.mrb[157].mxu1 }
 0x587   : > { %v11920_v21 = vadd.f32 %v7793_v38, %v7792_v42  ;;  %v7795_v56 = vpop.f32.mrb[158].mxu1  ;;  %v5945_v38 = vadd.f32 %v11856_v17, %v11926_v30  ;;  %v11965_v17 = vadd.f32 %v11903_v61, %v11926_v30  ;;  %v11981_v61 = vadd.f32 %v11914_v32, %v11926_v30 }
 0x588   : > { %v7796_v36 = vpop.f32.mrb[159].mxu1 }
 0x589   : > { %v7797_v55 = vadd.f32 %v7796_v36, %v7795_v56  ;;  %v5948_v56 = vadd.f32 %v11865_v34, %v11926_v30  ;;  %v11957_v36 = vadd.f32 %v11870_v48, %v11926_v30  ;;  %v11973_v34 = vadd.f32 %v11910_v13, %v11926_v30 }
 0x58b   : > { %v11933_v7 = vadd.f32 %v7797_v55, %v11926_v30 }
 0x58d   : > { %v5815_v29 = vpop.f32.mrb[96].mxu0  ;;  %v6025_v15 = vpop.f32.mrb[160].mxu1 }
 0x58e   : > { %v7958_v60 = vadd.f32 %v5815_v29, %v11928_v50  ;;  %v6026_v19 = vadd.f32 %v6025_v15, %v5929_v25  ;;  %v5817_v1 = vpop.f32.mrb[97].mxu0  ;;  %v6027_v33 = vpop.f32.mrb[161].mxu1  ;;  %v11969_v25 = vadd.f32 %v11906_v4, %v11926_v30 }
 0x58f   : > { %v7959_v58 = vadd.f32 %v5817_v1, %v11930_v46  ;;  %v5819_v40 = vpop.f32.mrb[98].mxu0  ;;  %v6028_v39 = vpop.f32.mrb[162].mxu1 }
 0x590   : > { %v6092_v52 = vmul.f32 0.5, %v7958_v60  ;;  %v6094_v51 = vmul.f32 0.5, %v6026_v19  ;;  %v7960_v41 = vadd.f32 %v5819_v40, %v11928_v50  ;;  %v6029_v22 = vadd.f32 %v6028_v39, %v5932_v24  ;;  %v5821_v14 = vpop.f32.mrb[99].mxu0  ;;  %v6030_v45 = vpop.f32.mrb[163].mxu1 }
 0x591   : > { %v6093_v62 = vmul.f32 0.5, %v7959_v58  ;;  %v7961_v37 = vadd.f32 %v5821_v14, %v11930_v46  ;;  %v11977_v60 = vadd.f32 %v11912_v31, %v11926_v30 }
 0x592   : > { %9181 = vtanh.f32 %v6092_v52  ;;  %v6099_v11 = vmul.f32 0.5, %v7960_v41  ;;  %v6101_v63 = vmul.f32 0.5, %v6029_v22 }
 0x593   : > { %9183 = vtanh.f32 %v6094_v51  ;;  %v6100_v54 = vmul.f32 0.5, %v7961_v37 }
 0x594   : > { %9185 = vtanh.f32 %v6093_v62 }
 0x595   : > { %9187 = vtanh.f32 %v6099_v11  ;;  %v5825_v47 = vpop.f32.mrb[100].mxu0  ;;  %v6033_v2 = vpop.f32.mrb[164].mxu1 }
 0x596   : > { %9189 = vtanh.f32 %v6101_v63  ;;  %v7962_v9 = vadd.f32 %v5825_v47, %v11928_v50  ;;  %v6034_v8 = vadd.f32 %v6033_v2, %v5937_v43  ;;  %v5827_v27 = vpop.f32.mrb[101].mxu0  ;;  %v6035_v59 = vpop.f32.mrb[165].mxu1 }
 0x597   : > { %9191 = vtanh.f32 %v6100_v54  ;;  %v7963_v23 = vadd.f32 %v5827_v27, %v11930_v46  ;;  %v5829_v10 = vpop.f32.mrb[102].mxu0  ;;  %v6036_v18 = vpop.f32.mrb[166].mxu1 }
 0x598   : > { %v6106_v26 = vmul.f32 0.5, %v7962_v9  ;;  %v6108_v35 = vmul.f32 0.5, %v6034_v8  ;;  %v7964_v5 = vadd.f32 %v5829_v10, %v11928_v50  ;;  %v6037_v53 = vadd.f32 %v6036_v18, %v5940_v57  ;;  %v5831_v3 = vpop.f32.mrb[103].mxu0  ;;  %v6038_v0 = vpop.f32.mrb[167].mxu1 }
 0x599   : > { %v6107_v16 = vmul.f32 0.5, %v7963_v23  ;;  %v7965_v42 = vadd.f32 %v5831_v3, %v11930_v46 }
 0x59a   : > { %9193 = vtanh.f32 %v6106_v26  ;;  %v6113_v6 = vmul.f32 0.5, %v7964_v5  ;;  %v6115_v44 = vmul.f32 0.5, %v6037_v53 }
 0x59b   : > { %9195 = vtanh.f32 %v6108_v35  ;;  %v6114_v20 = vmul.f32 0.5, %v7965_v42 }
 0x59c   : > { %v9182_v55 = vpop.eup %9181  ;;  %9197 = vtanh.f32 %v6107_v16  ;;  %v11992_v16 = vadd.f32 %v11916_v49, %v11926_v30 }
 0x59d   : > { %v9184_v48 = vpop.eup %9183  ;;  %v6316_v29 = vadd.f32 1.0, %v9182_v55  ;;  %9199 = vtanh.f32 %v6113_v6  ;;  %v5835_v15 = vpop.f32.mrb[104].mxu0 }
 0x59e   : > { %v6041_v28 = vpop.f32.mrb[168].mxu1  ;;  %v9186_v19 = vpop.eup %9185  ;;  %v6318_v4 = vadd.f32 1.0, %v9184_v48  ;;  %9201 = vtanh.f32 %v6115_v44  ;;  %v7966_v1 = vadd.f32 %v5835_v15, %v11928_v50 }
 0x59f   : > { %v6042_v13 = vadd.f32 %v6041_v28, %v5945_v38  ;;  %v5837_v33 = vpop.f32.mrb[105].mxu0  ;;  %v6043_v24 = vpop.f32.mrb[169].mxu1  ;;  %v6428_v40 = vmul.f32 0.5, %v6316_v29  ;;  %v6317_v39 = vadd.f32 1.0, %v9186_v19  ;;  %9203 = vtanh.f32 %v6114_v20 }
 0x5a0   : > { %v9188_v58 = vpop.eup %9187  ;;  %v7967_v52 = vadd.f32 %v5837_v33, %v11930_v46  ;;  %v5839_v31 = vpop.f32.mrb[106].mxu0  ;;  %v6430_v22 = vmul.f32 0.5, %v6318_v4  ;;  %v6120_v14 = vmul.f32 0.5, %v7966_v1 }
 0x5a1   : > { %v6044_v51 = vpop.f32.mrb[170].mxu1  ;;  %v9190_v41 = vpop.eup %9189  ;;  %v6323_v32 = vadd.f32 1.0, %v9188_v58  ;;  %v6122_v45 = vmul.f32 0.5, %v6042_v13  ;;  %v6429_v63 = vmul.f32 0.5, %v6317_v39  ;;  %v7968_v47 = vadd.f32 %v5839_v31, %v11928_v50 }
 0x5a2   : > { %v5841_v62 = vpop.f32.mrb[107].mxu0  ;;  %v6046_v37 = vpop.f32.mrb[171].mxu1  ;;  %v6325_v54 = vadd.f32 1.0, %v9190_v41  ;;  %v6121_v43 = vmul.f32 0.5, %v7967_v52  ;;  %v7671_v2 = vpack.c.bf16 %v6430_v22, %v6430_v22  ;;  %9205 = vtanh.f32 %v6120_v14 }
 0x5a3   : > { %v9192_v11 = vpop.eup %9191  ;;  %v6435_v9 = vmul.f32 0.5, %v6323_v32  ;;  %v7670_v27 = vpack.c.bf16 %v6429_v63, %v6428_v40  ;;  %9207 = vtanh.f32 %v6122_v45  ;;  %v6127_v57 = vmul.f32 0.5, %v7968_v47 }
 0x5a4   : > { %v6324_v8 = vadd.f32 1.0, %v9192_v11  ;;  %v6437_v59 = vmul.f32 0.5, %v6325_v54  ;;  %v9194_v23 = vpop.eup %9193  ;;  %6892 = vst.msk [vmem:[%s11661_s22 + $0x18] sm:$0xf] %vm6891_vm1, %v7671_v2  ;;  %9209 = vtanh.f32 %v6121_v43  ;;  %v6045_v18 = vadd.f32 %v6044_v51, %v5948_v56 }
 0x5a5   : > { %v7969_v26 = vadd.f32 %v5841_v62, %v11930_v46  ;;  %v9196_v35 = vpop.eup %9195  ;;  %6890 = vst [vmem:[%s11661_s22 + $0x10] sm:$0xff] %v7670_v27  ;;  %v6330_v53 = vadd.f32 1.0, %v9194_v23  ;;  %9211 = vtanh.f32 %v6127_v57  ;;  %v5845_v3 = vpop.f32.mrb[108].mxu0 }
 0x5a6   : > { %v6436_v10 = vmul.f32 0.5, %v6324_v8  ;;  %v7675_v5 = vpack.c.bf16 %v6437_v59, %v6437_v59  ;;  %v6049_v0 = vpop.f32.mrb[172].mxu1  ;;  %v9198_v42 = vpop.eup %9197  ;;  %v6332_v6 = vadd.f32 1.0, %v9196_v35  ;;  %v6129_v44 = vmul.f32 0.5, %v6045_v18 }
 0x5a7   : > { %v6128_v56 = vmul.f32 0.5, %v7969_v26  ;;  %v5847_v20 = vpop.f32.mrb[109].mxu0  ;;  %v6051_v55 = vpop.f32.mrb[173].mxu1  ;;  %v6442_v29 = vmul.f32 0.5, %v6330_v53  ;;  %v6331_v15 = vadd.f32 1.0, %v9198_v42  ;;  %v7970_v28 = vadd.f32 %v5845_v3, %v11928_v50 }
 0x5a8   : > { %v7674_v38 = vpack.c.bf16 %v6436_v10, %v6435_v9  ;;  %v9200_v48 = vpop.eup %9199  ;;  %6896 = vst.msk [vmem:[%s11661_s22 + $0x34] sm:$0xf] %vm6891_vm1, %v7675_v5  ;;  %v6050_v19 = vadd.f32 %v6049_v0, %v11957_v36  ;;  %v5849_v4 = vpop.f32.mrb[110].mxu0  ;;  %v6444_v13 = vmul.f32 0.5, %v6332_v6  ;;  %9213 = vtanh.f32 %v6129_v44 }
 0x5a9   : > { %v6052_v49 = vpop.f32.mrb[174].mxu1  ;;  %v9202_v1 = vpop.eup %9201  ;;  %v6337_v33 = vadd.f32 1.0, %v9200_v48  ;;  %v7971_v24 = vadd.f32 %v5847_v20, %v11930_v46  ;;  %v6443_v52 = vmul.f32 0.5, %v6331_v15  ;;  %9215 = vtanh.f32 %v6128_v56 }
 0x5aa   : > { %6895 = vst [vmem:[%s11661_s22 + $0x2c] sm:$0xff] %v7674_v38  ;;  %v5851_v58 = vpop.f32.mrb[111].mxu0  ;;  %v6054_v40 = vpop.f32.mrb[175].mxu1  ;;  %v6339_v31 = vadd.f32 1.0, %v9202_v1  ;;  %v6134_v51 = vmul.f32 0.5, %v7970_v28  ;;  %v7679_v41 = vpack.c.bf16 %v6444_v13, %v6444_v13  ;;  %v6136_v32 = vmul.f32 0.5, %v6050_v19 }
 0x5ab   : > { %v9204_v39 = vpop.eup %9203  ;;  %v6449_v36 = vmul.f32 0.5, %v6337_v33  ;;  %v7678_v14 = vpack.c.bf16 %v6443_v52, %v6442_v29  ;;  %v6135_v62 = vmul.f32 0.5, %v7971_v24  ;;  %v7972_v63 = vadd.f32 %v5849_v4, %v11928_v50 }
 0x5ac   : > { %v6338_v22 = vadd.f32 1.0, %v9204_v39  ;;  %v6451_v45 = vmul.f32 0.5, %v6339_v31  ;;  %9217 = vtanh.f32 %v6134_v51  ;;  %v9206_v37 = vpop.eup %9205  ;;  %6900 = vst.msk [vmem:[%s11661_s22 + $0x50] sm:$0xf] %vm6891_vm1, %v7679_v41  ;;  %v6053_v54 = vadd.f32 %v6052_v49, %v11961_v12 }
 0x5ad   : > { %9219 = vtanh.f32 %v6136_v32  ;;  %v9208_v43 = vpop.eup %9207  ;;  %6899 = vst [vmem:[%s11661_s22 + $0x48] sm:$0xff] %v7678_v14  ;;  %v6344_v2 = vadd.f32 1.0, %v9206_v37  ;;  %v7973_v9 = vadd.f32 %v5851_v58, %v11930_v46  ;;  %v5855_v8 = vpop.f32.mrb[112].mxu0  ;;  %v6141_v10 = vmul.f32 0.5, %v7972_v63 }
 0x5ae   : > { %v6450_v11 = vmul.f32 0.5, %v6338_v22  ;;  %v7683_v47 = vpack.c.bf16 %v6451_v45, %v6451_v45  ;;  %9221 = vtanh.f32 %v6135_v62  ;;  %v6057_v27 = vpop.f32.mrb[176].mxu1  ;;  %v9210_v59 = vpop.eup %9209  ;;  %v6346_v23 = vadd.f32 1.0, %v9208_v43 }
 0x5af   : > { %v6143_v18 = vmul.f32 0.5, %v6053_v54  ;;  %v5857_v26 = vpop.f32.mrb[113].mxu0  ;;  %v6059_v35 = vpop.f32.mrb[177].mxu1  ;;  %v6456_v12 = vmul.f32 0.5, %v6344_v2  ;;  %v6345_v53 = vadd.f32 1.0, %v9210_v59  ;;  %v6142_v3 = vmul.f32 0.5, %v7973_v9 }
 0x5b0   : > { %v7682_v57 = vpack.c.bf16 %v6450_v11, %v6449_v36  ;;  %v9212_v5 = vpop.eup %9211  ;;  %6904 = vst.msk [vmem:[%s11661_s22 + $0x6c] sm:$0xf] %vm6891_vm1, %v7683_v47  ;;  %v7974_v0 = vadd.f32 %v5855_v8, %v11928_v50  ;;  %v5859_v42 = vpop.f32.mrb[114].mxu0  ;;  %v6458_v6 = vmul.f32 0.5, %v6346_v23  ;;  %9223 = vtanh.f32 %v6141_v10 }
 0x5b1   : > { %v6060_v38 = vpop.f32.mrb[178].mxu1  ;;  %v6351_v44 = vadd.f32 1.0, %v9212_v5  ;;  %v6058_v56 = vadd.f32 %v6057_v27, %v11965_v17  ;;  %v5861_v20 = vpop.f32.mrb[115].mxu0  ;;  %v6457_v48 = vmul.f32 0.5, %v6345_v53  ;;  %9225 = vtanh.f32 %v6143_v18 }
 0x5b2   : > { %6903 = vst [vmem:[%s11661_s22 + $0x64] sm:$0xff] %v7682_v57  ;;  %v6062_v55 = vpop.f32.mrb[179].mxu1  ;;  %v6148_v29 = vmul.f32 0.5, %v7974_v0  ;;  %v7975_v15 = vadd.f32 %v5857_v26, %v11930_v46  ;;  %v9214_v28 = vpop.eup %9213  ;;  %v7687_v19 = vpack.c.bf16 %v6458_v6, %v6458_v6  ;;  %9227 = vtanh.f32 %v6142_v3 }
 0x5b3   : > { %v6463_v4 = vmul.f32 0.5, %v6351_v44  ;;  %v6150_v49 = vmul.f32 0.5, %v6058_v56  ;;  %v9216_v1 = vpop.eup %9215  ;;  %v7686_v13 = vpack.c.bf16 %v6457_v48, %v6456_v12  ;;  %v6353_v33 = vadd.f32 1.0, %v9214_v28 }
 0x5b4   : > { %9229 = vtanh.f32 %v6148_v29  ;;  %v6149_v24 = vmul.f32 0.5, %v7975_v15  ;;  %6908 = vst.msk [vmem:[%s11661_s22 + $0x88] sm:$0xf] %vm6891_vm1, %v7687_v19  ;;  %v6352_v17 = vadd.f32 1.0, %v9216_v1  ;;  %v7976_v58 = vadd.f32 %v5859_v42, %v11928_v50 }
 0x5b5   : > { %9231 = vtanh.f32 %v6150_v49  ;;  %v6061_v40 = vadd.f32 %v6060_v38, %v11969_v25  ;;  %6907 = vst [vmem:[%s11661_s22 + $0x80] sm:$0xff] %v7686_v13  ;;  %v6465_v52 = vmul.f32 0.5, %v6353_v33  ;;  %v7977_v31 = vadd.f32 %v5861_v20, %v11930_v46  ;;  %v5865_v51 = vpop.f32.mrb[116].mxu0  ;;  %v6065_v41 = vpop.f32.mrb[180].mxu1 }
 0x5b6   : > { %v9218_v39 = vpop.eup %9217  ;;  %9233 = vtanh.f32 %v6149_v24  ;;  %v12020_v36 = vadd.f32 %v11920_v21, %v11926_v30  ;;  %v6464_v32 = vmul.f32 0.5, %v6352_v17  ;;  %v6155_v45 = vmul.f32 0.5, %v7976_v58  ;;  %v5867_v37 = vpop.f32.mrb[117].mxu0 }
 0x5b7   : > { %v9220_v22 = vpop.eup %9219  ;;  %v6358_v14 = vadd.f32 1.0, %v9218_v39  ;;  %v6157_v62 = vmul.f32 0.5, %v6061_v40  ;;  %v6067_v25 = vpop.f32.mrb[181].mxu1  ;;  %v7691_v63 = vpack.c.bf16 %v6465_v52, %v6465_v52  ;;  %v6156_v43 = vmul.f32 0.5, %v7977_v31 }
 0x5b8   : > { %v9222_v11 = vpop.eup %9221  ;;  %v6360_v54 = vadd.f32 1.0, %v9220_v22  ;;  %v7978_v47 = vadd.f32 %v5865_v51, %v11928_v50  ;;  %v5869_v2 = vpop.f32.mrb[118].mxu0  ;;  %v7690_v8 = vpack.c.bf16 %v6464_v32, %v6463_v4  ;;  %9235 = vtanh.f32 %v6155_v45 }
 0x5b9   : > { %v6068_v9 = vpop.f32.mrb[182].mxu1  ;;  %v6470_v21 = vmul.f32 0.5, %v6358_v14  ;;  %v6359_v30 = vadd.f32 1.0, %v9222_v11  ;;  %v5871_v27 = vpop.f32.mrb[119].mxu0  ;;  %6912 = vst.msk [vmem:[%s11661_s22 + $0xa4] sm:$0xf] %vm6891_vm1, %v7691_v63  ;;  %9237 = vtanh.f32 %v6157_v62  ;;  %v6066_v10 = vadd.f32 %v6065_v41, %v11973_v34 }
 0x5ba   : > { %v6070_v59 = vpop.f32.mrb[183].mxu1  ;;  %v6472_v57 = vmul.f32 0.5, %v6360_v54  ;;  %v6162_v23 = vmul.f32 0.5, %v7978_v47  ;;  %v9224_v18 = vpop.eup %9223  ;;  %6911 = vst [vmem:[%s11661_s22 + $0x9c] sm:$0xff] %v7690_v8  ;;  %9239 = vtanh.f32 %v6156_v43  ;;  %v7979_v35 = vadd.f32 %v5867_v37, %v11930_v46 }
 0x5bb   : > { %v6471_v26 = vmul.f32 0.5, %v6359_v30  ;;  %v7980_v5 = vadd.f32 %v5869_v2, %v11928_v50  ;;  %v9226_v12 = vpop.eup %9225  ;;  %v6365_v3 = vadd.f32 1.0, %v9224_v18  ;;  %v6164_v0 = vmul.f32 0.5, %v6066_v10 }
 0x5bc   : > { %v7695_v53 = vpack.c.bf16 %v6472_v57, %v6472_v57  ;;  %9241 = vtanh.f32 %v6162_v23  ;;  %v9228_v42 = vpop.eup %9227  ;;  %v6367_v6 = vadd.f32 1.0, %v9226_v12  ;;  %v6163_v44 = vmul.f32 0.5, %v7979_v35 }
 0x5bd   : > { %v7694_v38 = vpack.c.bf16 %v6471_v26, %v6470_v21  ;;  %v6169_v34 = vmul.f32 0.5, %v7980_v5  ;;  %v6477_v20 = vmul.f32 0.5, %v6365_v3  ;;  %v6366_v55 = vadd.f32 1.0, %v9228_v42  ;;  %v5875_v29 = vpop.f32.mrb[120].mxu0  ;;  %v6073_v15 = vpop.f32.mrb[184].mxu1 }
 0x5be   : > { %v9230_v56 = vpop.eup %9229  ;;  %6916 = vst.msk [vmem:[%s11661_s22 + $0xc0] sm:$0xf] %vm6891_vm1, %v7695_v53  ;;  %9243 = vtanh.f32 %v6164_v0  ;;  %v6069_v48 = vadd.f32 %v6068_v9, %v11977_v60  ;;  %v6479_v19 = vmul.f32 0.5, %v6367_v6  ;;  %v7981_v49 = vadd.f32 %v5871_v27, %v11930_v46  ;;  %v5877_v1 = vpop.f32.mrb[121].mxu0 }
 0x5bf   : > { %v9232_v28 = vpop.eup %9231  ;;  %6915 = vst [vmem:[%s11661_s22 + $0xb8] sm:$0xff] %v7694_v38  ;;  %v6372_v4 = vadd.f32 1.0, %v9230_v56  ;;  %9245 = vtanh.f32 %v6163_v44  ;;  %v6075_v13 = vpop.f32.mrb[185].mxu1  ;;  %v6478_v24 = vmul.f32 0.5, %v6366_v55  ;;  %v7982_v45 = vadd.f32 %v5875_v29, %v11928_v50 }
 0x5c0   : > { %v9234_v33 = vpop.eup %9233  ;;  %v6374_v17 = vadd.f32 1.0, %v9232_v28  ;;  %9247 = vtanh.f32 %v6169_v34  ;;  %v6171_v58 = vmul.f32 0.5, %v6069_v48  ;;  %v5879_v40 = vpop.f32.mrb[122].mxu0  ;;  %v7699_v60 = vpack.c.bf16 %v6479_v19, %v6479_v19 }
 0x5c1   : > { %v6076_v39 = vpop.f32.mrb[186].mxu1  ;;  %v6484_v52 = vmul.f32 0.5, %v6372_v4  ;;  %v6373_v31 = vadd.f32 1.0, %v9234_v33  ;;  %v6170_v51 = vmul.f32 0.5, %v7981_v49  ;;  %v5881_v41 = vpop.f32.mrb[123].mxu0  ;;  %v7698_v32 = vpack.c.bf16 %v6478_v24, %v6477_v20 }
 0x5c2   : > { %v6078_v22 = vpop.f32.mrb[187].mxu1  ;;  %v6486_v14 = vmul.f32 0.5, %v6374_v17  ;;  %9249 = vtanh.f32 %v6171_v58  ;;  %v9236_v62 = vpop.eup %9235  ;;  %6920 = vst.msk [vmem:[%s11661_s22 + $0xdc] sm:$0xf] %vm6891_vm1, %v7699_v60  ;;  %v6074_v25 = vadd.f32 %v6073_v15, %v11981_v61  ;;  %v7983_v11 = vadd.f32 %v5877_v1, %v11930_v46 }
 0x5c3   : > { %v6485_v37 = vmul.f32 0.5, %v6373_v31  ;;  %9251 = vtanh.f32 %v6170_v51  ;;  %v9238_v63 = vpop.eup %9237  ;;  %6919 = vst [vmem:[%s11661_s22 + $0xd4] sm:$0xff] %v7698_v32  ;;  %v6379_v43 = vadd.f32 1.0, %v9236_v62  ;;  %v6176_v47 = vmul.f32 0.5, %v7982_v45 }
 0x5c4   : > { %v7703_v54 = vpack.c.bf16 %v6486_v14, %v6486_v14  ;;  %v7984_v2 = vadd.f32 %v5879_v40, %v11928_v50  ;;  %v9240_v9 = vpop.eup %9239  ;;  %v6381_v21 = vadd.f32 1.0, %v9238_v63  ;;  %v6178_v30 = vmul.f32 0.5, %v6074_v25 }
 0x5c5   : > { %v7702_v8 = vpack.c.bf16 %v6485_v37, %v6484_v52  ;;  %v6177_v27 = vmul.f32 0.5, %v7983_v11  ;;  %v6491_v57 = vmul.f32 0.5, %v6379_v43  ;;  %v6380_v61 = vadd.f32 1.0, %v9240_v9  ;;  %v5885_v10 = vpop.f32.mrb[124].mxu0  ;;  %v6081_v18 = vpop.f32.mrb[188].mxu1 }
 0x5c6   : > { %v9242_v59 = vpop.eup %9241  ;;  %6924 = vst.msk [vmem:[%s11661_s22 + $0xf8] sm:$0xf] %vm6891_vm1, %v7703_v54  ;;  %9253 = vtanh.f32 %v6176_v47  ;;  %v6183_v23 = vmul.f32 0.5, %v7984_v2  ;;  %v6493_v26 = vmul.f32 0.5, %v6381_v21  ;;  %v6077_v5 = vadd.f32 %v6076_v39, %v11992_v16  ;;  %v5887_v12 = vpop.f32.mrb[125].mxu0 }
 0x5c7   : > { %6923 = vst [vmem:[%s11661_s22 + $0xf0] sm:$0xff] %v7702_v8  ;;  %v6386_v35 = vadd.f32 1.0, %v9242_v59  ;;  %9255 = vtanh.f32 %v6178_v30  ;;  %v6083_v53 = vpop.f32.mrb[189].mxu1  ;;  %v6492_v0 = vmul.f32 0.5, %v6380_v61  ;;  %v7985_v42 = vadd.f32 %v5881_v41, %v11930_v46  ;;  %v5889_v6 = vpop.f32.mrb[126].mxu0 }
 0x5c8   : > { %v9244_v3 = vpop.eup %9243  ;;  %9257 = vtanh.f32 %v6177_v27  ;;  %v7986_v38 = vadd.f32 %v5885_v10, %v11928_v50  ;;  %v6084_v44 = vpop.f32.mrb[190].mxu1  ;;  %v7707_v56 = vpack.c.bf16 %v6493_v26, %v6493_v26  ;;  %v6185_v19 = vmul.f32 0.5, %v6077_v5 }
 0x5c9   : > { %v9246_v34 = vpop.eup %9245  ;;  %v6498_v20 = vmul.f32 0.5, %v6386_v35  ;;  %v6388_v55 = vadd.f32 1.0, %v9244_v3  ;;  %9259 = vtanh.f32 %v6183_v23  ;;  %v5891_v48 = vpop.f32.mrb[127].mxu0  ;;  %v7706_v15 = vpack.c.bf16 %v6492_v0, %v6491_v57 }
 0x5ca   : > { %v6086_v16 = vpop.f32.mrb[191].mxu1  ;;  %v9248_v29 = vpop.eup %9247  ;;  %v6387_v28 = vadd.f32 1.0, %v9246_v34  ;;  %v6184_v4 = vmul.f32 0.5, %v7985_v42  ;;  %6928 = vst.msk [vmem:[%s11661_s22 + $0x114] sm:$0xf] %vm6891_vm1, %v7707_v56  ;;  %v6190_v13 = vmul.f32 0.5, %v7986_v38  ;;  %v6082_v33 = vadd.f32 %v6081_v18, %v12020_v36 }
 0x5cb   : > { %v6500_v49 = vmul.f32 0.5, %v6388_v55  ;;  %v6393_v1 = vadd.f32 1.0, %v9248_v29  ;;  %6927 = vst [vmem:[%s11661_s22 + $0x10c] sm:$0xff] %v7706_v15  ;;  %9261 = vtanh.f32 %v6185_v19  ;;  %v7987_v58 = vadd.f32 %v5887_v12, %v11930_v46 }
 0x5cc   : > { %v9250_v24 = vpop.eup %9249  ;;  %v6499_v17 = vmul.f32 0.5, %v6387_v28  ;;  %v7988_v40 = vadd.f32 %v5889_v6, %v11928_v50  ;;  %9263 = vtanh.f32 %v6184_v4  ;;  %v6192_v22 = vmul.f32 0.5, %v6082_v33 }
 0x5cd   : > { %v9252_v39 = vpop.eup %9251  ;;  %v7711_v60 = vpack.c.bf16 %v6500_v49, %v6500_v49  ;;  %v6505_v52 = vmul.f32 0.5, %v6393_v1  ;;  %v6395_v31 = vadd.f32 1.0, %v9250_v24  ;;  %9265 = vtanh.f32 %v6190_v13 }
 0x5ce   : > { %v7710_v51 = vpack.c.bf16 %v6499_v17, %v6498_v20  ;;  %v6394_v41 = vadd.f32 1.0, %v9252_v39  ;;  %v6191_v32 = vmul.f32 0.5, %v7987_v58  ;;  %v6197_v14 = vmul.f32 0.5, %v7988_v40 }
 0x5cf   : > { %6932 = vst.msk [vmem:[%s11661_s22 + $0x130] sm:$0xf] %vm6891_vm1, %v7711_v60  ;;  %v6507_v36 = vmul.f32 0.5, %v6395_v31  ;;  %v6085_v45 = vadd.f32 %v6084_v44, %v11933_v7  ;;  %9267 = vtanh.f32 %v6192_v22  ;;  %v7989_v37 = vadd.f32 %v5891_v48, %v11930_v46 }
 0x5d0   : > { %v9254_v62 = vpop.eup %9253  ;;  %6931 = vst [vmem:[%s11661_s22 + $0x128] sm:$0xff] %v7710_v51  ;;  %v6506_v50 = vmul.f32 0.5, %v6394_v41  ;;  %9269 = vtanh.f32 %v6191_v32 }
 0x5d1   : > { %v9256_v25 = vpop.eup %9255  ;;  %v7715_v11 = vpack.c.bf16 %v6507_v36, %v6507_v36  ;;  %v6400_v63 = vadd.f32 1.0, %v9254_v62  ;;  %v6199_v54 = vmul.f32 0.5, %v6085_v45  ;;  %9271 = vtanh.f32 %v6197_v14 }
 0x5d2   : > { %v9258_v43 = vpop.eup %9257  ;;  %v7714_v47 = vpack.c.bf16 %v6506_v50, %v6505_v52  ;;  %v6402_v2 = vadd.f32 1.0, %v9256_v25  ;;  %v6198_v9 = vmul.f32 0.5, %v7989_v37 }
 0x5d3   : > { %v9260_v8 = vpop.eup %9259  ;;  %6936 = vst.msk [vmem:[%s11661_s22 + $0x14c] sm:$0xf] %vm6891_vm1, %v7715_v11  ;;  %v6512_v7 = vmul.f32 0.5, %v6400_v63  ;;  %v6401_v21 = vadd.f32 1.0, %v9258_v43  ;;  %9273 = vtanh.f32 %v6199_v54 }
 0x5d4   : > { %6935 = vst [vmem:[%s11661_s22 + $0x144] sm:$0xff] %v7714_v47  ;;  %v6514_v46 = vmul.f32 0.5, %v6402_v2  ;;  %v6407_v30 = vadd.f32 1.0, %v9260_v8  ;;  %9275 = vtanh.f32 %v6198_v9 }
 0x5d5   : > { %v6513_v27 = vmul.f32 0.5, %v6401_v21  ;;  %v9262_v59 = vpop.eup %9261 }
 0x5d6   : > { %v7719_v57 = vpack.c.bf16 %v6514_v46, %v6514_v46  ;;  %v9264_v61 = vpop.eup %9263  ;;  %v6409_v10 = vadd.f32 1.0, %v9262_v59  ;;  %v6519_v26 = vmul.f32 0.5, %v6407_v30 }
 0x5d7   : > { %v7718_v23 = vpack.c.bf16 %v6513_v27, %v6512_v7  ;;  %v9266_v18 = vpop.eup %9265  ;;  %v6408_v35 = vadd.f32 1.0, %v9264_v61 }
 0x5d8   : > { %6940 = vst.msk [vmem:[%s11661_s22 + $0x168] sm:$0xf] %vm6891_vm1, %v7719_v57  ;;  %v6521_v5 = vmul.f32 0.5, %v6409_v10  ;;  %v6414_v12 = vadd.f32 1.0, %v9266_v18 }
 0x5d9   : > { %6939 = vst [vmem:[%s11661_s22 + $0x160] sm:$0xff] %v7718_v23  ;;  %v9268_v53 = vpop.eup %9267  ;;  %v6520_v3 = vmul.f32 0.5, %v6408_v35 }
 0x5da   : > { %v9270_v0 = vpop.eup %9269  ;;  %v7723_v42 = vpack.c.bf16 %v6521_v5, %v6521_v5  ;;  %v6416_v38 = vadd.f32 1.0, %v9268_v53  ;;  %v6526_v34 = vmul.f32 0.5, %v6414_v12 }
 0x5db   : > { %v9272_v6 = vpop.eup %9271  ;;  %v7722_v44 = vpack.c.bf16 %v6520_v3, %v6519_v26  ;;  %v6415_v56 = vadd.f32 1.0, %v9270_v0 }
 0x5dc   : > { %6944 = vst.msk [vmem:[%s11661_s22 + $0x184] sm:$0xf] %vm6891_vm1, %v7723_v42  ;;  %v6528_v55 = vmul.f32 0.5, %v6416_v38  ;;  %v6421_v48 = vadd.f32 1.0, %v9272_v6 }
 0x5dd   : > { %v9274_v20 = vpop.eup %9273  ;;  %6943 = vst [vmem:[%s11661_s22 + $0x17c] sm:$0xff] %v7722_v44  ;;  %v6527_v29 = vmul.f32 0.5, %v6415_v56 }
 0x5de   : > { %v9276_v16 = vpop.eup %9275  ;;  %v6423_v15 = vadd.f32 1.0, %v9274_v20  ;;  %v7727_v28 = vpack.c.bf16 %v6528_v55, %v6528_v55  ;;  %v6533_v19 = vmul.f32 0.5, %v6421_v48 }
 0x5df   : > { %v6422_v4 = vadd.f32 1.0, %v9276_v16  ;;  %v7726_v49 = vpack.c.bf16 %v6527_v29, %v6526_v34 }
 0x5e0   : > { %v6535_v1 = vmul.f32 0.5, %v6423_v15  ;;  %6948 = vst.msk [vmem:[%s11661_s22 + $0x1a0] sm:$0xf] %vm6891_vm1, %v7727_v28 }
 0x5e1   : > { %v6534_v13 = vmul.f32 0.5, %v6422_v4  ;;  %6947 = vst [vmem:[%s11661_s22 + $0x198] sm:$0xff] %v7726_v49 }
 0x5e2   : > { %v7731_v33 = vpack.c.bf16 %v6535_v1, %v6535_v1 }
 0x5e3   : > { %v7730_v24 = vpack.c.bf16 %v6534_v13, %v6533_v19 }
 0x5e4   : > { %6952 = vst.msk [vmem:[%s11661_s22 + $0x1bc] sm:$0xf] %vm6891_vm1, %v7731_v33 }
 0x5e5   : > { %6951 = vst [vmem:[%s11661_s22 + $0x1b4] sm:$0xff] %v7730_v24 }
 0x5e6 PF: > { %p8318_p5 = scmp.ge.s32.totalorder %s9340_s20, 2  ;;  %s7002_s13 = sand.u32 1, %s9328_s17  }
 0x5e7   : > { %s7003_s21 = scalar_lea.sflag [#allocation3], %s7002_s13 }
 0x5e8   : > { %p8315_p1 = pnand %p8318_p5, %p9448_p6 }
 0x5ea   : > { %9323 = dma.done.wait (!%p8315_p1), %s7003_s21, 4096  }
 0x5eb   : > { %9325 = vsyncadd (!%p8315_p1), %s7003_s21, 4294963200  ;;  %s12110_s20 = sld [smem:[#allocation6_spill]]  ;;  %s12111_s15 = sld [smem:[#allocation5_spill]] }
 0x5ec   : > { %s12112_s19 = sld [smem:[#allocation7_spill]]  ;;  %s12113_s17 = smov %s9332_s18 }
 0x5f1   : > { %p22_p2 = scmp.ge.s32.totalorder %s12110_s20, 4   ;;  %s12114_s18 = smov %s12111_s15 }
 0x5f3   :  { %24 = sbr.rel (!%p22_p2) target bundleno = 3 (0x3), region = 110 }
 0x5fa   :  { %7008 = vsyncpa [#allocation3], 1 }
 0x5fb   :  { %7010 = vsyncpa [#allocation3 + $0x1], 1 }

</bundles_post_ra>
